<compile_context>
chip_gen: v7x
topology: tpu7x:2x2x1
jax: 0.10.0
libtpu: 0.0.40
codegen_flags: <defaults>
</compile_context>

<pallas_src>
import functools

import jax
import jax.numpy as jnp
from jax import lax
from jax.experimental import pallas as pl
from jax.experimental.pallas import tpu as pltpu

NEG_SLOPE = 0.2
_PAR = pltpu.CompilerParams(dimension_semantics=("parallel",))


def _lrelu(x):
    return jnp.where(x > 0, x, NEG_SLOPE * x)


# ---------------------------------------------------------------------------
# Fused Residual block: 1x1 conv -> LReLU -> 3x3 conv(pad=1) -> LReLU -> 1x1
# conv + identity skip, all in one kernel.  One image per grid step.
# ---------------------------------------------------------------------------
def _make_residual_kernel(H, W, C, Hd):
    HW = H * W

    def kernel(x_ref, w1_ref, b1_ref, w3_ref, b3_ref, w5_ref, b5_ref,
               o_ref, hp_ref):
        x = x_ref[...]                                              # (HW, C)

        # --- 1x1 conv + LeakyReLU -----------------------------------------
        h1 = jnp.dot(x, w1_ref[...], preferred_element_type=jnp.float32)
        h1 = _lrelu(h1 + b1_ref[...])                               # (HW, Hd)

        # --- 3x3 conv (pad=1) from a VMEM-resident padded buffer -----------
        # hp holds the hidden activation flattened row-major with zero image
        # rows of padding above/below (plus slack), so every 3x3 tap is a
        # static sublane-offset window of hp.  Horizontal (x +/- 1) wrap
        # across row boundaries is removed with a per-column mask.
        hp_ref[...] = jnp.zeros(hp_ref.shape, hp_ref.dtype)
        hp_ref[pl.ds(2 * W, HW), :] = h1

        col = lax.broadcasted_iota(jnp.int32, (HW, Hd), 0) % W
        left_ok = col >= 1            # reading column x-1 is valid
        right_ok = col <= W - 2       # reading column x+1 is valid

        acc = jnp.zeros((HW, Hd), jnp.float32)
        for ky in range(3):
            for kx in range(3):
                start = (ky + 1) * W + (kx - 1)
                win = hp_ref[pl.ds(start, HW), :]                   # (HW, Hd)
                if kx == 0:
                    win = jnp.where(left_ok, win, 0.0)
                elif kx == 2:
                    win = jnp.where(right_ok, win, 0.0)
                acc = acc + jnp.dot(win, w3_ref[ky * 3 + kx],
                                    preferred_element_type=jnp.float32)
        h3 = _lrelu(acc + b3_ref[...])                              # (HW, Hd)

        # --- final 1x1 conv + residual skip ---------------------------------
        y = jnp.dot(h3, w5_ref[...], preferred_element_type=jnp.float32)
        o_ref[...] = (y + b5_ref[...] + x).astype(o_ref.dtype)

    return kernel


def residual_block(x, p):
    """Residual(dim, dim) on an NHWC tensor, one fused pallas_call."""
    N, H, W, C = x.shape
    Hd = p["w1"].shape[1]
    HW = H * W
    x2 = x.reshape(N * HW, C)                                       # free reshape

    out2 = pl.pallas_call(
        _make_residual_kernel(H, W, C, Hd),
        out_shape=jax.ShapeDtypeStruct((N * HW, C), x.dtype),
        grid=(N,),
        in_specs=[
            pl.BlockSpec((HW, C), lambda i: (i, 0)),
            pl.BlockSpec((C, Hd), lambda i: (0, 0)),
            pl.BlockSpec((1, Hd), lambda i: (0, 0)),
            pl.BlockSpec((9, Hd, Hd), lambda i: (0, 0, 0)),
            pl.BlockSpec((1, Hd), lambda i: (0, 0)),
            pl.BlockSpec((Hd, C), lambda i: (0, 0)),
            pl.BlockSpec((1, C), lambda i: (0, 0)),
        ],
        out_specs=pl.BlockSpec((HW, C), lambda i: (i, 0)),
        scratch_shapes=[pltpu.VMEM((HW + 4 * W, Hd), jnp.float32)],
        compiler_params=_PAR,
    )(x2, p["w1"], p["b1"], p["w3r"], p["b3"], p["w5"], p["b5"])
    return out2.reshape(N, H, W, C)


# ---------------------------------------------------------------------------
# MaxPool2d(2, 2): only free reshapes outside; deinterleave in VMEM.
# Input view (N*H/2, 2, W/2, 2*C): dim 1 = vertical pair, last-dim halves =
# horizontal pair.
# ---------------------------------------------------------------------------
def _make_maxpool_kernel(C):
    def kernel(x_ref, o_ref):
        xv = x_ref[...]                                  # (H2, 2, W2, 2C)
        v = jnp.maximum(xv[:, 0], xv[:, 1])              # (H2, W2, 2C)
        o_ref[...] = jnp.maximum(v[:, :, :C], v[:, :, C:])
    return kernel


def maxpool2x2(x):
    N, H, W, C = x.shape
    H2, W2 = H // 2, W // 2
    x4 = x.reshape(N * H2, 2, W2, 2 * C)                 # free reshape
    out = pl.pallas_call(
        _make_maxpool_kernel(C),
        out_shape=jax.ShapeDtypeStruct((N * H2, W2, C), x.dtype),
        grid=(N,),
        in_specs=[pl.BlockSpec((H2, 2, W2, 2 * C), lambda i: (i, 0, 0, 0))],
        out_specs=pl.BlockSpec((H2, W2, C), lambda i: (i, 0, 0)),
        compiler_params=_PAR,
    )(x4)
    return out.reshape(N, H2, W2, C)


# ---------------------------------------------------------------------------
# Nearest 2x upsample of low3 fused with the hourglass "up1 + up2" add.
# Interleaved output is written directly with one broadcast store.
# ---------------------------------------------------------------------------
def _upsample_add_kernel(up_ref, low_ref, o_ref):
    low = low_ref[...]                                   # (H2, W2, C)
    low2 = jnp.concatenate([low, low], axis=-1)          # (H2, W2, 2C): x-duplicate
    o_ref[...] = up_ref[...] + low2[:, None, :, :]       # single broadcast store


def upsample2x_add(low3, up1):
    N, H2, W2, C = low3.shape
    H, W = 2 * H2, 2 * W2
    up4 = up1.reshape(N * H2, 2, W2, 2 * C)              # free reshape
    low3_3 = low3.reshape(N * H2, W2, C)                 # free reshape
    out4 = pl.pallas_call(
        _upsample_add_kernel,
        out_shape=jax.ShapeDtypeStruct((N * H2, 2, W2, 2 * C), up1.dtype),
        grid=(N,),
        in_specs=[pl.BlockSpec((H2, 2, W2, 2 * C), lambda i: (i, 0, 0, 0)),
                  pl.BlockSpec((H2, W2, C), lambda i: (i, 0, 0))],
        out_specs=pl.BlockSpec((H2, 2, W2, 2 * C), lambda i: (i, 0, 0, 0)),
        compiler_params=_PAR,
    )(up4, low3_3)
    return out4.reshape(N, H, W, C)


# ----------------------------- HourGlass forward -----------------------------

def _hourglass(x, params, n):
    up1 = residual_block(x, params[f"res{n}_1"])
    low1 = maxpool2x2(x)
    low1 = residual_block(low1, params[f"res{n}_2"])
    if n > 1:
        low2 = _hourglass(low1, params, n - 1)
    else:
        low2 = residual_block(low1, params["res_center"])
    low3 = residual_block(low2, params[f"res{n}_3"])
    return upsample2x_add(low3, up1)                     # out = up1 + upsample(low3)


@functools.partial(jax.jit, static_argnums=2)
def hourglass_forward(x, params, n):
    return _hourglass(x, params, n)


# ------------------------------ parameter init -------------------------------

def init_residual_params(key, c, scale=0.1):
    hd = c // 2
    ks = jax.random.split(key, 6)
    w1 = scale * jax.random.normal(ks[0], (c, hd), jnp.float32)
    b1 = scale * jax.random.normal(ks[1], (1, hd), jnp.float32)
    w3 = scale * jax.random.normal(ks[2], (3, 3, hd, hd), jnp.float32)   # HWIO
    b3 = scale * jax.random.normal(ks[3], (1, hd), jnp.float32)
    w5 = scale * jax.random.normal(ks[4], (hd, c), jnp.float32)
    b5 = scale * jax.random.normal(ks[5], (1, c), jnp.float32)
    return {"w1": w1, "b1": b1, "w3": w3, "w3r": w3.reshape(9, hd, hd),
            "b3": b3, "w5": w5, "b5": b5}


def init_hourglass_params(key, dim, n):
    names = []
    for lvl in range(n, 0, -1):
        names += [f"res{lvl}_1", f"res{lvl}_2", f"res{lvl}_3"]
    names += ["res_center"]
    keys = jax.random.split(key, len(names))
    return {name: init_residual_params(k, dim) for k, name in zip(keys, names)}


# ------------------------------ pure-JAX reference ---------------------------

def _conv_ref(x, w, padding):
    return lax.conv_general_dilated(
        x, w, (1, 1), padding,
        dimension_numbers=("NHWC", "HWIO", "NHWC"),
        precision=lax.Precision.HIGHEST)


def residual_ref(x, p):
    h = _lrelu(_conv_ref(x, p["w1"][None, None], "VALID") + p["b1"][0])
    h = _lrelu(_conv_ref(h, p["w3"], ((1, 1), (1, 1))) + p["b3"][0])
    y = _conv_ref(h, p["w5"][None, None], "VALID") + p["b5"][0]
    return y + x


def maxpool_ref(x):
    return lax.reduce_window(x, -jnp.inf, lax.max, (1, 2, 2, 1), (1, 2, 2, 1), "VALID")


def upsample_ref(x):
    return jnp.repeat(jnp.repeat(x, 2, axis=1), 2, axis=2)


def hourglass_ref(x, params, n):
    up1 = residual_ref(x, params[f"res{n}_1"])
    low1 = residual_ref(maxpool_ref(x), params[f"res{n}_2"])
    low2 = hourglass_ref(low1, params, n - 1) if n > 1 else residual_ref(low1, params["res_center"])
    low3 = residual_ref(low2, params[f"res{n}_3"])
    return up1 + upsample_ref(low3)


# ----------------------------------- main ------------------------------------

if __name__ == "__main__":
    key = jax.random.PRNGKey(0)
    kx, kp = jax.random.split(key)

    # HourGlassBlock(dim=8, n=2); PyTorch-convention input is NCHW.
    N, C, H, W = 2, 8, 16, 16
    n_levels = 2
    x_nchw = jax.random.normal(kx, (N, C, H, W), jnp.float32)
    params = init_hourglass_params(kp, C, n_levels)

    x = jnp.transpose(x_nchw, (0, 2, 3, 1))              # NCHW -> NHWC
    out = hourglass_forward(x, params, n_levels)
    out = jax.block_until_ready(out)
    out_nchw = jnp.transpose(out, (0, 3, 1, 2))          # back to NCHW

    ref = hourglass_ref(x, params, n_levels)
    err = float(jnp.max(jnp.abs(out - ref)))
    assert out_nchw.shape == x_nchw.shape
    assert err < 1e-3, f"max abs error vs reference: {err}"
    print("KERNEL_OK")
</pallas_src>

<mosaic_0001>
module attributes {stable_mosaic.version = 11 : i64} {
  func.func @kernel(%arg0: i32, %arg1: memref<8x2x8x16xf32, #tpu.memory_space<vmem>>, %arg2: memref<8x8x8xf32, #tpu.memory_space<vmem>>) attributes {dimension_semantics = [#tpu.dimension_semantics<parallel>], iteration_bounds = array<i64: 2>, scalar_prefetch = 0 : i64, scratch_operands = 0 : i64, tpu.core_type = #tpu.core_type<tc>, window_params = [{transform_indices = @transform_0, window_bounds = array<i64: 8, 2, 8, 16>}, {transform_indices = @transform_1, window_bounds = array<i64: 8, 8, 8>}]} {
    %c0 = arith.constant 0 : index
    %c0_0 = arith.constant 0 : index
    %c0_1 = arith.constant 0 : index
    %c0_2 = arith.constant 0 : index
    %0 = vector.load %arg1[%c0, %c0_0, %c0_1, %c0_2] : memref<8x2x8x16xf32, #tpu.memory_space<vmem>>, vector<8x2x8x16xf32>
    %1 = vector.extract_strided_slice %0 {offsets = [0, 0, 0, 0], sizes = [8, 1, 8, 16], strides = [1, 1, 1, 1]} : vector<8x2x8x16xf32> to vector<8x1x8x16xf32>
    %2 = vector.shape_cast %1 : vector<8x1x8x16xf32> to vector<8x8x16xf32>
    %3 = vector.extract_strided_slice %0 {offsets = [0, 1, 0, 0], sizes = [8, 1, 8, 16], strides = [1, 1, 1, 1]} : vector<8x2x8x16xf32> to vector<8x1x8x16xf32>
    %4 = vector.shape_cast %3 : vector<8x1x8x16xf32> to vector<8x8x16xf32>
    %5 = arith.maximumf %2, %4 : vector<8x8x16xf32>
    %6 = vector.extract_strided_slice %5 {offsets = [0, 0, 0], sizes = [8, 8, 8], strides = [1, 1, 1]} : vector<8x8x16xf32> to vector<8x8x8xf32>
    %7 = vector.extract_strided_slice %5 {offsets = [0, 0, 8], sizes = [8, 8, 8], strides = [1, 1, 1]} : vector<8x8x16xf32> to vector<8x8x8xf32>
    %8 = arith.maximumf %6, %7 : vector<8x8x8xf32>
    %c0_3 = arith.constant 0 : index
    %c0_4 = arith.constant 0 : index
    %c0_5 = arith.constant 0 : index
    %9 = vector.load %arg2[%c0_3, %c0_4, %c0_5] : memref<8x8x8xf32, #tpu.memory_space<vmem>>, vector<8x8x8xf32>
    tpu.vector_store %arg2[%c0_3, %c0_4, %c0_5], %8 {strides = array<i32>} : memref<8x8x8xf32, #tpu.memory_space<vmem>>, vector<8x8x8xf32>,
    return
  }
  func.func @transform_0(%arg0: i32) -> (i32, i32, i32, i32) {
    %c0_i32 = arith.constant 0 : i32
    %c0_i32_0 = arith.constant 0 : i32
    %c0_i32_1 = arith.constant 0 : i32
    %c0_i32_2 = arith.constant 0 : i32
    return %arg0, %c0_i32, %c0_i32_0, %c0_i32_1 : i32, i32, i32, i32
  }
  func.func @transform_1(%arg0: i32) -> (i32, i32, i32) {
    %c0_i32 = arith.constant 0 : i32
    %c0_i32_0 = arith.constant 0 : i32
    %c0_i32_1 = arith.constant 0 : i32
    return %arg0, %c0_i32, %c0_i32_0 : i32, i32, i32
  }
}

module attributes {stable_mosaic.version = 11 : i64} {
  func.func @kernel(%arg0: i32, %arg1: memref<4x2x4x16xf32, #tpu.memory_space<vmem>>, %arg2: memref<4x4x8xf32, #tpu.memory_space<vmem>>) attributes {dimension_semantics = [#tpu.dimension_semantics<parallel>], iteration_bounds = array<i64: 2>, scalar_prefetch = 0 : i64, scratch_operands = 0 : i64, tpu.core_type = #tpu.core_type<tc>, window_params = [{transform_indices = @transform_0, window_bounds = array<i64: 4, 2, 4, 16>}, {transform_indices = @transform_1, window_bounds = array<i64: 4, 4, 8>}]} {
    %c0 = arith.constant 0 : index
    %c0_0 = arith.constant 0 : index
    %c0_1 = arith.constant 0 : index
    %c0_2 = arith.constant 0 : index
    %0 = vector.load %arg1[%c0, %c0_0, %c0_1, %c0_2] : memref<4x2x4x16xf32, #tpu.memory_space<vmem>>, vector<4x2x4x16xf32>
    %1 = vector.extract_strided_slice %0 {offsets = [0, 0, 0, 0], sizes = [4, 1, 4, 16], strides = [1, 1, 1, 1]} : vector<4x2x4x16xf32> to vector<4x1x4x16xf32>
    %2 = vector.shape_cast %1 : vector<4x1x4x16xf32> to vector<4x4x16xf32>
    %3 = vector.extract_strided_slice %0 {offsets = [0, 1, 0, 0], sizes = [4, 1, 4, 16], strides = [1, 1, 1, 1]} : vector<4x2x4x16xf32> to vector<4x1x4x16xf32>
    %4 = vector.shape_cast %3 : vector<4x1x4x16xf32> to vector<4x4x16xf32>
    %5 = arith.maximumf %2, %4 : vector<4x4x16xf32>
    %6 = vector.extract_strided_slice %5 {offsets = [0, 0, 0], sizes = [4, 4, 8], strides = [1, 1, 1]} : vector<4x4x16xf32> to vector<4x4x8xf32>
    %7 = vector.extract_strided_slice %5 {offsets = [0, 0, 8], sizes = [4, 4, 8], strides = [1, 1, 1]} : vector<4x4x16xf32> to vector<4x4x8xf32>
    %8 = arith.maximumf %6, %7 : vector<4x4x8xf32>
    %c0_3 = arith.constant 0 : index
    %c0_4 = arith.constant 0 : index
    %c0_5 = arith.constant 0 : index
    %9 = vector.load %arg2[%c0_3, %c0_4, %c0_5] : memref<4x4x8xf32, #tpu.memory_space<vmem>>, vector<4x4x8xf32>
    tpu.vector_store %arg2[%c0_3, %c0_4, %c0_5], %8 {strides = array<i32>} : memref<4x4x8xf32, #tpu.memory_space<vmem>>, vector<4x4x8xf32>,
    return
  }
  func.func @transform_0(%arg0: i32) -> (i32, i32, i32, i32) {
    %c0_i32 = arith.constant 0 : i32
    %c0_i32_0 = arith.constant 0 : i32
    %c0_i32_1 = arith.constant 0 : i32
    %c0_i32_2 = arith.constant 0 : i32
    return %arg0, %c0_i32, %c0_i32_0, %c0_i32_1 : i32, i32, i32, i32
  }
  func.func @transform_1(%arg0: i32) -> (i32, i32, i32) {
    %c0_i32 = arith.constant 0 : i32
    %c0_i32_0 = arith.constant 0 : i32
    %c0_i32_1 = arith.constant 0 : i32
    return %arg0, %c0_i32, %c0_i32_0 : i32, i32, i32
  }
}

module attributes {stable_mosaic.version = 11 : i64} {
  func.func @kernel(%arg0: i32, %arg1: memref<64x8xf32, #tpu.memory_space<vmem>>, %arg2: memref<8x4xf32, #tpu.memory_space<vmem>>, %arg3: memref<1x4xf32, #tpu.memory_space<vmem>>, %arg4: memref<9x4x4xf32, #tpu.memory_space<vmem>>, %arg5: memref<1x4xf32, #tpu.memory_space<vmem>>, %arg6: memref<4x8xf32, #tpu.memory_space<vmem>>, %arg7: memref<1x8xf32, #tpu.memory_space<vmem>>, %arg8: memref<64x8xf32, #tpu.memory_space<vmem>>, %arg9: memref<96x4xf32, #tpu.memory_space<vmem>>) attributes {dimension_semantics = [#tpu.dimension_semantics<parallel>], iteration_bounds = array<i64: 2>, scalar_prefetch = 0 : i64, scratch_operands = 1 : i64, tpu.core_type = #tpu.core_type<tc>, window_params = [{transform_indices = @transform_0, window_bounds = array<i64: 64, 8>}, {pipeline_mode = #tpu.pipeline_mode<synchronous>, transform_indices = @transform_1, window_bounds = array<i64: 8, 4>}, {pipeline_mode = #tpu.pipeline_mode<synchronous>, transform_indices = @transform_2, window_bounds = array<i64: 1, 4>}, {pipeline_mode = #tpu.pipeline_mode<synchronous>, transform_indices = @transform_3, window_bounds = array<i64: 9, 4, 4>}, {pipeline_mode = #tpu.pipeline_mode<synchronous>, transform_indices = @transform_4, window_bounds = array<i64: 1, 4>}, {pipeline_mode = #tpu.pipeline_mode<synchronous>, transform_indices = @transform_5, window_bounds = array<i64: 4, 8>}, {pipeline_mode = #tpu.pipeline_mode<synchronous>, transform_indices = @transform_6, window_bounds = array<i64: 1, 8>}, {transform_indices = @transform_7, window_bounds = array<i64: 64, 8>}]} {
    %c0 = arith.constant 0 : index
    %c0_0 = arith.constant 0 : index
    %0 = vector.load %arg1[%c0, %c0_0] : memref<64x8xf32, #tpu.memory_space<vmem>>, vector<64x8xf32>
    %c0_1 = arith.constant 0 : index
    %c0_2 = arith.constant 0 : index
    %1 = vector.load %arg2[%c0_1, %c0_2] : memref<8x4xf32, #tpu.memory_space<vmem>>, vector<8x4xf32>
    %cst = arith.constant dense<0.000000e+00> : vector<64x4xf32>
    %2 = tpu.matmul %0, %1, %cst {dimension_numbers = #tpu.dot_dimension_numbers<[1], [0], [0], [1], [0, 0, 1, 1], [], []>} : vector<64x8xf32>, vector<8x4xf32>, vector<64x4xf32> -> vector<64x4xf32>
    %c0_3 = arith.constant 0 : index
    %c0_4 = arith.constant 0 : index
    %3 = vector.load %arg3[%c0_3, %c0_4] : memref<1x4xf32, #tpu.memory_space<vmem>>, vector<1x4xf32>
    %4 = vector.broadcast %3 : vector<1x4xf32> to vector<64x4xf32>
    %5 = arith.addf %2, %4 : vector<64x4xf32>
    %cst_5 = arith.constant 0.000000e+00 : f32
    %6 = vector.broadcast %cst_5 : f32 to vector<64x4xf32>
    %7 = arith.cmpf ogt, %5, %6 : vector<64x4xf32>
    %cst_6 = arith.constant 2.000000e-01 : f32
    %8 = vector.broadcast %cst_6 : f32 to vector<64x4xf32>
    %9 = arith.mulf %8, %5 : vector<64x4xf32>
    %10 = arith.select %7, %5, %9 : vector<64x4xi1>, vector<64x4xf32>
    %cst_7 = arith.constant 0.000000e+00 : f32
    %11 = vector.broadcast %cst_7 : f32 to vector<96x4xf32>
    %c0_8 = arith.constant 0 : index
    %c0_9 = arith.constant 0 : index
    %12 = vector.load %arg9[%c0_8, %c0_9] : memref<96x4xf32, #tpu.memory_space<vmem>>, vector<96x4xf32>
    tpu.vector_store %arg9[%c0_8, %c0_9], %11 {strides = array<i32>} : memref<96x4xf32, #tpu.memory_space<vmem>>, vector<96x4xf32>,
    %c16 = arith.constant 16 : index
    %c0_10 = arith.constant 0 : index
    %13 = vector.load %arg9[%c16, %c0_10] : memref<96x4xf32, #tpu.memory_space<vmem>>, vector<64x4xf32>
    tpu.vector_store %arg9[%c16, %c0_10], %10 {strides = array<i32>} : memref<96x4xf32, #tpu.memory_space<vmem>>, vector<64x4xf32>,
    %14 = tpu.iota {dimensions = array<i32: 0>} : vector<64x4xi32>
    %c8_i32 = arith.constant 8 : i32
    %c0_i32 = arith.constant 0 : i32
    %15 = arith.cmpi eq, %c8_i32, %c0_i32 : i32
    %c1_i32 = arith.constant 1 : i32
    %16 = arith.select %15, %c1_i32, %c8_i32 : i32
    %17 = vector.broadcast %16 : i32 to vector<64x4xi32>
    %18 = arith.remsi %14, %17 : vector<64x4xi32>
    %c0_i32_11 = arith.constant 0 : i32
    %19 = vector.broadcast %c0_i32_11 : i32 to vector<64x4xi32>
    %20 = arith.cmpi ne, %18, %19 : vector<64x4xi32>
    %c0_i32_12 = arith.constant 0 : i32
    %21 = vector.broadcast %c0_i32_12 : i32 to vector<64x4xi32>
    %22 = arith.cmpi slt, %18, %21 : vector<64x4xi32>
    %c0_i32_13 = arith.constant 0 : i32
    %23 = arith.cmpi slt, %16, %c0_i32_13 : i32
    %24 = vector.broadcast %23 : i1 to vector<64x4xi1>
    %25 = vector.broadcast %24 : vector<64x4xi1> to vector<64x4xi1>
    %26 = arith.xori %22, %25 : vector<64x4xi1>
    %27 = arith.andi %26, %20 : vector<64x4xi1>
    %28 = vector.broadcast %16 : i32 to vector<64x4xi32>
    %29 = arith.addi %18, %28 : vector<64x4xi32>
    %30 = arith.select %27, %29, %18 : vector<64x4xi1>, vector<64x4xi32>
    %c1_i32_14 = arith.constant 1 : i32
    %31 = vector.broadcast %c1_i32_14 : i32 to vector<64x4xi32>
    %32 = arith.cmpi sge, %30, %31 : vector<64x4xi32>
    %c6_i32 = arith.constant 6 : i32
    %33 = vector.broadcast %c6_i32 : i32 to vector<64x4xi32>
    %34 = arith.cmpi sle, %30, %33 : vector<64x4xi32>
    %cst_15 = arith.constant 0.000000e+00 : f32
    %35 = vector.broadcast %cst_15 : f32 to vector<64x4xf32>
    %c7 = arith.constant 7 : index
    %c0_16 = arith.constant 0 : index
    %36 = vector.load %arg9[%c7, %c0_16] : memref<96x4xf32, #tpu.memory_space<vmem>>, vector<64x4xf32>
    %cst_17 = arith.constant 0.000000e+00 : f32
    %37 = vector.broadcast %cst_17 : f32 to vector<64x4xf32>
    %38 = arith.select %32, %36, %37 : vector<64x4xi1>, vector<64x4xf32>
    %c0_18 = arith.constant 0 : index
    %c0_19 = arith.constant 0 : index
    %c0_20 = arith.constant 0 : index
    %39 = vector.load %arg4[%c0_18, %c0_19, %c0_20] : memref<9x4x4xf32, #tpu.memory_space<vmem>>, vector<1x4x4xf32>
    %40 = vector.shape_cast %39 : vector<1x4x4xf32> to vector<4x4xf32>
    %cst_21 = arith.constant dense<0.000000e+00> : vector<64x4xf32>
    %41 = tpu.matmul %38, %40, %cst_21 {dimension_numbers = #tpu.dot_dimension_numbers<[1], [0], [0], [1], [0, 0, 1, 1], [], []>} : vector<64x4xf32>, vector<4x4xf32>, vector<64x4xf32> -> vector<64x4xf32>
    %42 = arith.addf %35, %41 : vector<64x4xf32>
    %c8 = arith.constant 8 : index
    %c0_22 = arith.constant 0 : index
    %43 = vector.load %arg9[%c8, %c0_22] : memref<96x4xf32, #tpu.memory_space<vmem>>, vector<64x4xf32>
    %c1 = arith.constant 1 : index
    %c0_23 = arith.constant 0 : index
    %c0_24 = arith.constant 0 : index
    %44 = vector.load %arg4[%c1, %c0_23, %c0_24] : memref<9x4x4xf32, #tpu.memory_space<vmem>>, vector<1x4x4xf32>
    %45 = vector.shape_cast %44 : vector<1x4x4xf32> to vector<4x4xf32>
    %cst_25 = arith.constant dense<0.000000e+00> : vector<64x4xf32>
    %46 = tpu.matmul %43, %45, %cst_25 {dimension_numbers = #tpu.dot_dimension_numbers<[1], [0], [0], [1], [0, 0, 1, 1], [], []>} : vector<64x4xf32>, vector<4x4xf32>, vector<64x4xf32> -> vector<64x4xf32>
    %47 = arith.addf %42, %46 : vector<64x4xf32>
    %c9 = arith.constant 9 : index
    %c0_26 = arith.constant 0 : index
    %48 = vector.load %arg9[%c9, %c0_26] : memref<96x4xf32, #tpu.memory_space<vmem>>, vector<64x4xf32>
    %cst_27 = arith.constant 0.000000e+00 : f32
    %49 = vector.broadcast %cst_27 : f32 to vector<64x4xf32>
    %50 = arith.select %34, %48, %49 : vector<64x4xi1>, vector<64x4xf32>
    %c2 = arith.constant 2 : index
    %c0_28 = arith.constant 0 : index
    %c0_29 = arith.constant 0 : index
    %51 = vector.load %arg4[%c2, %c0_28, %c0_29] : memref<9x4x4xf32, #tpu.memory_space<vmem>>, vector<1x4x4xf32>
    %52 = vector.shape_cast %51 : vector<1x4x4xf32> to vector<4x4xf32>
    %cst_30 = arith.constant dense<0.000000e+00> : vector<64x4xf32>
    %53 = tpu.matmul %50, %52, %cst_30 {dimension_numbers = #tpu.dot_dimension_numbers<[1], [0], [0], [1], [0, 0, 1, 1], [], []>} : vector<64x4xf32>, vector<4x4xf32>, vector<64x4xf32> -> vector<64x4xf32>
    %54 = arith.addf %47, %53 : vector<64x4xf32>
    %c15 = arith.constant 15 : index
    %c0_31 = arith.constant 0 : index
    %55 = vector.load %arg9[%c15, %c0_31] : memref<96x4xf32, #tpu.memory_space<vmem>>, vector<64x4xf32>
    %cst_32 = arith.constant 0.000000e+00 : f32
    %56 = vector.broadcast %cst_32 : f32 to vector<64x4xf32>
    %57 = arith.select %32, %55, %56 : vector<64x4xi1>, vector<64x4xf32>
    %c3 = arith.constant 3 : index
    %c0_33 = arith.constant 0 : index
    %c0_34 = arith.constant 0 : index
    %58 = vector.load %arg4[%c3, %c0_33, %c0_34] : memref<9x4x4xf32, #tpu.memory_space<vmem>>, vector<1x4x4xf32>
    %59 = vector.shape_cast %58 : vector<1x4x4xf32> to vector<4x4xf32>
    %cst_35 = arith.constant dense<0.000000e+00> : vector<64x4xf32>
    %60 = tpu.matmul %57, %59, %cst_35 {dimension_numbers = #tpu.dot_dimension_numbers<[1], [0], [0], [1], [0, 0, 1, 1], [], []>} : vector<64x4xf32>, vector<4x4xf32>, vector<64x4xf32> -> vector<64x4xf32>
    %61 = arith.addf %54, %60 : vector<64x4xf32>
    %c16_36 = arith.constant 16 : index
    %c0_37 = arith.constant 0 : index
    %62 = vector.load %arg9[%c16_36, %c0_37] : memref<96x4xf32, #tpu.memory_space<vmem>>, vector<64x4xf32>
    %c4 = arith.constant 4 : index
    %c0_38 = arith.constant 0 : index
    %c0_39 = arith.constant 0 : index
    %63 = vector.load %arg4[%c4, %c0_38, %c0_39] : memref<9x4x4xf32, #tpu.memory_space<vmem>>, vector<1x4x4xf32>
    %64 = vector.shape_cast %63 : vector<1x4x4xf32> to vector<4x4xf32>
    %cst_40 = arith.constant dense<0.000000e+00> : vector<64x4xf32>
    %65 = tpu.matmul %62, %64, %cst_40 {dimension_numbers = #tpu.dot_dimension_numbers<[1], [0], [0], [1], [0, 0, 1, 1], [], []>} : vector<64x4xf32>, vector<4x4xf32>, vector<64x4xf32> -> vector<64x4xf32>
    %66 = arith.addf %61, %65 : vector<64x4xf32>
    %c17 = arith.constant 17 : index
    %c0_41 = arith.constant 0 : index
    %67 = vector.load %arg9[%c17, %c0_41] : memref<96x4xf32, #tpu.memory_space<vmem>>, vector<64x4xf32>
    %cst_42 = arith.constant 0.000000e+00 : f32
    %68 = vector.broadcast %cst_42 : f32 to vector<64x4xf32>
    %69 = arith.select %34, %67, %68 : vector<64x4xi1>, vector<64x4xf32>
    %c5 = arith.constant 5 : index
    %c0_43 = arith.constant 0 : index
    %c0_44 = arith.constant 0 : index
    %70 = vector.load %arg4[%c5, %c0_43, %c0_44] : memref<9x4x4xf32, #tpu.memory_space<vmem>>, vector<1x4x4xf32>
    %71 = vector.shape_cast %70 : vector<1x4x4xf32> to vector<4x4xf32>
    %cst_45 = arith.constant dense<0.000000e+00> : vector<64x4xf32>
    %72 = tpu.matmul %69, %71, %cst_45 {dimension_numbers = #tpu.dot_dimension_numbers<[1], [0], [0], [1], [0, 0, 1, 1], [], []>} : vector<64x4xf32>, vector<4x4xf32>, vector<64x4xf32> -> vector<64x4xf32>
    %73 = arith.addf %66, %72 : vector<64x4xf32>
    %c23 = arith.constant 23 : index
    %c0_46 = arith.constant 0 : index
    %74 = vector.load %arg9[%c23, %c0_46] : memref<96x4xf32, #tpu.memory_space<vmem>>, vector<64x4xf32>
    %cst_47 = arith.constant 0.000000e+00 : f32
    %75 = vector.broadcast %cst_47 : f32 to vector<64x4xf32>
    %76 = arith.select %32, %74, %75 : vector<64x4xi1>, vector<64x4xf32>
    %c6 = arith.constant 6 : index
    %c0_48 = arith.constant 0 : index
    %c0_49 = arith.constant 0 : index
    %77 = vector.load %arg4[%c6, %c0_48, %c0_49] : memref<9x4x4xf32, #tpu.memory_space<vmem>>, vector<1x4x4xf32>
    %78 = vector.shape_cast %77 : vector<1x4x4xf32> to vector<4x4xf32>
    %cst_50 = arith.constant dense<0.000000e+00> : vector<64x4xf32>
    %79 = tpu.matmul %76, %78, %cst_50 {dimension_numbers = #tpu.dot_dimension_numbers<[1], [0], [0], [1], [0, 0, 1, 1], [], []>} : vector<64x4xf32>, vector<4x4xf32>, vector<64x4xf32> -> vector<64x4xf32>
    %80 = arith.addf %73, %79 : vector<64x4xf32>
    %c24 = arith.constant 24 : index
    %c0_51 = arith.constant 0 : index
    %81 = vector.load %arg9[%c24, %c0_51] : memref<96x4xf32, #tpu.memory_space<vmem>>, vector<64x4xf32>
    %c7_52 = arith.constant 7 : index
    %c0_53 = arith.constant 0 : index
    %c0_54 = arith.constant 0 : index
    %82 = vector.load %arg4[%c7_52, %c0_53, %c0_54] : memref<9x4x4xf32, #tpu.memory_space<vmem>>, vector<1x4x4xf32>
    %83 = vector.shape_cast %82 : vector<1x4x4xf32> to vector<4x4xf32>
    %cst_55 = arith.constant dense<0.000000e+00> : vector<64x4xf32>
    %84 = tpu.matmul %81, %83, %cst_55 {dimension_numbers = #tpu.dot_dimension_numbers<[1], [0], [0], [1], [0, 0, 1, 1], [], []>} : vector<64x4xf32>, vector<4x4xf32>, vector<64x4xf32> -> vector<64x4xf32>
    %85 = arith.addf %80, %84 : vector<64x4xf32>
    %c25 = arith.constant 25 : index
    %c0_56 = arith.constant 0 : index
    %86 = vector.load %arg9[%c25, %c0_56] : memref<96x4xf32, #tpu.memory_space<vmem>>, vector<64x4xf32>
    %cst_57 = arith.constant 0.000000e+00 : f32
    %87 = vector.broadcast %cst_57 : f32 to vector<64x4xf32>
    %88 = arith.select %34, %86, %87 : vector<64x4xi1>, vector<64x4xf32>
    %c8_58 = arith.constant 8 : index
    %c0_59 = arith.constant 0 : index
    %c0_60 = arith.constant 0 : index
    %89 = vector.load %arg4[%c8_58, %c0_59, %c0_60] : memref<9x4x4xf32, #tpu.memory_space<vmem>>, vector<1x4x4xf32>
    %90 = vector.shape_cast %89 : vector<1x4x4xf32> to vector<4x4xf32>
    %cst_61 = arith.constant dense<0.000000e+00> : vector<64x4xf32>
    %91 = tpu.matmul %88, %90, %cst_61 {dimension_numbers = #tpu.dot_dimension_numbers<[1], [0], [0], [1], [0, 0, 1, 1], [], []>} : vector<64x4xf32>, vector<4x4xf32>, vector<64x4xf32> -> vector<64x4xf32>
    %92 = arith.addf %85, %91 : vector<64x4xf32>
    %c0_62 = arith.constant 0 : index
    %c0_63 = arith.constant 0 : index
    %93 = vector.load %arg5[%c0_62, %c0_63] : memref<1x4xf32, #tpu.memory_space<vmem>>, vector<1x4xf32>
    %94 = vector.broadcast %93 : vector<1x4xf32> to vector<64x4xf32>
    %95 = arith.addf %92, %94 : vector<64x4xf32>
    %cst_64 = arith.constant 0.000000e+00 : f32
    %96 = vector.broadcast %cst_64 : f32 to vector<64x4xf32>
    %97 = arith.cmpf ogt, %95, %96 : vector<64x4xf32>
    %cst_65 = arith.constant 2.000000e-01 : f32
    %98 = vector.broadcast %cst_65 : f32 to vector<64x4xf32>
    %99 = arith.mulf %98, %95 : vector<64x4xf32>
    %100 = arith.select %97, %95, %99 : vector<64x4xi1>, vector<64x4xf32>
    %c0_66 = arith.constant 0 : index
    %c0_67 = arith.constant 0 : index
    %101 = vector.load %arg6[%c0_66, %c0_67] : memref<4x8xf32, #tpu.memory_space<vmem>>, vector<4x8xf32>
    %cst_68 = arith.constant dense<0.000000e+00> : vector<64x8xf32>
    %102 = tpu.matmul %100, %101, %cst_68 {dimension_numbers = #tpu.dot_dimension_numbers<[1], [0], [0], [1], [0, 0, 1, 1], [], []>} : vector<64x4xf32>, vector<4x8xf32>, vector<64x8xf32> -> vector<64x8xf32>
    %c0_69 = arith.constant 0 : index
    %c0_70 = arith.constant 0 : index
    %103 = vector.load %arg7[%c0_69, %c0_70] : memref<1x8xf32, #tpu.memory_space<vmem>>, vector<1x8xf32>
    %104 = vector.broadcast %103 : vector<1x8xf32> to vector<64x8xf32>
    %105 = arith.addf %102, %104 : vector<64x8xf32>
    %106 = arith.addf %105, %0 : vector<64x8xf32>
    %c0_71 = arith.constant 0 : index
    %c0_72 = arith.constant 0 : index
    %107 = vector.load %arg8[%c0_71, %c0_72] : memref<64x8xf32, #tpu.memory_space<vmem>>, vector<64x8xf32>
    tpu.vector_store %arg8[%c0_71, %c0_72], %106 {strides = array<i32>} : memref<64x8xf32, #tpu.memory_space<vmem>>, vector<64x8xf32>,
    return
  }
  func.func @transform_0(%arg0: i32) -> (i32, i32) {
    %c0_i32 = arith.constant 0 : i32
    %c0_i32_0 = arith.constant 0 : i32
    return %arg0, %c0_i32 : i32, i32
  }
  func.func @transform_1(%arg0: i32) -> (i32, i32) {
    %c0_i32 = arith.constant 0 : i32
    %c0_i32_0 = arith.constant 0 : i32
    %c0_i32_1 = arith.constant 0 : i32
    return %c0_i32, %c0_i32_0 : i32, i32
  }
  func.func @transform_2(%arg0: i32) -> (i32, i32) {
    %c0_i32 = arith.constant 0 : i32
    %c0_i32_0 = arith.constant 0 : i32
    %c0_i32_1 = arith.constant 0 : i32
    return %c0_i32, %c0_i32_0 : i32, i32
  }
  func.func @transform_3(%arg0: i32) -> (i32, i32, i32) {
    %c0_i32 = arith.constant 0 : i32
    %c0_i32_0 = arith.constant 0 : i32
    %c0_i32_1 = arith.constant 0 : i32
    %c0_i32_2 = arith.constant 0 : i32
    return %c0_i32, %c0_i32_0, %c0_i32_1 : i32, i32, i32
  }
  func.func @transform_4(%arg0: i32) -> (i32, i32) {
    %c0_i32 = arith.constant 0 : i32
    %c0_i32_0 = arith.constant 0 : i32
    %c0_i32_1 = arith.constant 0 : i32
    return %c0_i32, %c0_i32_0 : i32, i32
  }
  func.func @transform_5(%arg0: i32) -> (i32, i32) {
    %c0_i32 = arith.constant 0 : i32
    %c0_i32_0 = arith.constant 0 : i32
    %c0_i32_1 = arith.constant 0 : i32
    return %c0_i32, %c0_i32_0 : i32, i32
  }
  func.func @transform_6(%arg0: i32) -> (i32, i32) {
    %c0_i32 = arith.constant 0 : i32
    %c0_i32_0 = arith.constant 0 : i32
    %c0_i32_1 = arith.constant 0 : i32
    return %c0_i32, %c0_i32_0 : i32, i32
  }
  func.func @transform_7(%arg0: i32) -> (i32, i32) {
    %c0_i32 = arith.constant 0 : i32
    %c0_i32_0 = arith.constant 0 : i32
    return %arg0, %c0_i32 : i32, i32
  }
}

module attributes {stable_mosaic.version = 11 : i64} {
  func.func @kernel(%arg0: i32, %arg1: memref<16x8xf32, #tpu.memory_space<vmem>>, %arg2: memref<8x4xf32, #tpu.memory_space<vmem>>, %arg3: memref<1x4xf32, #tpu.memory_space<vmem>>, %arg4: memref<9x4x4xf32, #tpu.memory_space<vmem>>, %arg5: memref<1x4xf32, #tpu.memory_space<vmem>>, %arg6: memref<4x8xf32, #tpu.memory_space<vmem>>, %arg7: memref<1x8xf32, #tpu.memory_space<vmem>>, %arg8: memref<16x8xf32, #tpu.memory_space<vmem>>, %arg9: memref<32x4xf32, #tpu.memory_space<vmem>>) attributes {dimension_semantics = [#tpu.dimension_semantics<parallel>], iteration_bounds = array<i64: 2>, scalar_prefetch = 0 : i64, scratch_operands = 1 : i64, tpu.core_type = #tpu.core_type<tc>, window_params = [{transform_indices = @transform_0, window_bounds = array<i64: 16, 8>}, {pipeline_mode = #tpu.pipeline_mode<synchronous>, transform_indices = @transform_1, window_bounds = array<i64: 8, 4>}, {pipeline_mode = #tpu.pipeline_mode<synchronous>, transform_indices = @transform_2, window_bounds = array<i64: 1, 4>}, {pipeline_mode = #tpu.pipeline_mode<synchronous>, transform_indices = @transform_3, window_bounds = array<i64: 9, 4, 4>}, {pipeline_mode = #tpu.pipeline_mode<synchronous>, transform_indices = @transform_4, window_bounds = array<i64: 1, 4>}, {pipeline_mode = #tpu.pipeline_mode<synchronous>, transform_indices = @transform_5, window_bounds = array<i64: 4, 8>}, {pipeline_mode = #tpu.pipeline_mode<synchronous>, transform_indices = @transform_6, window_bounds = array<i64: 1, 8>}, {transform_indices = @transform_7, window_bounds = array<i64: 16, 8>}]} {
    %c0 = arith.constant 0 : index
    %c0_0 = arith.constant 0 : index
    %0 = vector.load %arg1[%c0, %c0_0] : memref<16x8xf32, #tpu.memory_space<vmem>>, vector<16x8xf32>
    %c0_1 = arith.constant 0 : index
    %c0_2 = arith.constant 0 : index
    %1 = vector.load %arg2[%c0_1, %c0_2] : memref<8x4xf32, #tpu.memory_space<vmem>>, vector<8x4xf32>
    %cst = arith.constant dense<0.000000e+00> : vector<16x4xf32>
    %2 = tpu.matmul %0, %1, %cst {dimension_numbers = #tpu.dot_dimension_numbers<[1], [0], [0], [1], [0, 0, 1, 1], [], []>} : vector<16x8xf32>, vector<8x4xf32>, vector<16x4xf32> -> vector<16x4xf32>
    %c0_3 = arith.constant 0 : index
    %c0_4 = arith.constant 0 : index
    %3 = vector.load %arg3[%c0_3, %c0_4] : memref<1x4xf32, #tpu.memory_space<vmem>>, vector<1x4xf32>
    %4 = vector.broadcast %3 : vector<1x4xf32> to vector<16x4xf32>
    %5 = arith.addf %2, %4 : vector<16x4xf32>
    %cst_5 = arith.constant 0.000000e+00 : f32
    %6 = vector.broadcast %cst_5 : f32 to vector<16x4xf32>
    %7 = arith.cmpf ogt, %5, %6 : vector<16x4xf32>
    %cst_6 = arith.constant 2.000000e-01 : f32
    %8 = vector.broadcast %cst_6 : f32 to vector<16x4xf32>
    %9 = arith.mulf %8, %5 : vector<16x4xf32>
    %10 = arith.select %7, %5, %9 : vector<16x4xi1>, vector<16x4xf32>
    %cst_7 = arith.constant 0.000000e+00 : f32
    %11 = vector.broadcast %cst_7 : f32 to vector<32x4xf32>
    %c0_8 = arith.constant 0 : index
    %c0_9 = arith.constant 0 : index
    %12 = vector.load %arg9[%c0_8, %c0_9] : memref<32x4xf32, #tpu.memory_space<vmem>>, vector<32x4xf32>
    tpu.vector_store %arg9[%c0_8, %c0_9], %11 {strides = array<i32>} : memref<32x4xf32, #tpu.memory_space<vmem>>, vector<32x4xf32>,
    %c8 = arith.constant 8 : index
    %c0_10 = arith.constant 0 : index
    %13 = vector.load %arg9[%c8, %c0_10] : memref<32x4xf32, #tpu.memory_space<vmem>>, vector<16x4xf32>
    tpu.vector_store %arg9[%c8, %c0_10], %10 {strides = array<i32>} : memref<32x4xf32, #tpu.memory_space<vmem>>, vector<16x4xf32>,
    %14 = tpu.iota {dimensions = array<i32: 0>} : vector<16x4xi32>
    %c4_i32 = arith.constant 4 : i32
    %c0_i32 = arith.constant 0 : i32
    %15 = arith.cmpi eq, %c4_i32, %c0_i32 : i32
    %c1_i32 = arith.constant 1 : i32
    %16 = arith.select %15, %c1_i32, %c4_i32 : i32
    %17 = vector.broadcast %16 : i32 to vector<16x4xi32>
    %18 = arith.remsi %14, %17 : vector<16x4xi32>
    %c0_i32_11 = arith.constant 0 : i32
    %19 = vector.broadcast %c0_i32_11 : i32 to vector<16x4xi32>
    %20 = arith.cmpi ne, %18, %19 : vector<16x4xi32>
    %c0_i32_12 = arith.constant 0 : i32
    %21 = vector.broadcast %c0_i32_12 : i32 to vector<16x4xi32>
    %22 = arith.cmpi slt, %18, %21 : vector<16x4xi32>
    %c0_i32_13 = arith.constant 0 : i32
    %23 = arith.cmpi slt, %16, %c0_i32_13 : i32
    %24 = vector.broadcast %23 : i1 to vector<16x4xi1>
    %25 = vector.broadcast %24 : vector<16x4xi1> to vector<16x4xi1>
    %26 = arith.xori %22, %25 : vector<16x4xi1>
    %27 = arith.andi %26, %20 : vector<16x4xi1>
    %28 = vector.broadcast %16 : i32 to vector<16x4xi32>
    %29 = arith.addi %18, %28 : vector<16x4xi32>
    %30 = arith.select %27, %29, %18 : vector<16x4xi1>, vector<16x4xi32>
    %c1_i32_14 = arith.constant 1 : i32
    %31 = vector.broadcast %c1_i32_14 : i32 to vector<16x4xi32>
    %32 = arith.cmpi sge, %30, %31 : vector<16x4xi32>
    %c2_i32 = arith.constant 2 : i32
    %33 = vector.broadcast %c2_i32 : i32 to vector<16x4xi32>
    %34 = arith.cmpi sle, %30, %33 : vector<16x4xi32>
    %cst_15 = arith.constant 0.000000e+00 : f32
    %35 = vector.broadcast %cst_15 : f32 to vector<16x4xf32>
    %c3 = arith.constant 3 : index
    %c0_16 = arith.constant 0 : index
    %36 = vector.load %arg9[%c3, %c0_16] : memref<32x4xf32, #tpu.memory_space<vmem>>, vector<16x4xf32>
    %cst_17 = arith.constant 0.000000e+00 : f32
    %37 = vector.broadcast %cst_17 : f32 to vector<16x4xf32>
    %38 = arith.select %32, %36, %37 : vector<16x4xi1>, vector<16x4xf32>
    %c0_18 = arith.constant 0 : index
    %c0_19 = arith.constant 0 : index
    %c0_20 = arith.constant 0 : index
    %39 = vector.load %arg4[%c0_18, %c0_19, %c0_20] : memref<9x4x4xf32, #tpu.memory_space<vmem>>, vector<1x4x4xf32>
    %40 = vector.shape_cast %39 : vector<1x4x4xf32> to vector<4x4xf32>
    %cst_21 = arith.constant dense<0.000000e+00> : vector<16x4xf32>
    %41 = tpu.matmul %38, %40, %cst_21 {dimension_numbers = #tpu.dot_dimension_numbers<[1], [0], [0], [1], [0, 0, 1, 1], [], []>} : vector<16x4xf32>, vector<4x4xf32>, vector<16x4xf32> -> vector<16x4xf32>
    %42 = arith.addf %35, %41 : vector<16x4xf32>
    %c4 = arith.constant 4 : index
    %c0_22 = arith.constant 0 : index
    %43 = vector.load %arg9[%c4, %c0_22] : memref<32x4xf32, #tpu.memory_space<vmem>>, vector<16x4xf32>
    %c1 = arith.constant 1 : index
    %c0_23 = arith.constant 0 : index
    %c0_24 = arith.constant 0 : index
    %44 = vector.load %arg4[%c1, %c0_23, %c0_24] : memref<9x4x4xf32, #tpu.memory_space<vmem>>, vector<1x4x4xf32>
    %45 = vector.shape_cast %44 : vector<1x4x4xf32> to vector<4x4xf32>
    %cst_25 = arith.constant dense<0.000000e+00> : vector<16x4xf32>
    %46 = tpu.matmul %43, %45, %cst_25 {dimension_numbers = #tpu.dot_dimension_numbers<[1], [0], [0], [1], [0, 0, 1, 1], [], []>} : vector<16x4xf32>, vector<4x4xf32>, vector<16x4xf32> -> vector<16x4xf32>
    %47 = arith.addf %42, %46 : vector<16x4xf32>
    %c5 = arith.constant 5 : index
    %c0_26 = arith.constant 0 : index
    %48 = vector.load %arg9[%c5, %c0_26] : memref<32x4xf32, #tpu.memory_space<vmem>>, vector<16x4xf32>
    %cst_27 = arith.constant 0.000000e+00 : f32
    %49 = vector.broadcast %cst_27 : f32 to vector<16x4xf32>
    %50 = arith.select %34, %48, %49 : vector<16x4xi1>, vector<16x4xf32>
    %c2 = arith.constant 2 : index
    %c0_28 = arith.constant 0 : index
    %c0_29 = arith.constant 0 : index
    %51 = vector.load %arg4[%c2, %c0_28, %c0_29] : memref<9x4x4xf32, #tpu.memory_space<vmem>>, vector<1x4x4xf32>
    %52 = vector.shape_cast %51 : vector<1x4x4xf32> to vector<4x4xf32>
    %cst_30 = arith.constant dense<0.000000e+00> : vector<16x4xf32>
    %53 = tpu.matmul %50, %52, %cst_30 {dimension_numbers = #tpu.dot_dimension_numbers<[1], [0], [0], [1], [0, 0, 1, 1], [], []>} : vector<16x4xf32>, vector<4x4xf32>, vector<16x4xf32> -> vector<16x4xf32>
    %54 = arith.addf %47, %53 : vector<16x4xf32>
    %c7 = arith.constant 7 : index
    %c0_31 = arith.constant 0 : index
    %55 = vector.load %arg9[%c7, %c0_31] : memref<32x4xf32, #tpu.memory_space<vmem>>, vector<16x4xf32>
    %cst_32 = arith.constant 0.000000e+00 : f32
    %56 = vector.broadcast %cst_32 : f32 to vector<16x4xf32>
    %57 = arith.select %32, %55, %56 : vector<16x4xi1>, vector<16x4xf32>
    %c3_33 = arith.constant 3 : index
    %c0_34 = arith.constant 0 : index
    %c0_35 = arith.constant 0 : index
    %58 = vector.load %arg4[%c3_33, %c0_34, %c0_35] : memref<9x4x4xf32, #tpu.memory_space<vmem>>, vector<1x4x4xf32>
    %59 = vector.shape_cast %58 : vector<1x4x4xf32> to vector<4x4xf32>
    %cst_36 = arith.constant dense<0.000000e+00> : vector<16x4xf32>
    %60 = tpu.matmul %57, %59, %cst_36 {dimension_numbers = #tpu.dot_dimension_numbers<[1], [0], [0], [1], [0, 0, 1, 1], [], []>} : vector<16x4xf32>, vector<4x4xf32>, vector<16x4xf32> -> vector<16x4xf32>
    %61 = arith.addf %54, %60 : vector<16x4xf32>
    %c8_37 = arith.constant 8 : index
    %c0_38 = arith.constant 0 : index
    %62 = vector.load %arg9[%c8_37, %c0_38] : memref<32x4xf32, #tpu.memory_space<vmem>>, vector<16x4xf32>
    %c4_39 = arith.constant 4 : index
    %c0_40 = arith.constant 0 : index
    %c0_41 = arith.constant 0 : index
    %63 = vector.load %arg4[%c4_39, %c0_40, %c0_41] : memref<9x4x4xf32, #tpu.memory_space<vmem>>, vector<1x4x4xf32>
    %64 = vector.shape_cast %63 : vector<1x4x4xf32> to vector<4x4xf32>
    %cst_42 = arith.constant dense<0.000000e+00> : vector<16x4xf32>
    %65 = tpu.matmul %62, %64, %cst_42 {dimension_numbers = #tpu.dot_dimension_numbers<[1], [0], [0], [1], [0, 0, 1, 1], [], []>} : vector<16x4xf32>, vector<4x4xf32>, vector<16x4xf32> -> vector<16x4xf32>
    %66 = arith.addf %61, %65 : vector<16x4xf32>
    %c9 = arith.constant 9 : index
    %c0_43 = arith.constant 0 : index
    %67 = vector.load %arg9[%c9, %c0_43] : memref<32x4xf32, #tpu.memory_space<vmem>>, vector<16x4xf32>
    %cst_44 = arith.constant 0.000000e+00 : f32
    %68 = vector.broadcast %cst_44 : f32 to vector<16x4xf32>
    %69 = arith.select %34, %67, %68 : vector<16x4xi1>, vector<16x4xf32>
    %c5_45 = arith.constant 5 : index
    %c0_46 = arith.constant 0 : index
    %c0_47 = arith.constant 0 : index
    %70 = vector.load %arg4[%c5_45, %c0_46, %c0_47] : memref<9x4x4xf32, #tpu.memory_space<vmem>>, vector<1x4x4xf32>
    %71 = vector.shape_cast %70 : vector<1x4x4xf32> to vector<4x4xf32>
    %cst_48 = arith.constant dense<0.000000e+00> : vector<16x4xf32>
    %72 = tpu.matmul %69, %71, %cst_48 {dimension_numbers = #tpu.dot_dimension_numbers<[1], [0], [0], [1], [0, 0, 1, 1], [], []>} : vector<16x4xf32>, vector<4x4xf32>, vector<16x4xf32> -> vector<16x4xf32>
    %73 = arith.addf %66, %72 : vector<16x4xf32>
    %c11 = arith.constant 11 : index
    %c0_49 = arith.constant 0 : index
    %74 = vector.load %arg9[%c11, %c0_49] : memref<32x4xf32, #tpu.memory_space<vmem>>, vector<16x4xf32>
    %cst_50 = arith.constant 0.000000e+00 : f32
    %75 = vector.broadcast %cst_50 : f32 to vector<16x4xf32>
    %76 = arith.select %32, %74, %75 : vector<16x4xi1>, vector<16x4xf32>
    %c6 = arith.constant 6 : index
    %c0_51 = arith.constant 0 : index
    %c0_52 = arith.constant 0 : index
    %77 = vector.load %arg4[%c6, %c0_51, %c0_52] : memref<9x4x4xf32, #tpu.memory_space<vmem>>, vector<1x4x4xf32>
    %78 = vector.shape_cast %77 : vector<1x4x4xf32> to vector<4x4xf32>
    %cst_53 = arith.constant dense<0.000000e+00> : vector<16x4xf32>
    %79 = tpu.matmul %76, %78, %cst_53 {dimension_numbers = #tpu.dot_dimension_numbers<[1], [0], [0], [1], [0, 0, 1, 1], [], []>} : vector<16x4xf32>, vector<4x4xf32>, vector<16x4xf32> -> vector<16x4xf32>
    %80 = arith.addf %73, %79 : vector<16x4xf32>
    %c12 = arith.constant 12 : index
    %c0_54 = arith.constant 0 : index
    %81 = vector.load %arg9[%c12, %c0_54] : memref<32x4xf32, #tpu.memory_space<vmem>>, vector<16x4xf32>
    %c7_55 = arith.constant 7 : index
    %c0_56 = arith.constant 0 : index
    %c0_57 = arith.constant 0 : index
    %82 = vector.load %arg4[%c7_55, %c0_56, %c0_57] : memref<9x4x4xf32, #tpu.memory_space<vmem>>, vector<1x4x4xf32>
    %83 = vector.shape_cast %82 : vector<1x4x4xf32> to vector<4x4xf32>
    %cst_58 = arith.constant dense<0.000000e+00> : vector<16x4xf32>
    %84 = tpu.matmul %81, %83, %cst_58 {dimension_numbers = #tpu.dot_dimension_numbers<[1], [0], [0], [1], [0, 0, 1, 1], [], []>} : vector<16x4xf32>, vector<4x4xf32>, vector<16x4xf32> -> vector<16x4xf32>
    %85 = arith.addf %80, %84 : vector<16x4xf32>
    %c13 = arith.constant 13 : index
    %c0_59 = arith.constant 0 : index
    %86 = vector.load %arg9[%c13, %c0_59] : memref<32x4xf32, #tpu.memory_space<vmem>>, vector<16x4xf32>
    %cst_60 = arith.constant 0.000000e+00 : f32
    %87 = vector.broadcast %cst_60 : f32 to vector<16x4xf32>
    %88 = arith.select %34, %86, %87 : vector<16x4xi1>, vector<16x4xf32>
    %c8_61 = arith.constant 8 : index
    %c0_62 = arith.constant 0 : index
    %c0_63 = arith.constant 0 : index
    %89 = vector.load %arg4[%c8_61, %c0_62, %c0_63] : memref<9x4x4xf32, #tpu.memory_space<vmem>>, vector<1x4x4xf32>
    %90 = vector.shape_cast %89 : vector<1x4x4xf32> to vector<4x4xf32>
    %cst_64 = arith.constant dense<0.000000e+00> : vector<16x4xf32>
    %91 = tpu.matmul %88, %90, %cst_64 {dimension_numbers = #tpu.dot_dimension_numbers<[1], [0], [0], [1], [0, 0, 1, 1], [], []>} : vector<16x4xf32>, vector<4x4xf32>, vector<16x4xf32> -> vector<16x4xf32>
    %92 = arith.addf %85, %91 : vector<16x4xf32>
    %c0_65 = arith.constant 0 : index
    %c0_66 = arith.constant 0 : index
    %93 = vector.load %arg5[%c0_65, %c0_66] : memref<1x4xf32, #tpu.memory_space<vmem>>, vector<1x4xf32>
    %94 = vector.broadcast %93 : vector<1x4xf32> to vector<16x4xf32>
    %95 = arith.addf %92, %94 : vector<16x4xf32>
    %cst_67 = arith.constant 0.000000e+00 : f32
    %96 = vector.broadcast %cst_67 : f32 to vector<16x4xf32>
    %97 = arith.cmpf ogt, %95, %96 : vector<16x4xf32>
    %cst_68 = arith.constant 2.000000e-01 : f32
    %98 = vector.broadcast %cst_68 : f32 to vector<16x4xf32>
    %99 = arith.mulf %98, %95 : vector<16x4xf32>
    %100 = arith.select %97, %95, %99 : vector<16x4xi1>, vector<16x4xf32>
    %c0_69 = arith.constant 0 : index
    %c0_70 = arith.constant 0 : index
    %101 = vector.load %arg6[%c0_69, %c0_70] : memref<4x8xf32, #tpu.memory_space<vmem>>, vector<4x8xf32>
    %cst_71 = arith.constant dense<0.000000e+00> : vector<16x8xf32>
    %102 = tpu.matmul %100, %101, %cst_71 {dimension_numbers = #tpu.dot_dimension_numbers<[1], [0], [0], [1], [0, 0, 1, 1], [], []>} : vector<16x4xf32>, vector<4x8xf32>, vector<16x8xf32> -> vector<16x8xf32>
    %c0_72 = arith.constant 0 : index
    %c0_73 = arith.constant 0 : index
    %103 = vector.load %arg7[%c0_72, %c0_73] : memref<1x8xf32, #tpu.memory_space<vmem>>, vector<1x8xf32>
    %104 = vector.broadcast %103 : vector<1x8xf32> to vector<16x8xf32>
    %105 = arith.addf %102, %104 : vector<16x8xf32>
    %106 = arith.addf %105, %0 : vector<16x8xf32>
    %c0_74 = arith.constant 0 : index
    %c0_75 = arith.constant 0 : index
    %107 = vector.load %arg8[%c0_74, %c0_75] : memref<16x8xf32, #tpu.memory_space<vmem>>, vector<16x8xf32>
    tpu.vector_store %arg8[%c0_74, %c0_75], %106 {strides = array<i32>} : memref<16x8xf32, #tpu.memory_space<vmem>>, vector<16x8xf32>,
    return
  }
  func.func @transform_0(%arg0: i32) -> (i32, i32) {
    %c0_i32 = arith.constant 0 : i32
    %c0_i32_0 = arith.constant 0 : i32
    return %arg0, %c0_i32 : i32, i32
  }
  func.func @transform_1(%arg0: i32) -> (i32, i32) {
    %c0_i32 = arith.constant 0 : i32
    %c0_i32_0 = arith.constant 0 : i32
    %c0_i32_1 = arith.constant 0 : i32
    return %c0_i32, %c0_i32_0 : i32, i32
  }
  func.func @transform_2(%arg0: i32) -> (i32, i32) {
    %c0_i32 = arith.constant 0 : i32
    %c0_i32_0 = arith.constant 0 : i32
    %c0_i32_1 = arith.constant 0 : i32
    return %c0_i32, %c0_i32_0 : i32, i32
  }
  func.func @transform_3(%arg0: i32) -> (i32, i32, i32) {
    %c0_i32 = arith.constant 0 : i32
    %c0_i32_0 = arith.constant 0 : i32
    %c0_i32_1 = arith.constant 0 : i32
    %c0_i32_2 = arith.constant 0 : i32
    return %c0_i32, %c0_i32_0, %c0_i32_1 : i32, i32, i32
  }
  func.func @transform_4(%arg0: i32) -> (i32, i32) {
    %c0_i32 = arith.constant 0 : i32
    %c0_i32_0 = arith.constant 0 : i32
    %c0_i32_1 = arith.constant 0 : i32
    return %c0_i32, %c0_i32_0 : i32, i32
  }
  func.func @transform_5(%arg0: i32) -> (i32, i32) {
    %c0_i32 = arith.constant 0 : i32
    %c0_i32_0 = arith.constant 0 : i32
    %c0_i32_1 = arith.constant 0 : i32
    return %c0_i32, %c0_i32_0 : i32, i32
  }
  func.func @transform_6(%arg0: i32) -> (i32, i32) {
    %c0_i32 = arith.constant 0 : i32
    %c0_i32_0 = arith.constant 0 : i32
    %c0_i32_1 = arith.constant 0 : i32
    return %c0_i32, %c0_i32_0 : i32, i32
  }
  func.func @transform_7(%arg0: i32) -> (i32, i32) {
    %c0_i32 = arith.constant 0 : i32
    %c0_i32_0 = arith.constant 0 : i32
    return %arg0, %c0_i32 : i32, i32
  }
}

module attributes {stable_mosaic.version = 11 : i64} {
  func.func @_upsample_add_kernel(%arg0: i32, %arg1: memref<4x2x4x16xf32, #tpu.memory_space<vmem>>, %arg2: memref<4x4x8xf32, #tpu.memory_space<vmem>>, %arg3: memref<4x2x4x16xf32, #tpu.memory_space<vmem>>) attributes {dimension_semantics = [#tpu.dimension_semantics<parallel>], iteration_bounds = array<i64: 2>, scalar_prefetch = 0 : i64, scratch_operands = 0 : i64, tpu.core_type = #tpu.core_type<tc>, window_params = [{transform_indices = @transform_0, window_bounds = array<i64: 4, 2, 4, 16>}, {transform_indices = @transform_1, window_bounds = array<i64: 4, 4, 8>}, {transform_indices = @transform_2, window_bounds = array<i64: 4, 2, 4, 16>}]} {
    %c0 = arith.constant 0 : index
    %c0_0 = arith.constant 0 : index
    %c0_1 = arith.constant 0 : index
    %0 = vector.load %arg2[%c0, %c0_0, %c0_1] : memref<4x4x8xf32, #tpu.memory_space<vmem>>, vector<4x4x8xf32>
    %1 = tpu.concatenate %0, %0 in 2 : vector<4x4x8xf32>, vector<4x4x8xf32> -> vector<4x4x16xf32>
    %c0_2 = arith.constant 0 : index
    %c0_3 = arith.constant 0 : index
    %c0_4 = arith.constant 0 : index
    %c0_5 = arith.constant 0 : index
    %2 = vector.load %arg1[%c0_2, %c0_3, %c0_4, %c0_5] : memref<4x2x4x16xf32, #tpu.memory_space<vmem>>, vector<4x2x4x16xf32>
    %3 = vector.shape_cast %1 : vector<4x4x16xf32> to vector<4x1x4x16xf32>
    %4 = vector.broadcast %3 : vector<4x1x4x16xf32> to vector<4x2x4x16xf32>
    %5 = arith.addf %2, %4 : vector<4x2x4x16xf32>
    %c0_6 = arith.constant 0 : index
    %c0_7 = arith.constant 0 : index
    %c0_8 = arith.constant 0 : index
    %c0_9 = arith.constant 0 : index
    %6 = vector.load %arg3[%c0_6, %c0_7, %c0_8, %c0_9] : memref<4x2x4x16xf32, #tpu.memory_space<vmem>>, vector<4x2x4x16xf32>
    tpu.vector_store %arg3[%c0_6, %c0_7, %c0_8, %c0_9], %5 {strides = array<i32>} : memref<4x2x4x16xf32, #tpu.memory_space<vmem>>, vector<4x2x4x16xf32>,
    return
  }
  func.func @transform_0(%arg0: i32) -> (i32, i32, i32, i32) {
    %c0_i32 = arith.constant 0 : i32
    %c0_i32_0 = arith.constant 0 : i32
    %c0_i32_1 = arith.constant 0 : i32
    %c0_i32_2 = arith.constant 0 : i32
    return %arg0, %c0_i32, %c0_i32_0, %c0_i32_1 : i32, i32, i32, i32
  }
  func.func @transform_1(%arg0: i32) -> (i32, i32, i32) {
    %c0_i32 = arith.constant 0 : i32
    %c0_i32_0 = arith.constant 0 : i32
    %c0_i32_1 = arith.constant 0 : i32
    return %arg0, %c0_i32, %c0_i32_0 : i32, i32, i32
  }
  func.func @transform_2(%arg0: i32) -> (i32, i32, i32, i32) {
    %c0_i32 = arith.constant 0 : i32
    %c0_i32_0 = arith.constant 0 : i32
    %c0_i32_1 = arith.constant 0 : i32
    %c0_i32_2 = arith.constant 0 : i32
    return %arg0, %c0_i32, %c0_i32_0, %c0_i32_1 : i32, i32, i32, i32
  }
}

module attributes {stable_mosaic.version = 11 : i64} {
  func.func @kernel(%arg0: i32, %arg1: memref<256x8xf32, #tpu.memory_space<vmem>>, %arg2: memref<8x4xf32, #tpu.memory_space<vmem>>, %arg3: memref<1x4xf32, #tpu.memory_space<vmem>>, %arg4: memref<9x4x4xf32, #tpu.memory_space<vmem>>, %arg5: memref<1x4xf32, #tpu.memory_space<vmem>>, %arg6: memref<4x8xf32, #tpu.memory_space<vmem>>, %arg7: memref<1x8xf32, #tpu.memory_space<vmem>>, %arg8: memref<256x8xf32, #tpu.memory_space<vmem>>, %arg9: memref<320x4xf32, #tpu.memory_space<vmem>>) attributes {dimension_semantics = [#tpu.dimension_semantics<parallel>], iteration_bounds = array<i64: 2>, scalar_prefetch = 0 : i64, scratch_operands = 1 : i64, tpu.core_type = #tpu.core_type<tc>, window_params = [{transform_indices = @transform_0, window_bounds = array<i64: 256, 8>}, {pipeline_mode = #tpu.pipeline_mode<synchronous>, transform_indices = @transform_1, window_bounds = array<i64: 8, 4>}, {pipeline_mode = #tpu.pipeline_mode<synchronous>, transform_indices = @transform_2, window_bounds = array<i64: 1, 4>}, {pipeline_mode = #tpu.pipeline_mode<synchronous>, transform_indices = @transform_3, window_bounds = array<i64: 9, 4, 4>}, {pipeline_mode = #tpu.pipeline_mode<synchronous>, transform_indices = @transform_4, window_bounds = array<i64: 1, 4>}, {pipeline_mode = #tpu.pipeline_mode<synchronous>, transform_indices = @transform_5, window_bounds = array<i64: 4, 8>}, {pipeline_mode = #tpu.pipeline_mode<synchronous>, transform_indices = @transform_6, window_bounds = array<i64: 1, 8>}, {transform_indices = @transform_7, window_bounds = array<i64: 256, 8>}]} {
    %c0 = arith.constant 0 : index
    %c0_0 = arith.constant 0 : index
    %0 = vector.load %arg1[%c0, %c0_0] : memref<256x8xf32, #tpu.memory_space<vmem>>, vector<256x8xf32>
    %c0_1 = arith.constant 0 : index
    %c0_2 = arith.constant 0 : index
    %1 = vector.load %arg2[%c0_1, %c0_2] : memref<8x4xf32, #tpu.memory_space<vmem>>, vector<8x4xf32>
    %cst = arith.constant dense<0.000000e+00> : vector<256x4xf32>
    %2 = tpu.matmul %0, %1, %cst {dimension_numbers = #tpu.dot_dimension_numbers<[1], [0], [0], [1], [0, 0, 1, 1], [], []>} : vector<256x8xf32>, vector<8x4xf32>, vector<256x4xf32> -> vector<256x4xf32>
    %c0_3 = arith.constant 0 : index
    %c0_4 = arith.constant 0 : index
    %3 = vector.load %arg3[%c0_3, %c0_4] : memref<1x4xf32, #tpu.memory_space<vmem>>, vector<1x4xf32>
    %4 = vector.broadcast %3 : vector<1x4xf32> to vector<256x4xf32>
    %5 = arith.addf %2, %4 : vector<256x4xf32>
    %cst_5 = arith.constant 0.000000e+00 : f32
    %6 = vector.broadcast %cst_5 : f32 to vector<256x4xf32>
    %7 = arith.cmpf ogt, %5, %6 : vector<256x4xf32>
    %cst_6 = arith.constant 2.000000e-01 : f32
    %8 = vector.broadcast %cst_6 : f32 to vector<256x4xf32>
    %9 = arith.mulf %8, %5 : vector<256x4xf32>
    %10 = arith.select %7, %5, %9 : vector<256x4xi1>, vector<256x4xf32>
    %cst_7 = arith.constant 0.000000e+00 : f32
    %11 = vector.broadcast %cst_7 : f32 to vector<320x4xf32>
    %c0_8 = arith.constant 0 : index
    %c0_9 = arith.constant 0 : index
    %12 = vector.load %arg9[%c0_8, %c0_9] : memref<320x4xf32, #tpu.memory_space<vmem>>, vector<320x4xf32>
    tpu.vector_store %arg9[%c0_8, %c0_9], %11 {strides = array<i32>} : memref<320x4xf32, #tpu.memory_space<vmem>>, vector<320x4xf32>,
    %c32 = arith.constant 32 : index
    %c0_10 = arith.constant 0 : index
    %13 = vector.load %arg9[%c32, %c0_10] : memref<320x4xf32, #tpu.memory_space<vmem>>, vector<256x4xf32>
    tpu.vector_store %arg9[%c32, %c0_10], %10 {strides = array<i32>} : memref<320x4xf32, #tpu.memory_space<vmem>>, vector<256x4xf32>,
    %14 = tpu.iota {dimensions = array<i32: 0>} : vector<256x4xi32>
    %c16_i32 = arith.constant 16 : i32
    %c0_i32 = arith.constant 0 : i32
    %15 = arith.cmpi eq, %c16_i32, %c0_i32 : i32
    %c1_i32 = arith.constant 1 : i32
    %16 = arith.select %15, %c1_i32, %c16_i32 : i32
    %17 = vector.broadcast %16 : i32 to vector<256x4xi32>
    %18 = arith.remsi %14, %17 : vector<256x4xi32>
    %c0_i32_11 = arith.constant 0 : i32
    %19 = vector.broadcast %c0_i32_11 : i32 to vector<256x4xi32>
    %20 = arith.cmpi ne, %18, %19 : vector<256x4xi32>
    %c0_i32_12 = arith.constant 0 : i32
    %21 = vector.broadcast %c0_i32_12 : i32 to vector<256x4xi32>
    %22 = arith.cmpi slt, %18, %21 : vector<256x4xi32>
    %c0_i32_13 = arith.constant 0 : i32
    %23 = arith.cmpi slt, %16, %c0_i32_13 : i32
    %24 = vector.broadcast %23 : i1 to vector<256x4xi1>
    %25 = vector.broadcast %24 : vector<256x4xi1> to vector<256x4xi1>
    %26 = arith.xori %22, %25 : vector<256x4xi1>
    %27 = arith.andi %26, %20 : vector<256x4xi1>
    %28 = vector.broadcast %16 : i32 to vector<256x4xi32>
    %29 = arith.addi %18, %28 : vector<256x4xi32>
    %30 = arith.select %27, %29, %18 : vector<256x4xi1>, vector<256x4xi32>
    %c1_i32_14 = arith.constant 1 : i32
    %31 = vector.broadcast %c1_i32_14 : i32 to vector<256x4xi32>
    %32 = arith.cmpi sge, %30, %31 : vector<256x4xi32>
    %c14_i32 = arith.constant 14 : i32
    %33 = vector.broadcast %c14_i32 : i32 to vector<256x4xi32>
    %34 = arith.cmpi sle, %30, %33 : vector<256x4xi32>
    %cst_15 = arith.constant 0.000000e+00 : f32
    %35 = vector.broadcast %cst_15 : f32 to vector<256x4xf32>
    %c15 = arith.constant 15 : index
    %c0_16 = arith.constant 0 : index
    %36 = vector.load %arg9[%c15, %c0_16] : memref<320x4xf32, #tpu.memory_space<vmem>>, vector<256x4xf32>
    %cst_17 = arith.constant 0.000000e+00 : f32
    %37 = vector.broadcast %cst_17 : f32 to vector<256x4xf32>
    %38 = arith.select %32, %36, %37 : vector<256x4xi1>, vector<256x4xf32>
    %c0_18 = arith.constant 0 : index
    %c0_19 = arith.constant 0 : index
    %c0_20 = arith.constant 0 : index
    %39 = vector.load %arg4[%c0_18, %c0_19, %c0_20] : memref<9x4x4xf32, #tpu.memory_space<vmem>>, vector<1x4x4xf32>
    %40 = vector.shape_cast %39 : vector<1x4x4xf32> to vector<4x4xf32>
    %cst_21 = arith.constant dense<0.000000e+00> : vector<256x4xf32>
    %41 = tpu.matmul %38, %40, %cst_21 {dimension_numbers = #tpu.dot_dimension_numbers<[1], [0], [0], [1], [0, 0, 1, 1], [], []>} : vector<256x4xf32>, vector<4x4xf32>, vector<256x4xf32> -> vector<256x4xf32>
    %42 = arith.addf %35, %41 : vector<256x4xf32>
    %c16 = arith.constant 16 : index
    %c0_22 = arith.constant 0 : index
    %43 = vector.load %arg9[%c16, %c0_22] : memref<320x4xf32, #tpu.memory_space<vmem>>, vector<256x4xf32>
    %c1 = arith.constant 1 : index
    %c0_23 = arith.constant 0 : index
    %c0_24 = arith.constant 0 : index
    %44 = vector.load %arg4[%c1, %c0_23, %c0_24] : memref<9x4x4xf32, #tpu.memory_space<vmem>>, vector<1x4x4xf32>
    %45 = vector.shape_cast %44 : vector<1x4x4xf32> to vector<4x4xf32>
    %cst_25 = arith.constant dense<0.000000e+00> : vector<256x4xf32>
    %46 = tpu.matmul %43, %45, %cst_25 {dimension_numbers = #tpu.dot_dimension_numbers<[1], [0], [0], [1], [0, 0, 1, 1], [], []>} : vector<256x4xf32>, vector<4x4xf32>, vector<256x4xf32> -> vector<256x4xf32>
    %47 = arith.addf %42, %46 : vector<256x4xf32>
    %c17 = arith.constant 17 : index
    %c0_26 = arith.constant 0 : index
    %48 = vector.load %arg9[%c17, %c0_26] : memref<320x4xf32, #tpu.memory_space<vmem>>, vector<256x4xf32>
    %cst_27 = arith.constant 0.000000e+00 : f32
    %49 = vector.broadcast %cst_27 : f32 to vector<256x4xf32>
    %50 = arith.select %34, %48, %49 : vector<256x4xi1>, vector<256x4xf32>
    %c2 = arith.constant 2 : index
    %c0_28 = arith.constant 0 : index
    %c0_29 = arith.constant 0 : index
    %51 = vector.load %arg4[%c2, %c0_28, %c0_29] : memref<9x4x4xf32, #tpu.memory_space<vmem>>, vector<1x4x4xf32>
    %52 = vector.shape_cast %51 : vector<1x4x4xf32> to vector<4x4xf32>
    %cst_30 = arith.constant dense<0.000000e+00> : vector<256x4xf32>
    %53 = tpu.matmul %50, %52, %cst_30 {dimension_numbers = #tpu.dot_dimension_numbers<[1], [0], [0], [1], [0, 0, 1, 1], [], []>} : vector<256x4xf32>, vector<4x4xf32>, vector<256x4xf32> -> vector<256x4xf32>
    %54 = arith.addf %47, %53 : vector<256x4xf32>
    %c31 = arith.constant 31 : index
    %c0_31 = arith.constant 0 : index
    %55 = vector.load %arg9[%c31, %c0_31] : memref<320x4xf32, #tpu.memory_space<vmem>>, vector<256x4xf32>
    %cst_32 = arith.constant 0.000000e+00 : f32
    %56 = vector.broadcast %cst_32 : f32 to vector<256x4xf32>
    %57 = arith.select %32, %55, %56 : vector<256x4xi1>, vector<256x4xf32>
    %c3 = arith.constant 3 : index
    %c0_33 = arith.constant 0 : index
    %c0_34 = arith.constant 0 : index
    %58 = vector.load %arg4[%c3, %c0_33, %c0_34] : memref<9x4x4xf32, #tpu.memory_space<vmem>>, vector<1x4x4xf32>
    %59 = vector.shape_cast %58 : vector<1x4x4xf32> to vector<4x4xf32>
    %cst_35 = arith.constant dense<0.000000e+00> : vector<256x4xf32>
    %60 = tpu.matmul %57, %59, %cst_35 {dimension_numbers = #tpu.dot_dimension_numbers<[1], [0], [0], [1], [0, 0, 1, 1], [], []>} : vector<256x4xf32>, vector<4x4xf32>, vector<256x4xf32> -> vector<256x4xf32>
    %61 = arith.addf %54, %60 : vector<256x4xf32>
    %c32_36 = arith.constant 32 : index
    %c0_37 = arith.constant 0 : index
    %62 = vector.load %arg9[%c32_36, %c0_37] : memref<320x4xf32, #tpu.memory_space<vmem>>, vector<256x4xf32>
    %c4 = arith.constant 4 : index
    %c0_38 = arith.constant 0 : index
    %c0_39 = arith.constant 0 : index
    %63 = vector.load %arg4[%c4, %c0_38, %c0_39] : memref<9x4x4xf32, #tpu.memory_space<vmem>>, vector<1x4x4xf32>
    %64 = vector.shape_cast %63 : vector<1x4x4xf32> to vector<4x4xf32>
    %cst_40 = arith.constant dense<0.000000e+00> : vector<256x4xf32>
    %65 = tpu.matmul %62, %64, %cst_40 {dimension_numbers = #tpu.dot_dimension_numbers<[1], [0], [0], [1], [0, 0, 1, 1], [], []>} : vector<256x4xf32>, vector<4x4xf32>, vector<256x4xf32> -> vector<256x4xf32>
    %66 = arith.addf %61, %65 : vector<256x4xf32>
    %c33 = arith.constant 33 : index
    %c0_41 = arith.constant 0 : index
    %67 = vector.load %arg9[%c33, %c0_41] : memref<320x4xf32, #tpu.memory_space<vmem>>, vector<256x4xf32>
    %cst_42 = arith.constant 0.000000e+00 : f32
    %68 = vector.broadcast %cst_42 : f32 to vector<256x4xf32>
    %69 = arith.select %34, %67, %68 : vector<256x4xi1>, vector<256x4xf32>
    %c5 = arith.constant 5 : index
    %c0_43 = arith.constant 0 : index
    %c0_44 = arith.constant 0 : index
    %70 = vector.load %arg4[%c5, %c0_43, %c0_44] : memref<9x4x4xf32, #tpu.memory_space<vmem>>, vector<1x4x4xf32>
    %71 = vector.shape_cast %70 : vector<1x4x4xf32> to vector<4x4xf32>
    %cst_45 = arith.constant dense<0.000000e+00> : vector<256x4xf32>
    %72 = tpu.matmul %69, %71, %cst_45 {dimension_numbers = #tpu.dot_dimension_numbers<[1], [0], [0], [1], [0, 0, 1, 1], [], []>} : vector<256x4xf32>, vector<4x4xf32>, vector<256x4xf32> -> vector<256x4xf32>
    %73 = arith.addf %66, %72 : vector<256x4xf32>
    %c47 = arith.constant 47 : index
    %c0_46 = arith.constant 0 : index
    %74 = vector.load %arg9[%c47, %c0_46] : memref<320x4xf32, #tpu.memory_space<vmem>>, vector<256x4xf32>
    %cst_47 = arith.constant 0.000000e+00 : f32
    %75 = vector.broadcast %cst_47 : f32 to vector<256x4xf32>
    %76 = arith.select %32, %74, %75 : vector<256x4xi1>, vector<256x4xf32>
    %c6 = arith.constant 6 : index
    %c0_48 = arith.constant 0 : index
    %c0_49 = arith.constant 0 : index
    %77 = vector.load %arg4[%c6, %c0_48, %c0_49] : memref<9x4x4xf32, #tpu.memory_space<vmem>>, vector<1x4x4xf32>
    %78 = vector.shape_cast %77 : vector<1x4x4xf32> to vector<4x4xf32>
    %cst_50 = arith.constant dense<0.000000e+00> : vector<256x4xf32>
    %79 = tpu.matmul %76, %78, %cst_50 {dimension_numbers = #tpu.dot_dimension_numbers<[1], [0], [0], [1], [0, 0, 1, 1], [], []>} : vector<256x4xf32>, vector<4x4xf32>, vector<256x4xf32> -> vector<256x4xf32>
    %80 = arith.addf %73, %79 : vector<256x4xf32>
    %c48 = arith.constant 48 : index
    %c0_51 = arith.constant 0 : index
    %81 = vector.load %arg9[%c48, %c0_51] : memref<320x4xf32, #tpu.memory_space<vmem>>, vector<256x4xf32>
    %c7 = arith.constant 7 : index
    %c0_52 = arith.constant 0 : index
    %c0_53 = arith.constant 0 : index
    %82 = vector.load %arg4[%c7, %c0_52, %c0_53] : memref<9x4x4xf32, #tpu.memory_space<vmem>>, vector<1x4x4xf32>
    %83 = vector.shape_cast %82 : vector<1x4x4xf32> to vector<4x4xf32>
    %cst_54 = arith.constant dense<0.000000e+00> : vector<256x4xf32>
    %84 = tpu.matmul %81, %83, %cst_54 {dimension_numbers = #tpu.dot_dimension_numbers<[1], [0], [0], [1], [0, 0, 1, 1], [], []>} : vector<256x4xf32>, vector<4x4xf32>, vector<256x4xf32> -> vector<256x4xf32>
    %85 = arith.addf %80, %84 : vector<256x4xf32>
    %c49 = arith.constant 49 : index
    %c0_55 = arith.constant 0 : index
    %86 = vector.load %arg9[%c49, %c0_55] : memref<320x4xf32, #tpu.memory_space<vmem>>, vector<256x4xf32>
    %cst_56 = arith.constant 0.000000e+00 : f32
    %87 = vector.broadcast %cst_56 : f32 to vector<256x4xf32>
    %88 = arith.select %34, %86, %87 : vector<256x4xi1>, vector<256x4xf32>
    %c8 = arith.constant 8 : index
    %c0_57 = arith.constant 0 : index
    %c0_58 = arith.constant 0 : index
    %89 = vector.load %arg4[%c8, %c0_57, %c0_58] : memref<9x4x4xf32, #tpu.memory_space<vmem>>, vector<1x4x4xf32>
    %90 = vector.shape_cast %89 : vector<1x4x4xf32> to vector<4x4xf32>
    %cst_59 = arith.constant dense<0.000000e+00> : vector<256x4xf32>
    %91 = tpu.matmul %88, %90, %cst_59 {dimension_numbers = #tpu.dot_dimension_numbers<[1], [0], [0], [1], [0, 0, 1, 1], [], []>} : vector<256x4xf32>, vector<4x4xf32>, vector<256x4xf32> -> vector<256x4xf32>
    %92 = arith.addf %85, %91 : vector<256x4xf32>
    %c0_60 = arith.constant 0 : index
    %c0_61 = arith.constant 0 : index
    %93 = vector.load %arg5[%c0_60, %c0_61] : memref<1x4xf32, #tpu.memory_space<vmem>>, vector<1x4xf32>
    %94 = vector.broadcast %93 : vector<1x4xf32> to vector<256x4xf32>
    %95 = arith.addf %92, %94 : vector<256x4xf32>
    %cst_62 = arith.constant 0.000000e+00 : f32
    %96 = vector.broadcast %cst_62 : f32 to vector<256x4xf32>
    %97 = arith.cmpf ogt, %95, %96 : vector<256x4xf32>
    %cst_63 = arith.constant 2.000000e-01 : f32
    %98 = vector.broadcast %cst_63 : f32 to vector<256x4xf32>
    %99 = arith.mulf %98, %95 : vector<256x4xf32>
    %100 = arith.select %97, %95, %99 : vector<256x4xi1>, vector<256x4xf32>
    %c0_64 = arith.constant 0 : index
    %c0_65 = arith.constant 0 : index
    %101 = vector.load %arg6[%c0_64, %c0_65] : memref<4x8xf32, #tpu.memory_space<vmem>>, vector<4x8xf32>
    %cst_66 = arith.constant dense<0.000000e+00> : vector<256x8xf32>
    %102 = tpu.matmul %100, %101, %cst_66 {dimension_numbers = #tpu.dot_dimension_numbers<[1], [0], [0], [1], [0, 0, 1, 1], [], []>} : vector<256x4xf32>, vector<4x8xf32>, vector<256x8xf32> -> vector<256x8xf32>
    %c0_67 = arith.constant 0 : index
    %c0_68 = arith.constant 0 : index
    %103 = vector.load %arg7[%c0_67, %c0_68] : memref<1x8xf32, #tpu.memory_space<vmem>>, vector<1x8xf32>
    %104 = vector.broadcast %103 : vector<1x8xf32> to vector<256x8xf32>
    %105 = arith.addf %102, %104 : vector<256x8xf32>
    %106 = arith.addf %105, %0 : vector<256x8xf32>
    %c0_69 = arith.constant 0 : index
    %c0_70 = arith.constant 0 : index
    %107 = vector.load %arg8[%c0_69, %c0_70] : memref<256x8xf32, #tpu.memory_space<vmem>>, vector<256x8xf32>
    tpu.vector_store %arg8[%c0_69, %c0_70], %106 {strides = array<i32>} : memref<256x8xf32, #tpu.memory_space<vmem>>, vector<256x8xf32>,
    return
  }
  func.func @transform_0(%arg0: i32) -> (i32, i32) {
    %c0_i32 = arith.constant 0 : i32
    %c0_i32_0 = arith.constant 0 : i32
    return %arg0, %c0_i32 : i32, i32
  }
  func.func @transform_1(%arg0: i32) -> (i32, i32) {
    %c0_i32 = arith.constant 0 : i32
    %c0_i32_0 = arith.constant 0 : i32
    %c0_i32_1 = arith.constant 0 : i32
    return %c0_i32, %c0_i32_0 : i32, i32
  }
  func.func @transform_2(%arg0: i32) -> (i32, i32) {
    %c0_i32 = arith.constant 0 : i32
    %c0_i32_0 = arith.constant 0 : i32
    %c0_i32_1 = arith.constant 0 : i32
    return %c0_i32, %c0_i32_0 : i32, i32
  }
  func.func @transform_3(%arg0: i32) -> (i32, i32, i32) {
    %c0_i32 = arith.constant 0 : i32
    %c0_i32_0 = arith.constant 0 : i32
    %c0_i32_1 = arith.constant 0 : i32
    %c0_i32_2 = arith.constant 0 : i32
    return %c0_i32, %c0_i32_0, %c0_i32_1 : i32, i32, i32
  }
  func.func @transform_4(%arg0: i32) -> (i32, i32) {
    %c0_i32 = arith.constant 0 : i32
    %c0_i32_0 = arith.constant 0 : i32
    %c0_i32_1 = arith.constant 0 : i32
    return %c0_i32, %c0_i32_0 : i32, i32
  }
  func.func @transform_5(%arg0: i32) -> (i32, i32) {
    %c0_i32 = arith.constant 0 : i32
    %c0_i32_0 = arith.constant 0 : i32
    %c0_i32_1 = arith.constant 0 : i32
    return %c0_i32, %c0_i32_0 : i32, i32
  }
  func.func @transform_6(%arg0: i32) -> (i32, i32) {
    %c0_i32 = arith.constant 0 : i32
    %c0_i32_0 = arith.constant 0 : i32
    %c0_i32_1 = arith.constant 0 : i32
    return %c0_i32, %c0_i32_0 : i32, i32
  }
  func.func @transform_7(%arg0: i32) -> (i32, i32) {
    %c0_i32 = arith.constant 0 : i32
    %c0_i32_0 = arith.constant 0 : i32
    return %arg0, %c0_i32 : i32, i32
  }
}

module attributes {stable_mosaic.version = 11 : i64} {
  func.func @_upsample_add_kernel(%arg0: i32, %arg1: memref<8x2x8x16xf32, #tpu.memory_space<vmem>>, %arg2: memref<8x8x8xf32, #tpu.memory_space<vmem>>, %arg3: memref<8x2x8x16xf32, #tpu.memory_space<vmem>>) attributes {dimension_semantics = [#tpu.dimension_semantics<parallel>], iteration_bounds = array<i64: 2>, scalar_prefetch = 0 : i64, scratch_operands = 0 : i64, tpu.core_type = #tpu.core_type<tc>, window_params = [{transform_indices = @transform_0, window_bounds = array<i64: 8, 2, 8, 16>}, {transform_indices = @transform_1, window_bounds = array<i64: 8, 8, 8>}, {transform_indices = @transform_2, window_bounds = array<i64: 8, 2, 8, 16>}]} {
    %c0 = arith.constant 0 : index
    %c0_0 = arith.constant 0 : index
    %c0_1 = arith.constant 0 : index
    %0 = vector.load %arg2[%c0, %c0_0, %c0_1] : memref<8x8x8xf32, #tpu.memory_space<vmem>>, vector<8x8x8xf32>
    %1 = tpu.concatenate %0, %0 in 2 : vector<8x8x8xf32>, vector<8x8x8xf32> -> vector<8x8x16xf32>
    %c0_2 = arith.constant 0 : index
    %c0_3 = arith.constant 0 : index
    %c0_4 = arith.constant 0 : index
    %c0_5 = arith.constant 0 : index
    %2 = vector.load %arg1[%c0_2, %c0_3, %c0_4, %c0_5] : memref<8x2x8x16xf32, #tpu.memory_space<vmem>>, vector<8x2x8x16xf32>
    %3 = vector.shape_cast %1 : vector<8x8x16xf32> to vector<8x1x8x16xf32>
    %4 = vector.broadcast %3 : vector<8x1x8x16xf32> to vector<8x2x8x16xf32>
    %5 = arith.addf %2, %4 : vector<8x2x8x16xf32>
    %c0_6 = arith.constant 0 : index
    %c0_7 = arith.constant 0 : index
    %c0_8 = arith.constant 0 : index
    %c0_9 = arith.constant 0 : index
    %6 = vector.load %arg3[%c0_6, %c0_7, %c0_8, %c0_9] : memref<8x2x8x16xf32, #tpu.memory_space<vmem>>, vector<8x2x8x16xf32>
    tpu.vector_store %arg3[%c0_6, %c0_7, %c0_8, %c0_9], %5 {strides = array<i32>} : memref<8x2x8x16xf32, #tpu.memory_space<vmem>>, vector<8x2x8x16xf32>,
    return
  }
  func.func @transform_0(%arg0: i32) -> (i32, i32, i32, i32) {
    %c0_i32 = arith.constant 0 : i32
    %c0_i32_0 = arith.constant 0 : i32
    %c0_i32_1 = arith.constant 0 : i32
    %c0_i32_2 = arith.constant 0 : i32
    return %arg0, %c0_i32, %c0_i32_0, %c0_i32_1 : i32, i32, i32, i32
  }
  func.func @transform_1(%arg0: i32) -> (i32, i32, i32) {
    %c0_i32 = arith.constant 0 : i32
    %c0_i32_0 = arith.constant 0 : i32
    %c0_i32_1 = arith.constant 0 : i32
    return %arg0, %c0_i32, %c0_i32_0 : i32, i32, i32
  }
  func.func @transform_2(%arg0: i32) -> (i32, i32, i32, i32) {
    %c0_i32 = arith.constant 0 : i32
    %c0_i32_0 = arith.constant 0 : i32
    %c0_i32_1 = arith.constant 0 : i32
    %c0_i32_2 = arith.constant 0 : i32
    return %arg0, %c0_i32, %c0_i32_0, %c0_i32_1 : i32, i32, i32, i32
  }
}

</mosaic_0001>

<bundles_post_ra>
// kernel: hourglass_forward.12
= control target key start
LH: loop header
LB: loop body
LE: loop exit
PB: predicated region body
PF: predicated region fallthrough
CT: control target
= control target key end

     0   :  { %s293_s6 = smov 0   ;;  %s322_s0 = inlined_call_operand.vmem [shape: f32[16,2,8,16], index: 0, kind: input, shape index: {}]   ;;  %s323_s1 = inlined_call_operand.vmem [shape: f32[16,8,8], index: 1, kind: output, shape index: {}]  }
   0x1 LB: > { %s252_s7 = sadd.s32 4294967295, %s280_s6   ;;  %p256_p0 = scmp.ge.s32.totalorder %s280_s6, 1  ;;  %s280_s6 = sphi %s293_s6, %s11_s6  }
   0x2   : > { %p89_p1 = scmp.lt.s32.totalorder %s280_s6, 3 }
   0x4   : > { %p90_p2 = pnand %p256_p0, %p89_p1 }
   0x5   : > { %s257_s8 = sshll.u32 (!%p90_p2), %s252_s7, 3  ;;  %s282_s13 = smov (!%p90_p2), 120   ;;  %vm187_vm0 = vcmask (!%p90_p2), 64512  }
   0x6   : > { %93 = sbr.rel (%p90_p2) target bundleno = 150 (0x96), region = 24  ;;  %p111_p3 = scmp.lt.s32.totalorder (!%p90_p2), %s257_s8, 15 }
   0xd   : > { %s325_s8 = smov (!%p111_p3, %s257_s8), 15 }
   0xe   : > { %s264_s9 = sshll.u32 %s325_s8, 4  ;;  %s261_s14 = sshll.u32 %s325_s8, 3 }
   0xf   : > { %s115_s12 = scalar_lea.vmem %s322_s0, %s264_s9  ;;  %s121_s17 = scalar_lea.vmem %s323_s1, %s261_s14 }
  0x10   : > { %v127_v0 = vld [vmem:[%s115_s12 + $0x20] sm:$0xff]  ;;  %v128_v1 = vld [vmem:[%s115_s12 + $0x28] sm:$0xff]  ;;  %v129_v5 = vld [vmem:[%s115_s12 + $0x30] sm:$0xff] }
  0x11   : > { %v123_v2 = vld [vmem:[%s115_s12] sm:$0xff]  ;;  %v141_v3 = vmax.f32 %v127_v0, %v128_v1  ;;  %v124_v4 = vld [vmem:[%s115_s12 + $0x8] sm:$0xff]  ;;  %v130_v6 = vld [vmem:[%s115_s12 + $0x38] sm:$0xff] }
  0x12   : > { %v139_v7 = vmax.f32 %v123_v2, %v124_v4  ;;  %v125_v8 = vld [vmem:[%s115_s12 + $0x10] sm:$0xff]  ;;  %v126_v9 = vld [vmem:[%s115_s12 + $0x18] sm:$0xff]  ;;  %v142_v10 = vmax.f32 %v129_v5, %v130_v6  ;;  %v131_v14 = vld [vmem:[%s115_s12 + $0x40] sm:$0xff] }
  0x13   : > { %159 = vrot.lane.b32.xlu1 %v141_v3, %s282_s13  ;;  %v140_v11 = vmax.f32 %v125_v8, %v126_v9  ;;  %v133_v12 = vld [vmem:[%s115_s12 + $0x50] sm:$0xff]  ;;  %v134_v13 = vld [vmem:[%s115_s12 + $0x58] sm:$0xff]  ;;  %v132_v15 = vld [vmem:[%s115_s12 + $0x48] sm:$0xff] }
  0x14   : > { %155 = vrot.lane.b32.xlu0 %v139_v7, %s282_s13  ;;  %v144_v16 = vmax.f32 %v133_v12, %v134_v13  ;;  %v143_v17 = vmax.f32 %v131_v14, %v132_v15  ;;  %v137_v18 = vld [vmem:[%s115_s12 + $0x70] sm:$0xff]  ;;  %v138_v19 = vld [vmem:[%s115_s12 + $0x78] sm:$0xff]  ;;  %v135_v20 = vld [vmem:[%s115_s12 + $0x60] sm:$0xff] }
  0x15   : > { %v136_v21 = vld [vmem:[%s115_s12 + $0x68] sm:$0xff]  ;;  %v146_v22 = vmax.f32 %v137_v18, %v138_v19 }
  0x16   : > { %v145_v23 = vmax.f32 %v135_v20, %v136_v21 }
  0x17   : > { %161 = vrot.lane.b32.xlu1 %v142_v10, %s282_s13 }
  0x18   : > { %157 = vrot.lane.b32.xlu0 %v140_v11, %s282_s13 }
  0x1b   : > { %165 = vrot.lane.b32.xlu1 %v144_v16, %s282_s13 }
  0x1c   : > { %163 = vrot.lane.b32.xlu0 %v143_v17, %s282_s13 }
  0x1f   : > { %169 = vrot.lane.b32.xlu1 %v146_v22, %s282_s13 }
  0x20   : > { %167 = vrot.lane.b32.xlu0 %v145_v23, %s282_s13 }
  0x85   : > { %v160_v24 = vpop.permute.xlu1 %159 }
  0x86   : > { %v181_v25 = vmax.f32 %v141_v3, %v160_v24  ;;  %v156_v26 = vpop.permute.xlu0 %155 }
  0x87   : > { %v179_v27 = vmax.f32 %v139_v7, %v156_v26 }
  0x88   : > { %190 = vst.msk [vmem:[%s121_s17 + $0x10] sm:$0xff] %vm187_vm0, %v181_v25 }
  0x89   : > { %188 = vst.msk [vmem:[%s121_s17] sm:$0xff] %vm187_vm0, %v179_v27  ;;  %v162_v28 = vpop.permute.xlu1 %161 }
  0x8a   : > { %v182_v29 = vmax.f32 %v142_v10, %v162_v28  ;;  %v158_v30 = vpop.permute.xlu0 %157 }
  0x8b   : > { %v180_v31 = vmax.f32 %v140_v11, %v158_v30 }
  0x8c   : > { %191 = vst.msk [vmem:[%s121_s17 + $0x18] sm:$0xff] %vm187_vm0, %v182_v29 }
  0x8d   : > { %189 = vst.msk [vmem:[%s121_s17 + $0x8] sm:$0xff] %vm187_vm0, %v180_v31  ;;  %v166_v32 = vpop.permute.xlu1 %165 }
  0x8e   : > { %v184_v33 = vmax.f32 %v144_v16, %v166_v32  ;;  %v164_v34 = vpop.permute.xlu0 %163 }
  0x8f   : > { %v183_v35 = vmax.f32 %v143_v17, %v164_v34 }
  0x90   : > { %193 = vst.msk [vmem:[%s121_s17 + $0x28] sm:$0xff] %vm187_vm0, %v184_v33 }
  0x91   : > { %192 = vst.msk [vmem:[%s121_s17 + $0x20] sm:$0xff] %vm187_vm0, %v183_v35  ;;  %v170_v36 = vpop.permute.xlu1 %169 }
  0x92   : > { %v186_v37 = vmax.f32 %v146_v22, %v170_v36  ;;  %v168_v38 = vpop.permute.xlu0 %167 }
  0x93   : > { %v185_v39 = vmax.f32 %v145_v23, %v168_v38 }
  0x94   : > { %195 = vst.msk [vmem:[%s121_s17 + $0x38] sm:$0xff] %vm187_vm0, %v186_v37 }
  0x95   : > { %194 = vst.msk [vmem:[%s121_s17 + $0x30] sm:$0xff] %vm187_vm0, %v185_v39 }
  0x96 PF: > { %s11_s6 = sadd.s32 1, %s280_s6  }
  0x97   : > { %p8_p4 = scmp.ge.s32.totalorder %s11_s6, 4  }
  0x99   :  { %10 = sbr.rel (!%p8_p4) target bundleno = 1 (0x1), region = 54 }

// kernel: hourglass_forward.15
= control target key start
LH: loop header
LB: loop body
LE: loop exit
PB: predicated region body
PF: predicated region fallthrough
CT: control target
= control target key end

     0   :  { %s257_s6 = smov 0   ;;  %s274_s0 = inlined_call_operand.vmem [shape: f32[8,2,4,16], index: 0, kind: input, shape index: {}]   ;;  %s275_s1 = inlined_call_operand.vmem [shape: f32[8,4,8], index: 1, kind: output, shape index: {}]  }
   0x1 LB: > { %s216_s7 = sadd.s32 4294967295, %s244_s6   ;;  %p220_p0 = scmp.ge.s32.totalorder %s244_s6, 1  ;;  %s244_s6 = sphi %s257_s6, %s11_s6  }
   0x2   : > { %p89_p1 = scmp.lt.s32.totalorder %s244_s6, 3 }
   0x4   : > { %p90_p2 = pnand %p220_p0, %p89_p1 }
   0x5   : > { %s221_s8 = sshll.u32 (!%p90_p2), %s216_s7, 2  ;;  %s246_s13 = smov (!%p90_p2), 120   ;;  %vm155_vm0 = vcmask (!%p90_p2), 60416  }
   0x6   : > { %93 = sbr.rel (%p90_p2) target bundleno = 142 (0x8e), region = 24  ;;  %p111_p3 = scmp.lt.s32.totalorder (!%p90_p2), %s221_s8, 7 }
   0xd   : > { %s277_s8 = smov (!%p111_p3, %s221_s8), 7 }
   0xe   : > { %s228_s9 = sshll.u32 %s277_s8, 3  ;;  %s225_s14 = sshll.u32 %s277_s8, 2 }
   0xf   : > { %s115_s12 = scalar_lea.vmem %s274_s0, %s228_s9  ;;  %s121_s17 = scalar_lea.vmem %s275_s1, %s225_s14 }
  0x10   : > { %v123_v0 = vld [vmem:[%s115_s12] sm:$0xf]  ;;  %v124_v1 = vld [vmem:[%s115_s12 + $0x4] sm:$0xf]  ;;  %v127_v2 = vld [vmem:[%s115_s12 + $0x10] sm:$0xf] }
  0x11   : > { %v131_v3 = vmax.f32 %v123_v0, %v124_v1  ;;  %v128_v4 = vld [vmem:[%s115_s12 + $0x14] sm:$0xf]  ;;  %v125_v5 = vld [vmem:[%s115_s12 + $0x8] sm:$0xf]  ;;  %v126_v6 = vld [vmem:[%s115_s12 + $0xc] sm:$0xf] }
  0x12   : > { %v133_v7 = vmax.f32 %v127_v2, %v128_v4  ;;  %v129_v8 = vld [vmem:[%s115_s12 + $0x18] sm:$0xf]  ;;  %v130_v9 = vld [vmem:[%s115_s12 + $0x1c] sm:$0xf]  ;;  %v132_v10 = vmax.f32 %v125_v5, %v126_v6 }
  0x13   : > { %139 = vrot.lane.b32.xlu0 %v131_v3, %s246_s13  ;;  %v134_v11 = vmax.f32 %v129_v8, %v130_v9 }
  0x14   : > { %143 = vrot.lane.b32.xlu1 %v133_v7, %s246_s13 }
  0x17   : > { %141 = vrot.lane.b32.xlu0 %v132_v10, %s246_s13 }
  0x18   : > { %145 = vrot.lane.b32.xlu1 %v134_v11, %s246_s13 }
  0x85   : > { %v140_v12 = vpop.permute.xlu0 %139 }
  0x86   : > { %v151_v13 = vmax.f32 %v131_v3, %v140_v12  ;;  %v144_v14 = vpop.permute.xlu1 %143 }
  0x87   : > { %v153_v18 = vmax.f32 %v133_v7, %v144_v14 }
  0x88   : > { %156 = vst.msk [vmem:[%s121_s17] sm:$0xf] %vm155_vm0, %v151_v13 }
  0x89   : > { %v142_v15 = vpop.permute.xlu0 %141  ;;  %158 = vst.msk [vmem:[%s121_s17 + $0x8] sm:$0xf] %vm155_vm0, %v153_v18 }
  0x8a   : > { %v152_v16 = vmax.f32 %v132_v10, %v142_v15  ;;  %v146_v17 = vpop.permute.xlu1 %145 }
  0x8b   : > { %v154_v19 = vmax.f32 %v134_v11, %v146_v17 }
  0x8c   : > { %157 = vst.msk [vmem:[%s121_s17 + $0x4] sm:$0xf] %vm155_vm0, %v152_v16 }
  0x8d   : > { %159 = vst.msk [vmem:[%s121_s17 + $0xc] sm:$0xf] %vm155_vm0, %v154_v19 }
  0x8e PF: > { %s11_s6 = sadd.s32 1, %s244_s6  }
  0x8f   : > { %p8_p4 = scmp.ge.s32.totalorder %s11_s6, 4  }
  0x91   :  { %10 = sbr.rel (!%p8_p4) target bundleno = 1 (0x1), region = 54 }

// kernel: hourglass_forward.19
= control target key start
LH: loop header
LB: loop body
LE: loop exit
PB: predicated region body
PF: predicated region fallthrough
CT: control target
= control target key end

     0   :  { %s344_s9 = smov 0   ;;  %s376_s0 = inlined_call_operand.vmem [shape: f32[8,2,4,16], index: 0, kind: input, shape index: {}]   ;;  %s377_s1 = inlined_call_operand.vmem [shape: f32[8,4,8], index: 1, kind: input, shape index: {}]   ;;  %s378_s2 = inlined_call_operand.vmem [shape: f32[8,2,4,16], index: 2, kind: output, shape index: {}]  }
   0x1 LB: > { %s294_s10 = sadd.s32 4294967295, %s326_s9   ;;  %p298_p0 = scmp.ge.s32.totalorder %s326_s9, 1  ;;  %s326_s9 = sphi %s344_s9, %s12_s9  }
   0x2   : > { %p125_p1 = scmp.lt.s32.totalorder %s326_s9, 3 }
   0x4   : > { %p126_p2 = pnand %p298_p0, %p125_p1 }
   0x5   : > { %s299_s11 = sshll.u32 (!%p126_p2), %s294_s10, 2  ;;  %s328_s16 = smov (!%p126_p2), 8   ;;  %vm194_vm0 = vcmask (!%p126_p2), 64512   ;;  %vm215_vm1 = vcmask (!%p126_p2), 125952  }
   0x6   : > { %129 = sbr.rel (%p126_p2) target bundleno = 141 (0x8d), region = 28  ;;  %p155_p3 = scmp.lt.s32.totalorder (!%p126_p2), %s299_s11, 7 }
   0xd   : > { %s380_s11 = smov (!%p155_p3, %s299_s11), 7 }
   0xe   : > { %s303_s12 = sshll.u32 %s380_s11, 2  ;;  %s309_s17 = sshll.u32 %s380_s11, 3 }
   0xf   : > { %s165_s15 = scalar_lea.vmem %s377_s1, %s303_s12  ;;  %s159_s20 = scalar_lea.vmem %s376_s0, %s309_s17 }
  0x10   : > { %v174_v0 = vld [vmem:[%s165_s15] sm:$0xf]  ;;  %v176_v1 = vld [vmem:[%s165_s15 + $0x8] sm:$0xf]  ;;  %v175_v2 = vld [vmem:[%s165_s15 + $0x4] sm:$0xf]  ;;  %s172_s23 = scalar_lea.vmem %s378_s2, %s309_s17 }
  0x11   : > { %182 = vrot.lane.b32.xlu0 %v174_v0, %s328_s16  ;;  %186 = vrot.lane.b32.xlu1 %v176_v1, %s328_s16  ;;  %v177_v3 = vld [vmem:[%s165_s15 + $0xc] sm:$0xf]  ;;  %v199_v4 = vld [vmem:[%s159_s20] sm:$0xf] }
  0x12   : > { %v200_v5 = vld [vmem:[%s159_s20 + $0x4] sm:$0xf]  ;;  %v201_v11 = vld [vmem:[%s159_s20 + $0x8] sm:$0xf]  ;;  %v202_v12 = vld [vmem:[%s159_s20 + $0xc] sm:$0xf] }
  0x13   : > { %v205_v13 = vld [vmem:[%s159_s20 + $0x18] sm:$0xf]  ;;  %v206_v14 = vld [vmem:[%s159_s20 + $0x1c] sm:$0xf]  ;;  %v203_v16 = vld [vmem:[%s159_s20 + $0x10] sm:$0xf] }
  0x14   : > { %v204_v17 = vld [vmem:[%s159_s20 + $0x14] sm:$0xf] }
  0x15   : > { %184 = vrot.lane.b32.xlu0 %v175_v2, %s328_s16  ;;  %188 = vrot.lane.b32.xlu1 %v177_v3, %s328_s16 }
  0x83   : > { %v183_v6 = vpop.permute.xlu0 %182  ;;  %v187_v7 = vpop.permute.xlu1 %186 }
  0x84   : > { %v195_v8 = vsel %vm194_vm0, %v174_v0, %v183_v6  ;;  %v197_v15 = vsel %vm194_vm0, %v176_v1, %v187_v7 }
  0x85   : > { %v207_v9 = vadd.f32 %v199_v4, %v195_v8  ;;  %v208_v10 = vadd.f32 %v200_v5, %v195_v8  ;;  %v211_v26 = vadd.f32 %v203_v16, %v197_v15  ;;  %v212_v27 = vadd.f32 %v204_v17, %v197_v15 }
  0x87   : > { %216 = vst.msk [vmem:[%s172_s23] sm:$0xf] %vm215_vm1, %v207_v9  ;;  %217 = vst.msk [vmem:[%s172_s23 + $0x4] sm:$0xf] %vm215_vm1, %v208_v10  ;;  %v185_v18 = vpop.permute.xlu0 %184  ;;  %v189_v19 = vpop.permute.xlu1 %188 }
  0x88   : > { %v196_v20 = vsel %vm194_vm0, %v175_v2, %v185_v18  ;;  %v198_v21 = vsel %vm194_vm0, %v177_v3, %v189_v19  ;;  %220 = vst.msk [vmem:[%s172_s23 + $0x10] sm:$0xf] %vm215_vm1, %v211_v26  ;;  %221 = vst.msk [vmem:[%s172_s23 + $0x14] sm:$0xf] %vm215_vm1, %v212_v27 }
  0x89   : > { %v209_v22 = vadd.f32 %v201_v11, %v196_v20  ;;  %v210_v23 = vadd.f32 %v202_v12, %v196_v20  ;;  %v213_v24 = vadd.f32 %v205_v13, %v198_v21  ;;  %v214_v25 = vadd.f32 %v206_v14, %v198_v21 }
  0x8b   : > { %218 = vst.msk [vmem:[%s172_s23 + $0x8] sm:$0xf] %vm215_vm1, %v209_v22  ;;  %219 = vst.msk [vmem:[%s172_s23 + $0xc] sm:$0xf] %vm215_vm1, %v210_v23 }
  0x8c   : > { %222 = vst.msk [vmem:[%s172_s23 + $0x18] sm:$0xf] %vm215_vm1, %v213_v24  ;;  %223 = vst.msk [vmem:[%s172_s23 + $0x1c] sm:$0xf] %vm215_vm1, %v214_v25 }
  0x8d PF: > { %s12_s9 = sadd.s32 1, %s326_s9  }
  0x8e   : > { %p9_p4 = scmp.ge.s32.totalorder %s12_s9, 4  }
  0x90   :  { %11 = sbr.rel (!%p9_p4) target bundleno = 1 (0x1), region = 61 }

// kernel: hourglass_forward.16
= control target key start
LH: loop header
LB: loop body
LE: loop exit
PB: predicated region body
PF: predicated region fallthrough
CT: control target
= control target key end

     0   :  { %s1619_s24 = smov 0   ;;  %s1783_s0 = inlined_call_operand.vmem [shape: f32[32,8], index: 0, kind: input, shape index: {}]   ;;  %s1784_s1 = inlined_call_operand.vmem [shape: f32[8,4], index: 1, kind: input, shape index: {}]   ;;  %s1785_s2 = inlined_call_operand.vmem [shape: f32[1,4], index: 2, kind: input, shape index: {}]   ;;  %s1786_s3 = inlined_call_operand.vmem [shape: f32[9,4,4], index: 3, kind: input, shape index: {}]   ;;  %s1787_s4 = inlined_call_operand.vmem [shape: f32[1,4], index: 4, kind: input, shape index: {}]   ;;  %s1788_s5 = inlined_call_operand.vmem [shape: f32[4,8], index: 5, kind: input, shape index: {}]   ;;  %s1789_s6 = inlined_call_operand.vmem [shape: f32[1,8], index: 6, kind: input, shape index: {}]   ;;  %s1790_s7 = inlined_call_operand.vmem [shape: f32[32,8], index: 7, kind: output, shape index: {}]  }
   0x1 LB: > { %s1403_s25 = sadd.s32 4294967295, %s1576_s24   ;;  %p1407_p0 = scmp.ge.s32.totalorder %s1576_s24, 1  ;;  %s1576_s24 = sphi %s1619_s24, %s17_s24  }
   0x2   : > { %p238_p1 = scmp.lt.s32.totalorder %s1576_s24, 3 }
   0x4   : > { %p239_p2 = pnand %p1407_p0, %p238_p1 }
   0x5   : > { %v284_v0 = vld [vmem:[%s1784_s1] sm:$0xff] (!%p239_p2)  ;;  %s1408_s28 = sshll.u32 (!%p239_p2), %s1403_s25, 1  ;;  %vm292_vm0 = vcmask (!%p239_p2), 64512   ;;  %vm380_vm1 = vcmask (!%p239_p2), 31744   ;;  %v1578_v3 = vmov (!%p239_p2), 0.0   ;;  %vm433_vm2 = vcmask (!%p239_p2), 1043456  }
   0x6   : > { %242 = sbr.rel (%p239_p2) target bundleno = 726 (0x2d6), region = 48  ;;  %1490 = vmatprep.subr.mxu0 (!%p239_p2), %v284_v0  ;;  %p271_p3 = scmp.lt.s32.totalorder (!%p239_p2), %s1408_s28, 3  ;;  %381 = vst.msk [vmem:[#allocation2] sm:$0xff] (!%p239_p2), %vm380_vm1, %v1578_v3  ;;  %383 = vst.msk [vmem:[#allocation2 + $0x10] sm:$0xff] (!%p239_p2), %vm380_vm1, %v1578_v3  ;;  %v1415_v4 = vld [vmem:[%s1786_s3 + $0x4] sm:$0xf] (!%p239_p2)  ;;  %v387_v8 = vlaneseq (!%p239_p2) }
   0x7   : > { %1491 = vmatpush3.msra.mxu0 (!%p239_p2), %v284_v0  ;;  %384 = vst.msk [vmem:[#allocation2 + $0x18] sm:$0xff] (!%p239_p2), %vm380_vm1, %v1578_v3  ;;  %382 = vst.msk [vmem:[#allocation2 + $0x8] sm:$0xff] (!%p239_p2), %vm380_vm1, %v1578_v3  ;;  %v1426_v5 = vld [vmem:[%s1786_s3 + $0xc] sm:$0xf] (!%p239_p2)  ;;  %v1430_v6 = vld [vmem:[%s1786_s3 + $0x10] sm:$0xf] (!%p239_p2) }
   0x8   : > { %1495 = vmatprep.subr.msk.mxu0 (!%p239_p2), %vm433_vm2, %v1415_v4  ;;  %1510 = vmatprep.subr.msk.mxu1 (!%p239_p2), %vm433_vm2, %v1426_v5  ;;  %v422_v7 = vld [vmem:[%s1786_s3] sm:$0xf] (!%p239_p2)  ;;  %v388_v13 = vshrl.u32 (!%p239_p2), %v387_v8, 7  ;;  %v1434_v32 = vld [vmem:[%s1786_s3 + $0x14] sm:$0xf] (!%p239_p2) }
   0x9   : > { %1511 = vmatpush3.msk.msra.mxu1 (!%p239_p2), %vm433_vm2, %v1426_v5  ;;  %v1412_v9 = vld [vmem:[%s1785_s2] ss:$0 sm:$0xff] (!%p239_p2)  ;;  %v1422_v34 = vld [vmem:[%s1786_s3 + $0x8] sm:$0xf] (!%p239_p2)  ;;  %v1438_v42 = vld [vmem:[%s1786_s3 + $0x18] sm:$0xf] (!%p239_p2) }
   0xa   : > { %1515 = vmatprep.subr.msk.mxu1 (!%p239_p2), %vm433_vm2, %v1430_v6  ;;  %v389_v18 = vadd.s32 (!%p239_p2), 8, %v388_v13  ;;  %v394_v20 = vand.u32 (!%p239_p2), 3, %v388_v13  ;;  %v1442_v49 = vld [vmem:[%s1786_s3 + $0x1c] sm:$0xf] (!%p239_p2)  ;;  %v1446_v53 = vld [vmem:[%s1786_s3 + $0x20] sm:$0xf] (!%p239_p2) }
   0xb   : > { %v1251_v58 = vld [vmem:[%s1788_s5] sm:$0xf] (!%p239_p2) }
   0xc   : > { %v401_v21 = vand.u32 (!%p239_p2), 3, %v389_v18  ;;  %vm1673_vm5 = vcmp.ge.s32.totalorder (!%p239_p2), %v394_v20, 1  ;;  %vm1703_vm7 = vcmp.le.s32.totalorder (!%p239_p2), %v394_v20, 2  ;;  %v1450_v62 = vld [vmem:[%s1787_s4] ss:$0 sm:$0xff] (!%p239_p2) }
   0xd   : > { %s1800_s28 = smov (!%p271_p3, %s1408_s28), 3 }
   0xe   : > { %s1409_s29 = sshll.u32 %s1800_s28, 3  ;;  %vm1677_vm6 = vcmp.ge.s32.totalorder %v401_v21, 1  ;;  %vm1723_vm8 = vcmp.le.s32.totalorder %v401_v21, 2 }
   0xf   : > { %s274_s9 = scalar_lea.vmem %s1783_s0, %s1409_s29  ;;  %s280_s18 = scalar_lea.vmem %s1790_s7, %s1409_s29 }
  0x10   : > { %v1638_v1 = vld [vmem:[%s274_s9] sm:$0xff]  ;;  %v1640_v2 = vld [vmem:[%s274_s9 + $0x8] sm:$0xff] }
  0x11   : > { %1492 = vmatprep.mubr.msk.f32.mxu0 %vm292_vm0, %v1638_v1 }
  0x12   : > { %1493 = vmatmul.mubr.msk.f32.vlgmr.msra.gmra.mrb[0].mxu0 %vm292_vm0, %v1640_v2 }
  0x13   : > { %1496 = vmatpush3.msk.msra.mxu0 %vm433_vm2, %v1415_v4 }
  0x14   : > { %1500 = vmatprep.subr.msk.mxu0 %vm433_vm2, %v422_v7 }
  0xe5   : > { %v1494_v10 = vpop.f32.mrb[0].mxu0 }
  0xe6   : > { %v371_v11 = vadd.f32 %v1494_v10, %v1412_v9  ;;  %v365_v12 = vpop.f32.mrb[1].mxu0  ;;  %v1451_v10 = vld [vmem:[%s1789_s6] ss:$0 sm:$0xff] }
  0xe7   : > { %v366_v14 = vadd.f32 %v1412_v9, %v365_v12 }
  0xe8   : > { %vm375_vm3 = vcmp.gt.f32.partialorder %v371_v11, 0.0  ;;  %v377_v15 = vmul.f32 0.2, %v371_v11 }
  0xe9   : > { %vm374_vm4 = vcmp.gt.f32.partialorder %v366_v14, 0.0  ;;  %v376_v16 = vmul.f32 0.2, %v366_v14 }
  0xea   : > { %v379_v17 = vsel %vm375_vm3, %v371_v11, %v377_v15 }
  0xeb   : > { %386 = vst.msk [vmem:[#allocation2 + $0x10] sm:$0xff] %vm380_vm1, %v379_v17  ;;  %v378_v19 = vsel %vm374_vm4, %v366_v14, %v376_v16 }
  0xec   : > { %385 = vst.msk [vmem:[#allocation2 + $0x8] sm:$0xff] %vm380_vm1, %v378_v19 }
  0xf2   : > { %v781_v41 = vld [vmem:[#allocation2 + $0x10] sm:$0xff] }
  0xf3   : > { %v423_v24 = vld [vmem:[#allocation2 + $0x4] sm:$0xff]  ;;  %v424_v25 = vld [vmem:[#allocation2 + $0xc] sm:$0xff]  ;;  %v1055_v54 = vld [vmem:[#allocation2 + $0x14] sm:$0xff] }
  0xf4   : > { %v688_v26 = vld [vmem:[#allocation2 + $0x7] sm:$0xff]  ;;  %1497 = vmatprep.mubr.msk.f32.mxu0 %vm380_vm1, %v423_v24  ;;  %v689_v29 = vld [vmem:[#allocation2 + $0xf] sm:$0xff] }
  0xf5   : > { %v690_v27 = vsel %vm1673_vm5, %v688_v26, 0.0  ;;  %v418_v28 = vld [vmem:[#allocation2 + $0x3] sm:$0xff]  ;;  %1498 = vmatmul.mubr.msk.f32.vlgmr.msra.gmra.mrb[2].mxu0 %vm380_vm1, %v424_v25  ;;  %v691_v31 = vsel %vm1677_vm6, %v689_v29, 0.0  ;;  %v419_v35 = vld [vmem:[#allocation2 + $0xb] sm:$0xff]  ;;  %v963_v51 = vld [vmem:[#allocation2 + $0x13] sm:$0xff] }
  0xf6   : > { %1512 = vmatprep.mubr.msk.f32.mxu1 %vm380_vm1, %v690_v27  ;;  %v420_v30 = vsel %vm1673_vm5, %v418_v28, 0.0  ;;  %v780_v33 = vld [vmem:[#allocation2 + $0x8] sm:$0xff]  ;;  %1501 = vmatpush3.msk.msra.mxu0 %vm433_vm2, %v422_v7  ;;  %v421_v39 = vsel %vm1677_vm6, %v419_v35, 0.0  ;;  %v871_v46 = vld [vmem:[#allocation2 + $0x11] sm:$0xff]  ;;  %v964_v50 = vsel %vm1673_vm5, %v419_v35, 0.0  ;;  %v965_v52 = vsel %vm1677_vm6, %v963_v51, 0.0 }
  0xf7   : > { %1502 = vmatprep.mubr.msk.f32.mxu0 %vm380_vm1, %v420_v30  ;;  %1513 = vmatmul.mubr.msk.f32.vlgmr.msra.gmra.mrb[0].mxu1 %vm380_vm1, %v691_v31  ;;  %v596_v37 = vld [vmem:[#allocation2 + $0x5] sm:$0xff]  ;;  %v597_v45 = vld [vmem:[#allocation2 + $0xd] sm:$0xff]  ;;  %v873_v48 = vsel %vm1723_vm8, %v871_v46, 0.0  ;;  %v1145_v56 = vld [vmem:[#allocation2 + $0x15] sm:$0xff] }
  0xf8   : > { %1516 = vmatpush3.msk.msra.mxu1 %vm433_vm2, %v1430_v6  ;;  %1517 = vmatprep.mubr.msk.f32.mxu1 %vm380_vm1, %v780_v33  ;;  %v870_v38 = vld [vmem:[#allocation2 + $0x9] sm:$0xff]  ;;  %v598_v40 = vsel %vm1703_vm7, %v596_v37, 0.0  ;;  %v599_v47 = vsel %vm1723_vm8, %v597_v45, 0.0  ;;  %v1146_v55 = vsel %vm1703_vm7, %v597_v45, 0.0  ;;  %v1147_v57 = vsel %vm1723_vm8, %v1145_v56, 0.0 }
  0xf9   : > { %1520 = vmatprep.subr.msk.mxu1 %vm433_vm2, %v1434_v32  ;;  %1505 = vmatprep.subr.msk.mxu0 %vm433_vm2, %v1422_v34  ;;  %v872_v43 = vsel %vm1703_vm7, %v870_v38, 0.0 }
  0xfd   : > { %1503 = vmatmul.mubr.msk.f32.vlgmr.msra.gmra.mrb[2].mxu0 %vm380_vm1, %v421_v39 }
  0xfe   : > { %1507 = vmatprep.mubr.msk.f32.mxu0 %vm380_vm1, %v598_v40  ;;  %1506 = vmatpush3.msk.msra.mxu0 %vm433_vm2, %v1422_v34 }
  0xff   : > { %1518 = vmatmul.mubr.msk.f32.vlgmr.msra.gmra.mrb[0].mxu1 %vm380_vm1, %v781_v41  ;;  %1540 = vmatprep.subr.msk.mxu0 %vm433_vm2, %v1251_v58 }
 0x100   : > { %1521 = vmatpush3.msk.msra.mxu1 %vm433_vm2, %v1434_v32  ;;  %1522 = vmatprep.mubr.msk.f32.mxu1 %vm380_vm1, %v872_v43 }
 0x101   : > { %1525 = vmatprep.subr.msk.mxu1 %vm433_vm2, %v1438_v42 }
 0x105   : > { %1508 = vmatmul.mubr.msk.f32.vlgmr.msra.gmra.mrb[2].mxu0 %vm380_vm1, %v599_v47 }
 0x106   : > { %1541 = vmatpush3.msk.msra.mxu0 %vm433_vm2, %v1251_v58 }
 0x107   : > { %1523 = vmatmul.mubr.msk.f32.vlgmr.msra.gmra.mrb[0].mxu1 %vm380_vm1, %v873_v48 }
 0x108   : > { %1526 = vmatpush3.msk.msra.mxu1 %vm433_vm2, %v1438_v42  ;;  %1527 = vmatprep.mubr.msk.f32.mxu1 %vm380_vm1, %v964_v50 }
 0x109   : > { %1530 = vmatprep.subr.msk.mxu1 %vm433_vm2, %v1442_v49 }
 0x10f   : > { %1528 = vmatmul.mubr.msk.f32.vlgmr.msra.gmra.mrb[0].mxu1 %vm380_vm1, %v965_v52 }
 0x110   : > { %1531 = vmatpush3.msk.msra.mxu1 %vm433_vm2, %v1442_v49  ;;  %1532 = vmatprep.mubr.msk.f32.mxu1 %vm380_vm1, %v424_v25 }
 0x111   : > { %1535 = vmatprep.subr.msk.mxu1 %vm433_vm2, %v1446_v53 }
 0x117   : > { %1533 = vmatmul.mubr.msk.f32.vlgmr.msra.gmra.mrb[0].mxu1 %vm380_vm1, %v1055_v54 }
 0x118   : > { %1536 = vmatpush3.msk.msra.mxu1 %vm433_vm2, %v1446_v53  ;;  %1537 = vmatprep.mubr.msk.f32.mxu1 %vm380_vm1, %v1146_v55 }
 0x11f   : > { %1538 = vmatmul.mubr.msk.f32.vlgmr.msra.gmra.mrb[0].mxu1 %vm380_vm1, %v1147_v57 }
 0x1d8   : > { %v1509_v59 = vpop.f32.mrb[2].mxu0 }
 0x1d9   : > { %v677_v60 = vpop.f32.mrb[3].mxu0 }
 0x1f2   : > { %v1539_v61 = vpop.f32.mrb[0].mxu1 }
 0x1f3   : > { %v1545_v63 = vadd.f32 %v1539_v61, %v1509_v59  ;;  %v1225_v0 = vpop.f32.mrb[1].mxu1 }
 0x1f4   : > { %v1546_v3 = vadd.f32 %v1225_v0, %v677_v60 }
 0x1f5   : > { %v1244_v4 = vadd.f32 %v1545_v63, %v1450_v62 }
 0x1f6   : > { %v1243_v5 = vadd.f32 %v1546_v3, %v1450_v62 }
 0x1f7   : > { %v1248_v6 = vmul.f32 0.2, %v1244_v4  ;;  %vm1246_vm9 = vcmp.gt.f32.partialorder %v1244_v4, 0.0 }
 0x1f8   : > { %v1247_v7 = vmul.f32 0.2, %v1243_v5  ;;  %vm1245_vm10 = vcmp.gt.f32.partialorder %v1243_v5, 0.0 }
 0x1f9   : > { %v1250_v9 = vsel %vm1246_vm9, %v1244_v4, %v1248_v6 }
 0x1fa   : > { %v1249_v8 = vsel %vm1245_vm10, %v1243_v5, %v1247_v7 }
 0x1fb   : > { %1542 = vmatprep.mubr.msk.f32.mxu0 %vm380_vm1, %v1249_v8 }
 0x1fc   : > { %1543 = vmatmul.mubr.msk.f32.vlgmr.msra.gmra.mrb[4].mxu0 %vm380_vm1, %v1250_v9 }
 0x2cf   : > { %v1544_v11 = vpop.f32.mrb[4].mxu0 }
 0x2d0   : > { %v1340_v12 = vadd.f32 %v1544_v11, %v1451_v10  ;;  %v1334_v13 = vpop.f32.mrb[5].mxu0 }
 0x2d1   : > { %v1335_v14 = vadd.f32 %v1451_v10, %v1334_v13 }
 0x2d2   : > { %v1344_v16 = vadd.f32 %v1340_v12, %v1640_v2 }
 0x2d3   : > { %v1343_v15 = vadd.f32 %v1335_v14, %v1638_v1 }
 0x2d4   : > { %1346 = vst.msk [vmem:[%s280_s18 + $0x8] sm:$0xff] %vm292_vm0, %v1344_v16 }
 0x2d5   : > { %1345 = vst.msk [vmem:[%s280_s18] sm:$0xff] %vm292_vm0, %v1343_v15 }
 0x2d6 PF: > { %s17_s24 = sadd.s32 1, %s1576_s24  }
 0x2d7   : > { %p14_p4 = scmp.ge.s32.totalorder %s17_s24, 4  }
 0x2d9   :  { %16 = sbr.rel (!%p14_p4) target bundleno = 1 (0x1), region = 86 }

// kernel: hourglass_forward.13
= control target key start
LH: loop header
LB: loop body
LE: loop exit
PB: predicated region body
PF: predicated region fallthrough
CT: control target
= control target key end

     0   :  { %s2724_s24 = smov 0   ;;  %s3291_s0 = inlined_call_operand.vmem [shape: f32[128,8], index: 0, kind: input, shape index: {}]   ;;  %s3292_s1 = inlined_call_operand.vmem [shape: f32[8,4], index: 1, kind: input, shape index: {}]   ;;  %s3293_s2 = inlined_call_operand.vmem [shape: f32[1,4], index: 2, kind: input, shape index: {}]   ;;  %s3294_s3 = inlined_call_operand.vmem [shape: f32[9,4,4], index: 3, kind: input, shape index: {}]   ;;  %s3295_s4 = inlined_call_operand.vmem [shape: f32[1,4], index: 4, kind: input, shape index: {}]   ;;  %s3296_s5 = inlined_call_operand.vmem [shape: f32[4,8], index: 5, kind: input, shape index: {}]   ;;  %s3297_s6 = inlined_call_operand.vmem [shape: f32[1,8], index: 6, kind: input, shape index: {}]   ;;  %s3298_s7 = inlined_call_operand.vmem [shape: f32[128,8], index: 7, kind: output, shape index: {}]  }
   0x1 LB: > { %s2227_s25 = sadd.s32 4294967295, %s2681_s24   ;;  %p2231_p0 = scmp.ge.s32.totalorder %s2681_s24, 1  ;;  %s2681_s24 = sphi %s2724_s24, %s17_s24  }
   0x2   : > { %p238_p1 = scmp.lt.s32.totalorder %s2681_s24, 3 }
   0x4   : > { %p239_p2 = pnand %p2231_p0, %p238_p1 }
   0x5   : > { %v290_v0 = vld [vmem:[%s3292_s1] sm:$0xff] (!%p239_p2)  ;;  %s2232_s28 = sshll.u32 (!%p239_p2), %s2227_s25, 3  ;;  %vm3299_vm0 = vcmask (!%p239_p2), 64512   ;;  %vm452_vm1 = vcmask (!%p239_p2), 31744   ;;  %v2683_v9 = vmov (!%p239_p2), 0.0   ;;  %vm3301_vm2 = vcmask (!%p239_p2), 1043456  }
   0x6   : > { %242 = sbr.rel (%p239_p2) target bundleno = 778 (0x30a), region = 48  ;;  %2446 = vmatprep.subr.mxu0 (!%p239_p2), %v290_v0  ;;  %p271_p3 = scmp.lt.s32.totalorder (!%p239_p2), %s2232_s28, 15  ;;  %456 = vst.msk [vmem:[#allocation2 + $0x18] sm:$0xff] (!%p239_p2), %vm452_vm1, %v2683_v9  ;;  %453 = vst.msk [vmem:[#allocation2] sm:$0xff] (!%p239_p2), %vm452_vm1, %v2683_v9  ;;  %v2245_v10 = vld [vmem:[%s3294_s3 + $0x4] sm:$0xf] (!%p239_p2)  ;;  %v473_v28 = vlaneseq (!%p239_p2) }
   0x7   : > { %2447 = vmatpush3.msra.mxu0 (!%p239_p2), %v290_v0  ;;  %454 = vst.msk [vmem:[#allocation2 + $0x8] sm:$0xff] (!%p239_p2), %vm452_vm1, %v2683_v9  ;;  %455 = vst.msk [vmem:[#allocation2 + $0x10] sm:$0xff] (!%p239_p2), %vm452_vm1, %v2683_v9  ;;  %v2796_v12 = vld [vmem:[%s3294_s3 + $0xc] sm:$0xf] (!%p239_p2)  ;;  %v2805_v13 = vld [vmem:[%s3294_s3 + $0x10] sm:$0xf] (!%p239_p2) }
   0x8   : > { %457 = vst.msk [vmem:[#allocation2 + $0x20] sm:$0xff] (!%p239_p2), %vm452_vm1, %v2683_v9  ;;  %458 = vst.msk [vmem:[#allocation2 + $0x28] sm:$0xff] (!%p239_p2), %vm452_vm1, %v2683_v9  ;;  %2460 = vmatprep.subr.msk.mxu0 (!%p239_p2), %vm3301_vm2, %v2245_v10  ;;  %2600 = vmatprep.subr.msk.mxu1 (!%p239_p2), %vm3301_vm2, %v2796_v12  ;;  %v610_v14 = vld [vmem:[%s3294_s3] sm:$0xf] (!%p239_p2)  ;;  %v2819_v37 = vshrl.u32 (!%p239_p2), %v473_v28, 7 }
   0x9   : > { %459 = vst.msk [vmem:[#allocation2 + $0x30] sm:$0xff] (!%p239_p2), %vm452_vm1, %v2683_v9  ;;  %460 = vst.msk [vmem:[#allocation2 + $0x38] sm:$0xff] (!%p239_p2), %vm452_vm1, %v2683_v9  ;;  %2601 = vmatpush3.msk.msra.mxu1 (!%p239_p2), %vm3301_vm2, %v2796_v12  ;;  %v2236_v15 = vld [vmem:[%s3293_s2] ss:$0 sm:$0xff] (!%p239_p2)  ;;  %v2834_v49 = vld [vmem:[%s3294_s3 + $0x8] sm:$0xf] (!%p239_p2) }
   0xa   : > { %461 = vst.msk [vmem:[#allocation2 + $0x40] sm:$0xff] (!%p239_p2), %vm452_vm1, %v2683_v9  ;;  %462 = vst.msk [vmem:[#allocation2 + $0x48] sm:$0xff] (!%p239_p2), %vm452_vm1, %v2683_v9  ;;  %2516 = vmatprep.subr.msk.mxu1 (!%p239_p2), %vm3301_vm2, %v2805_v13  ;;  %v2823_v41 = vadd.s32 (!%p239_p2), 40, %v2819_v37  ;;  %v2829_v48 = vadd.s32 (!%p239_p2), 32, %v2819_v37  ;;  %v2845_v54 = vadd.s32 (!%p239_p2), 56, %v2819_v37  ;;  %v2855_v59 = vadd.s32 (!%p239_p2), 48, %v2819_v37 }
   0xb   : > { %463 = vst.msk [vmem:[#allocation2 + $0x50] sm:$0xff] (!%p239_p2), %vm452_vm1, %v2683_v9  ;;  %464 = vst.msk [vmem:[#allocation2 + $0x58] sm:$0xff] (!%p239_p2), %vm452_vm1, %v2683_v9  ;;  %v2863_v61 = vadd.s32 (!%p239_p2), 8, %v2819_v37  ;;  %v486_v0 = vand.u32 (!%p239_p2), 7, %v2819_v37  ;;  %v2876_v9 = vadd.s32 (!%p239_p2), 16, %v2819_v37 }
   0xc   : > { %v521_v53 = vand.u32 (!%p239_p2), 7, %v2823_v41  ;;  %v514_v58 = vand.u32 (!%p239_p2), 7, %v2829_v48  ;;  %v535_v63 = vand.u32 (!%p239_p2), 7, %v2845_v54 }
   0xd   : > { %s3349_s28 = smov (!%p271_p3, %s2232_s28), 15  ;;  %vm2916_vm14 = vcmp.ge.s32.totalorder %v486_v0, 1 }
   0xe   : > { %s2233_s29 = sshll.u32 %s3349_s28, 3  ;;  %v611_v11 = vld [vmem:[#allocation2 + $0x8] sm:$0xff]  ;;  %vm2869_vm11 = vcmp.ge.s32.totalorder %v521_v53, 1  ;;  %vm2882_vm12 = vcmp.ge.s32.totalorder %v514_v58, 1  ;;  %vm2910_vm13 = vcmp.ge.s32.totalorder %v535_v63, 1 }
   0xf   : > { %s274_s9 = scalar_lea.vmem %s3291_s0, %s2233_s29  ;;  %s280_s18 = scalar_lea.vmem %s3298_s7, %s2233_s29 }
  0x10   : > { %v2743_v1 = vld [vmem:[%s274_s9] sm:$0xff]  ;;  %v2745_v2 = vld [vmem:[%s274_s9 + $0x8] sm:$0xff]  ;;  %v2747_v3 = vld [vmem:[%s274_s9 + $0x10] sm:$0xff] }
  0x11   : > { %2448 = vmatprep.mubr.msk.f32.mxu0 %vm3299_vm0, %v2743_v1  ;;  %v2755_v4 = vld [vmem:[%s274_s9 + $0x18] sm:$0xff]  ;;  %v2757_v5 = vld [vmem:[%s274_s9 + $0x20] sm:$0xff]  ;;  %v2763_v6 = vld [vmem:[%s274_s9 + $0x28] sm:$0xff] }
  0x12   : > { %2449 = vmatmul.mubr.msk.f32.vlgmr.msra.gmra.mrb[0].mxu0 %vm3299_vm0, %v2745_v2  ;;  %v2765_v7 = vld [vmem:[%s274_s9 + $0x30] sm:$0xff]  ;;  %v2771_v8 = vld [vmem:[%s274_s9 + $0x38] sm:$0xff] }
  0x13   : > { %2451 = vmatprep.mubr.msk.f32.mxu0 %vm3299_vm0, %v2747_v3  ;;  %2461 = vmatpush3.msk.msra.mxu0 %vm3301_vm2, %v2245_v10  ;;  %v594_v10 = vld [vmem:[#allocation2 + $0x7] sm:$0xff] }
  0x14   : > { %2474 = vmatprep.subr.msk.mxu0 %vm3301_vm2, %v610_v14 }
  0x16   : > { %2452 = vmatmul.mubr.msk.f32.gmra.mrb[2].mxu0 %vm3299_vm0, %v2755_v4 }
  0x17   : > { %2454 = vmatprep.mubr.msk.f32.mxu0 %vm3299_vm0, %v2757_v5 }
  0x1a   : > { %2455 = vmatmul.mubr.msk.f32.gmra.mrb[4].mxu0 %vm3299_vm0, %v2763_v6 }
  0x1b   : > { %2457 = vmatprep.mubr.msk.f32.mxu0 %vm3299_vm0, %v2765_v7 }
  0x1e   : > { %2458 = vmatmul.mubr.msk.f32.gmra.mrb[6].mxu0 %vm3299_vm0, %v2771_v8  ;;  %vm3097_vm0 = vcmp.le.s32.totalorder %v521_v53, 6 }
  0x1f   : > { %2462 = vmatprep.mubr.msk.f32.mxu0 %vm452_vm1, %v611_v11 }
  0xe5   : > { %v2450_v16 = vpop.f32.mrb[0].mxu0 }
  0xe6   : > { %v395_v17 = vadd.f32 %v2450_v16, %v2236_v15  ;;  %v389_v18 = vpop.f32.mrb[1].mxu0 }
  0xe7   : > { %v390_v19 = vadd.f32 %v2236_v15, %v389_v18 }
  0xe8   : > { %vm429_vm3 = vcmp.gt.f32.partialorder %v395_v17, 0.0  ;;  %v437_v20 = vmul.f32 0.2, %v395_v17 }
  0xe9   : > { %vm428_vm4 = vcmp.gt.f32.partialorder %v390_v19, 0.0  ;;  %v436_v21 = vmul.f32 0.2, %v390_v19  ;;  %v2453_v22 = vpop.f32.mrb[2].mxu0 }
  0xea   : > { %v445_v23 = vsel %vm429_vm3, %v395_v17, %v437_v20  ;;  %v405_v24 = vadd.f32 %v2453_v22, %v2236_v15  ;;  %v399_v25 = vpop.f32.mrb[3].mxu0  ;;  %v528_v17 = vand.u32 7, %v2855_v59  ;;  %v2903_v22 = vadd.s32 24, %v2819_v37 }
  0xeb   : > { %466 = vst.msk [vmem:[#allocation2 + $0x18] sm:$0xff] %vm452_vm1, %v445_v23  ;;  %v444_v26 = vsel %vm428_vm4, %v390_v19, %v436_v21  ;;  %v400_v27 = vadd.f32 %v2236_v15, %v399_v25  ;;  %v493_v21 = vand.u32 7, %v2863_v61  ;;  %v500_v25 = vand.u32 7, %v2876_v9 }
  0xec   : > { %465 = vst.msk [vmem:[#allocation2 + $0x10] sm:$0xff] %vm452_vm1, %v444_v26  ;;  %vm431_vm5 = vcmp.gt.f32.partialorder %v405_v24, 0.0  ;;  %v439_v29 = vmul.f32 0.2, %v405_v24  ;;  %v2294_v26 = vld [vmem:[%s3294_s3 + $0x14] sm:$0xf] }
  0xed   : > { %vm430_vm6 = vcmp.gt.f32.partialorder %v400_v27, 0.0  ;;  %v438_v30 = vmul.f32 0.2, %v400_v27  ;;  %v2456_v31 = vpop.f32.mrb[4].mxu0  ;;  %vm2933_vm15 = vcmp.ge.s32.totalorder %v528_v17, 1  ;;  %vm2949_vm3 = vcmp.ge.s32.totalorder %v493_v21, 1 }
  0xee   : > { %v447_v32 = vsel %vm431_vm5, %v405_v24, %v439_v29  ;;  %v415_v33 = vadd.f32 %v2456_v31, %v2236_v15  ;;  %v409_v34 = vpop.f32.mrb[5].mxu0  ;;  %vm2959_vm4 = vcmp.ge.s32.totalorder %v500_v25, 1  ;;  %v2324_v24 = vld [vmem:[%s3294_s3 + $0x20] sm:$0xf] }
  0xef   : > { %468 = vst.msk [vmem:[#allocation2 + $0x28] sm:$0xff] %vm452_vm1, %v447_v32  ;;  %v446_v35 = vsel %vm430_vm6, %v400_v27, %v438_v30  ;;  %v410_v36 = vadd.f32 %v2236_v15, %v409_v34  ;;  %v602_v27 = vsel %vm2916_vm14, %v594_v10, 0.0  ;;  %vm3019_vm6 = vcmp.le.s32.totalorder %v486_v0, 6  ;;  %v2015_v29 = vld [vmem:[%s3296_s5] sm:$0xf] }
  0xf0   : > { %467 = vst.msk [vmem:[#allocation2 + $0x20] sm:$0xff] %vm452_vm1, %v446_v35  ;;  %vm433_vm7 = vcmp.gt.f32.partialorder %v415_v33, 0.0  ;;  %v441_v38 = vmul.f32 0.2, %v415_v33  ;;  %v507_v35 = vand.u32 7, %v2903_v22  ;;  %v3322_v10 = vmov 0 }
  0xf1   : > { %vm432_vm8 = vcmp.gt.f32.partialorder %v410_v36, 0.0  ;;  %v440_v39 = vmul.f32 0.2, %v410_v36  ;;  %v2459_v40 = vpop.f32.mrb[6].mxu0 }
  0xf2   : > { %v449_v42 = vsel %vm433_vm7, %v415_v33, %v441_v38  ;;  %v425_v43 = vadd.f32 %v2459_v40, %v2236_v15  ;;  %v419_v44 = vpop.f32.mrb[7].mxu0  ;;  %v2839_v51 = vld [vmem:[#allocation2 + $0x18] sm:$0xff]  ;;  %vm2975_vm5 = vcmp.ge.s32.totalorder %v507_v35, 1  ;;  %vm3033_vm7 = vcmp.le.s32.totalorder %v493_v21, 6 }
  0xf3   : > { %470 = vst.msk [vmem:[#allocation2 + $0x38] sm:$0xff] %vm452_vm1, %v449_v42  ;;  %v448_v45 = vsel %vm432_vm8, %v410_v36, %v440_v39  ;;  %v420_v46 = vadd.f32 %v2236_v15, %v419_v44  ;;  %v2826_v47 = vld [vmem:[#allocation2 + $0x10] sm:$0xff]  ;;  %vm3040_vm8 = vcmp.le.s32.totalorder %v500_v25, 6 }
  0xf4   : > { %469 = vst.msk [vmem:[#allocation2 + $0x30] sm:$0xff] %vm452_vm1, %v448_v45  ;;  %vm435_vm9 = vcmp.gt.f32.partialorder %v425_v43, 0.0  ;;  %v443_v50 = vmul.f32 0.2, %v425_v43  ;;  %2463 = vmatmul.mubr.msk.f32.vlgmr.msra.gmra.mrb[8].mxu0 %vm452_vm1, %v2826_v47  ;;  %v2953_v34 = vld [vmem:[#allocation2 + $0xf] sm:$0xff]  ;;  %v2963_v38 = vld [vmem:[#allocation2 + $0x17] sm:$0xff] }
  0xf5   : > { %vm434_vm10 = vcmp.gt.f32.partialorder %v420_v46, 0.0  ;;  %v442_v52 = vmul.f32 0.2, %v420_v46  ;;  %2465 = vmatprep.mubr.msk.f32.mxu0 %vm452_vm1, %v2839_v51  ;;  %2475 = vmatpush3.msk.msra.mxu0 %vm3301_vm2, %v610_v14  ;;  %v603_v39 = vsel %vm2949_vm3, %v2953_v34, 0.0  ;;  %v604_v40 = vsel %vm2959_vm4, %v2963_v38, 0.0  ;;  %v1352_v61 = vld [vmem:[#allocation2 + $0x11] sm:$0xff] }
  0xf6   : > { %v451_v55 = vsel %vm435_vm9, %v425_v43, %v443_v50  ;;  %2488 = vmatprep.subr.msk.mxu0 %vm3301_vm2, %v2834_v49  ;;  %v2860_v60 = vld [vmem:[#allocation2 + $0x28] sm:$0xff]  ;;  %v2304_v45 = vld [vmem:[%s3294_s3 + $0x18] sm:$0xf]  ;;  %v3323_v10 = vsel %vm3040_vm8, 4294967295, %v3322_v10  ;;  %v895_v21 = vsel %vm3033_vm7, %v1352_v61, 0.0  ;;  %vm3059_vm9 = vcmp.le.s32.totalorder %v507_v35, 6 }
  0xf7   : > { %472 = vst.msk [vmem:[#allocation2 + $0x48] sm:$0xff] %vm452_vm1, %v451_v55  ;;  %v450_v56 = vsel %vm434_vm10, %v420_v46, %v442_v52  ;;  %v2851_v57 = vld [vmem:[#allocation2 + $0x20] sm:$0xff]  ;;  %v886_v55 = vld [vmem:[#allocation2 + $0x9] sm:$0xff]  ;;  %vm3069_vm10 = vcmp.le.s32.totalorder %v514_v58, 6  ;;  %v2314_v35 = vld [vmem:[%s3294_s3 + $0x1c] sm:$0xf] }
  0xf8   : > { %471 = vst.msk [vmem:[#allocation2 + $0x40] sm:$0xff] %vm452_vm1, %v450_v56  ;;  %2466 = vmatmul.mubr.msk.f32.gmra.mrb[10].mxu0 %vm452_vm1, %v2851_v57  ;;  %v2979_v43 = vld [vmem:[#allocation2 + $0x1f] sm:$0xff]  ;;  %v2982_v44 = vld [vmem:[#allocation2 + $0x27] sm:$0xff]  ;;  %v894_v37 = vsel %vm3019_vm6, %v886_v55, 0.0 }
  0xf9   : > { %2468 = vmatprep.mubr.msk.f32.mxu0 %vm452_vm1, %v2860_v60  ;;  %v605_v46 = vsel %vm2975_vm5, %v2979_v43, 0.0  ;;  %v3053_v22 = vld [vmem:[#allocation2 + $0x21] sm:$0xff] }
  0xfa   : > { %v2893_v18 = vld [vmem:[#allocation2 + $0x38] sm:$0xff]  ;;  %v897_v48 = vsel %vm3059_vm9, %v3053_v22, 0.0 }
  0xfb   : > { %v2878_v11 = vld [vmem:[#allocation2 + $0x30] sm:$0xff] }
  0xfc   : > { %v2886_v15 = vld [vmem:[#allocation2 + $0x2f] sm:$0xff]  ;;  %v2888_v16 = vld [vmem:[#allocation2 + $0x37] sm:$0xff]  ;;  %2469 = vmatmul.mubr.msk.f32.gmra.mrb[12].mxu0 %vm452_vm1, %v2878_v11 }
  0xfd   : > { %v1056_v19 = vsel %vm2882_vm12, %v2886_v15, 0.0  ;;  %v1057_v20 = vsel %vm2869_vm11, %v2888_v16, 0.0  ;;  %2471 = vmatprep.mubr.msk.f32.mxu0 %vm452_vm1, %v2893_v18  ;;  %v608_v50 = vsel %vm2933_vm15, %v2888_v16, 0.0  ;;  %v3089_v58 = vld [vmem:[#allocation2 + $0x31] sm:$0xff]  ;;  %v1521_v33 = vsel %vm2975_vm5, %v2886_v15, 0.0 }
  0xfe   : > { %2510 = vmatprep.mubr.msk.f32.mxu1 %vm452_vm1, %v1056_v19  ;;  %v3038_v9 = vld [vmem:[#allocation2 + $0x48] sm:$0xff]  ;;  %v3044_v19 = vld [vmem:[#allocation2 + $0x19] sm:$0xff]  ;;  %v1364_v41 = vsel %vm3069_vm10, %v3089_v58, 0.0  ;;  %v899_v53 = vsel %vm3097_vm0, %v3089_v58, 0.0  ;;  %v1522_v36 = vsel %vm2882_vm12, %v2888_v16, 0.0  ;;  %v1825_v16 = vld [vmem:[#allocation2 + $0x51] sm:$0xff] }
  0xff   : > { %2511 = vmatmul.mubr.msk.f32.vlgmr.msra.gmra.mrb[0].mxu1 %vm452_vm1, %v1057_v20  ;;  %v2929_v28 = vld [vmem:[#allocation2 + $0x40] sm:$0xff]  ;;  %v1360_v20 = vsel %vm3019_vm6, %v1352_v61, 0.0  ;;  %v896_v25 = vsel %vm3040_vm8, %v3044_v19, 0.0  ;;  %v1517_v42 = vld [vmem:[#allocation2 + $0x4f] sm:$0xff] }
 0x100   : > { %2517 = vmatpush3.msk.msra.mxu1 %vm3301_vm2, %v2805_v13  ;;  %v2937_v30 = vld [vmem:[#allocation2 + $0x3f] sm:$0xff]  ;;  %v2939_v31 = vld [vmem:[#allocation2 + $0x47] sm:$0xff]  ;;  %2472 = vmatmul.mubr.msk.f32.gmra.mrb[14].mxu0 %vm452_vm1, %v2929_v28 }
 0x101   : > { %v1058_v32 = vsel %vm2933_vm15, %v2937_v30, 0.0  ;;  %v1059_v13 = vsel %vm2910_vm13, %v2939_v31, 0.0  ;;  %2530 = vmatprep.subr.msk.mxu1 %vm3301_vm2, %v2294_v26  ;;  %2476 = vmatprep.mubr.msk.f32.mxu0 %vm452_vm1, %v602_v27  ;;  %v609_v56 = vsel %vm2910_vm13, %v2937_v30, 0.0  ;;  %v1361_v27 = vsel %vm3033_vm7, %v3044_v19, 0.0 }
 0x102   : > { %2513 = vmatprep.mubr.msk.f32.mxu1 %vm452_vm1, %v1058_v32 }
 0x103   : > { %2514 = vmatmul.mubr.msk.f32.gmra.mrb[2].mxu1 %vm452_vm1, %v1059_v13  ;;  %v3073_v13 = vld [vmem:[#allocation2 + $0x29] sm:$0xff] }
 0x104   : > { %2518 = vmatprep.mubr.msk.f32.mxu1 %vm452_vm1, %v2826_v47  ;;  %2477 = vmatmul.mubr.msk.f32.vlgmr.msra.gmra.mrb[8].mxu0 %vm452_vm1, %v603_v39  ;;  %v606_v47 = vsel %vm2882_vm12, %v2982_v44, 0.0  ;;  %v1362_v39 = vsel %vm3040_vm8, %v3053_v22, 0.0  ;;  %vm3108_vm8 = vcmp.le.s32.totalorder %v528_v17, 6  ;;  %vm3337_vm12 = vnez %v3323_v10 }
 0x105   : > { %2479 = vmatprep.mubr.msk.f32.mxu0 %vm452_vm1, %v604_v40  ;;  %2489 = vmatpush3.msk.msra.mxu0 %vm3301_vm2, %v2834_v49  ;;  %v607_v49 = vsel %vm2869_vm11, %v2886_v15, 0.0  ;;  %v1525_v15 = vsel %vm2910_vm13, %v1517_v42, 0.0  ;;  %v1828_v62 = vsel %vm3337_vm12, %v3073_v13, 0.0 }
 0x106   : > { %2502 = vmatprep.subr.msk.mxu0 %vm3301_vm2, %v2796_v12 }
 0x107   : > { %2519 = vmatmul.mubr.msk.f32.vlgmr.msra.gmra.mrb[4].mxu1 %vm452_vm1, %v2839_v51 }
 0x108   : > { %2531 = vmatpush3.msk.msra.mxu1 %vm3301_vm2, %v2294_v26  ;;  %2521 = vmatprep.mubr.msk.f32.mxu1 %vm452_vm1, %v2851_v57 }
 0x109   : > { %2480 = vmatmul.mubr.msk.f32.gmra.mrb[10].mxu0 %vm452_vm1, %v605_v46  ;;  %2544 = vmatprep.subr.msk.mxu1 %vm3301_vm2, %v2304_v45 }
 0x10a   : > { %2482 = vmatprep.mubr.msk.f32.mxu0 %vm452_vm1, %v606_v47  ;;  %v3112_v47 = vld [vmem:[#allocation2 + $0x39] sm:$0xff] }
 0x10b   : > { %2522 = vmatmul.mubr.msk.f32.gmra.mrb[6].mxu1 %vm452_vm1, %v2860_v60  ;;  %v900_v59 = vsel %vm3108_vm8, %v3112_v47, 0.0  ;;  %v1830_v14 = vsel %vm3069_vm10, %v3112_v47, 0.0 }
 0x10c   : > { %2524 = vmatprep.mubr.msk.f32.mxu1 %vm452_vm1, %v2878_v11 }
 0x10d   : > { %2483 = vmatmul.mubr.msk.f32.gmra.mrb[12].mxu0 %vm452_vm1, %v607_v49  ;;  %v3122_v49 = vld [vmem:[#allocation2 + $0x41] sm:$0xff] }
 0x10e   : > { %2485 = vmatprep.mubr.msk.f32.mxu0 %vm452_vm1, %v608_v50  ;;  %v1365_v50 = vsel %vm3097_vm0, %v3112_v47, 0.0  ;;  %v1366_v55 = vsel %vm3108_vm8, %v3122_v49, 0.0 }
 0x10f   : > { %2525 = vmatmul.mubr.msk.f32.gmra.mrb[0].mxu1 %vm452_vm1, %v2893_v18 }
 0x110   : > { %2527 = vmatprep.mubr.msk.f32.mxu1 %vm452_vm1, %v2929_v28 }
 0x111   : > { %2486 = vmatmul.mubr.msk.f32.gmra.mrb[14].mxu0 %vm452_vm1, %v609_v56  ;;  %v1359_v56 = vld [vmem:[#allocation2 + $0x49] sm:$0xff] }
 0x112   : > { %2490 = vmatprep.mubr.msk.f32.mxu0 %vm452_vm1, %v894_v37  ;;  %v1518_v37 = vsel %vm2916_vm14, %v2963_v38, 0.0  ;;  %v1832_v23 = vsel %vm3108_vm8, %v1359_v56, 0.0 }
 0x113   : > { %2528 = vmatmul.mubr.msk.f32.gmra.mrb[2].mxu1 %vm452_vm1, %v3038_v9 }
 0x114   : > { %2532 = vmatprep.mubr.msk.f32.mxu1 %vm452_vm1, %v1360_v20  ;;  %v1053_v20 = vsel %vm2949_vm3, %v2963_v38, 0.0  ;;  %v1520_v38 = vsel %vm2959_vm4, %v2982_v44, 0.0 }
 0x115   : > { %2491 = vmatmul.mubr.msk.f32.vlgmr.msra.gmra.mrb[8].mxu0 %vm452_vm1, %v895_v21  ;;  %v1519_v21 = vsel %vm2949_vm3, %v2979_v43, 0.0 }
 0x116   : > { %2493 = vmatprep.mubr.msk.f32.mxu0 %vm452_vm1, %v896_v25  ;;  %2503 = vmatpush3.msk.msra.mxu0 %vm3301_vm2, %v2796_v12  ;;  %v898_v12 = vsel %vm3069_vm10, %v3073_v13, 0.0  ;;  %v1055_v25 = vsel %vm2975_vm5, %v2982_v44, 0.0  ;;  %v1524_v44 = vsel %vm2933_vm15, %v2939_v31, 0.0  ;;  %vm3340_vm10 = vcmask 64512  }
 0x117   : > { %2533 = vmatmul.mubr.msk.f32.vlgmr.msra.gmra.mrb[4].mxu1 %vm452_vm1, %v1361_v27  ;;  %v2334_v27 = vld [vmem:[%s3295_s4] ss:$0 sm:$0xff] }
 0x118   : > { %2545 = vmatpush3.msk.msra.mxu1 %vm3301_vm2, %v2304_v45  ;;  %2535 = vmatprep.mubr.msk.f32.mxu1 %vm452_vm1, %v1362_v39  ;;  %v1363_v45 = vsel %vm3059_vm9, %v3073_v13, 0.0 }
 0x119   : > { %2494 = vmatmul.mubr.msk.f32.gmra.mrb[10].mxu0 %vm452_vm1, %v897_v48  ;;  %2558 = vmatprep.subr.msk.mxu1 %vm3301_vm2, %v2314_v35  ;;  %vm3130_vm2 = vcmp.le.s32.totalorder %v535_v63, 6  ;;  %v1052_v63 = vsel %vm2916_vm14, %v2953_v34, 0.0  ;;  %v1054_v34 = vsel %vm2959_vm4, %v2979_v43, 0.0  ;;  %vm3334_vm14 = vcmask 1043456  }
 0x11a   : > { %2496 = vmatprep.mubr.msk.f32.mxu0 %vm452_vm1, %v898_v12  ;;  %v901_v54 = vsel %vm3130_vm2, %v3122_v49, 0.0  ;;  %v1367_v61 = vsel %vm3130_vm2, %v1359_v56, 0.0  ;;  %vm3335_vm3 = vmmov %vm3334_vm14  ;;  %v1523_v43 = vsel %vm2869_vm11, %v2937_v30, 0.0 }
 0x11b   : > { %2536 = vmatmul.mubr.msk.f32.gmra.mrb[6].mxu1 %vm452_vm1, %v1363_v45  ;;  %vm3336_vm11 = vmmov %vm3335_vm3 }
 0x11c   : > { %2538 = vmatprep.mubr.msk.f32.mxu1 %vm452_vm1, %v1364_v41  ;;  %vm3338_vm13 = vmmov %vm3335_vm3 }
 0x11d   : > { %2497 = vmatmul.mubr.msk.f32.gmra.mrb[12].mxu0 %vm452_vm1, %v899_v53  ;;  %2586 = vmatprep.subr.msk.mxu0 %vm3338_vm13, %v2015_v29  ;;  %vm3339_vm15 = vmmov %vm3335_vm3 }
 0x11e   : > { %2499 = vmatprep.mubr.msk.f32.mxu0 %vm452_vm1, %v900_v59 }
 0x11f   : > { %2539 = vmatmul.mubr.msk.f32.gmra.mrb[0].mxu1 %vm452_vm1, %v1365_v50 }
 0x120   : > { %2541 = vmatprep.mubr.msk.f32.mxu1 %vm452_vm1, %v1366_v55 }
 0x121   : > { %2500 = vmatmul.mubr.msk.f32.gmra.mrb[14].mxu0 %vm452_vm1, %v901_v54 }
 0x122   : > { %2504 = vmatprep.mubr.msk.f32.mxu0 %vm452_vm1, %v1052_v63 }
 0x123   : > { %2542 = vmatmul.mubr.msk.f32.gmra.mrb[2].mxu1 %vm452_vm1, %v1367_v61 }
 0x124   : > { %2546 = vmatprep.mubr.msk.f32.mxu1 %vm452_vm1, %v1518_v37 }
 0x125   : > { %2505 = vmatmul.mubr.msk.f32.vlgmr.msra.gmra.mrb[8].mxu0 %vm452_vm1, %v1053_v20 }
 0x126   : > { %2507 = vmatprep.mubr.msk.f32.mxu0 %vm452_vm1, %v1054_v34  ;;  %2587 = vmatpush3.msk.msra.mxu0 %vm3339_vm15, %v2015_v29 }
 0x127   : > { %2547 = vmatmul.mubr.msk.f32.vlgmr.msra.gmra.mrb[4].mxu1 %vm452_vm1, %v1519_v21 }
 0x128   : > { %2559 = vmatpush3.msk.msra.mxu1 %vm3334_vm14, %v2314_v35  ;;  %2549 = vmatprep.mubr.msk.f32.mxu1 %vm452_vm1, %v1520_v38 }
 0x129   : > { %2508 = vmatmul.mubr.msk.f32.gmra.mrb[10].mxu0 %vm452_vm1, %v1055_v25  ;;  %2572 = vmatprep.subr.msk.mxu1 %vm3335_vm3, %v2324_v24 }
 0x12b   : > { %2550 = vmatmul.mubr.msk.f32.gmra.mrb[6].mxu1 %vm452_vm1, %v1521_v33 }
 0x12c   : > { %2552 = vmatprep.mubr.msk.f32.mxu1 %vm452_vm1, %v1522_v36 }
 0x12f   : > { %2553 = vmatmul.mubr.msk.f32.gmra.mrb[0].mxu1 %vm452_vm1, %v1523_v43 }
 0x130   : > { %2555 = vmatprep.mubr.msk.f32.mxu1 %vm452_vm1, %v1524_v44 }
 0x133   : > { %2556 = vmatmul.mubr.msk.f32.gmra.mrb[2].mxu1 %vm452_vm1, %v1525_v15 }
 0x134   : > { %2560 = vmatprep.mubr.msk.f32.mxu1 %vm452_vm1, %v2839_v51  ;;  %v1675_v51 = vld [vmem:[#allocation2 + $0x50] sm:$0xff] }
 0x137   : > { %2561 = vmatmul.mubr.msk.f32.vlgmr.msra.gmra.mrb[4].mxu1 %vm452_vm1, %v2851_v57  ;;  %v1826_v57 = vsel %vm3019_vm6, %v3044_v19, 0.0 }
 0x138   : > { %2573 = vmatpush3.msk.msra.mxu1 %vm3336_vm11, %v2324_v24  ;;  %2563 = vmatprep.mubr.msk.f32.mxu1 %vm452_vm1, %v2860_v60  ;;  %v1827_v60 = vsel %vm3033_vm7, %v3053_v22, 0.0 }
 0x13b   : > { %2564 = vmatmul.mubr.msk.f32.gmra.mrb[6].mxu1 %vm452_vm1, %v2878_v11  ;;  %v1829_v11 = vsel %vm3059_vm9, %v3089_v58, 0.0 }
 0x13c   : > { %2566 = vmatprep.mubr.msk.f32.mxu1 %vm452_vm1, %v2893_v18  ;;  %v1831_v18 = vsel %vm3097_vm0, %v3122_v49, 0.0 }
 0x13f   : > { %2567 = vmatmul.mubr.msk.f32.gmra.mrb[0].mxu1 %vm452_vm1, %v2929_v28  ;;  %v1833_v28 = vsel %vm3130_vm2, %v1825_v16, 0.0 }
 0x140   : > { %2569 = vmatprep.mubr.msk.f32.mxu1 %vm452_vm1, %v3038_v9 }
 0x143   : > { %2570 = vmatmul.mubr.msk.f32.gmra.mrb[2].mxu1 %vm452_vm1, %v1675_v51 }
 0x144   : > { %2574 = vmatprep.mubr.msk.f32.mxu1 %vm452_vm1, %v1826_v57 }
 0x147   : > { %2575 = vmatmul.mubr.msk.f32.vlgmr.msra.gmra.mrb[4].mxu1 %vm452_vm1, %v1827_v60 }
 0x148   : > { %2577 = vmatprep.mubr.msk.f32.mxu1 %vm452_vm1, %v1828_v62 }
 0x14b   : > { %2578 = vmatmul.mubr.msk.f32.gmra.mrb[6].mxu1 %vm452_vm1, %v1829_v11  ;;  %v2335_v11 = vld [vmem:[%s3297_s6] ss:$0 sm:$0xff] }
 0x14c   : > { %2580 = vmatprep.mubr.msk.f32.mxu1 %vm452_vm1, %v1830_v14 }
 0x14f   : > { %2581 = vmatmul.mubr.msk.f32.gmra.mrb[0].mxu1 %vm452_vm1, %v1831_v18 }
 0x150   : > { %2583 = vmatprep.mubr.msk.f32.mxu1 %vm452_vm1, %v1832_v23 }
 0x153   : > { %2584 = vmatmul.mubr.msk.f32.gmra.mrb[2].mxu1 %vm452_vm1, %v1833_v28 }
 0x1f0   : > { %v2498_v30 = vpop.f32.mrb[12].mxu0 }
 0x1f1   : > { %v1017_v31 = vpop.f32.mrb[13].mxu0 }
 0x1f4   : > { %v2501_v52 = vpop.f32.mrb[14].mxu0 }
 0x1f5   : > { %v1027_v0 = vpop.f32.mrb[15].mxu0 }
 0x1f8   : > { %v2506_v9 = vpop.f32.mrb[8].mxu0 }
 0x1f9   : > { %v1155_v10 = vpop.f32.mrb[9].mxu0 }
 0x1fc   : > { %v2509_v19 = vpop.f32.mrb[10].mxu0 }
 0x1fd   : > { %v1165_v22 = vpop.f32.mrb[11].mxu0 }
 0x21a   : > { %v2576_v26 = vpop.f32.mrb[4].mxu1 }
 0x21b   : > { %v2602_v32 = vadd.f32 %v2576_v26, %v2506_v9  ;;  %v1929_v13 = vpop.f32.mrb[5].mxu1 }
 0x21c   : > { %v2603_v35 = vadd.f32 %v1929_v13, %v1155_v10 }
 0x21d   : > { %v1984_v39 = vadd.f32 %v2602_v32, %v2334_v27 }
 0x21e   : > { %v1983_v48 = vadd.f32 %v2603_v35, %v2334_v27  ;;  %v2579_v58 = vpop.f32.mrb[6].mxu1 }
 0x21f   : > { %v2000_v12 = vmul.f32 0.2, %v1984_v39  ;;  %v2604_v40 = vadd.f32 %v2579_v58, %v2509_v19  ;;  %v1939_v45 = vpop.f32.mrb[7].mxu1  ;;  %vm1992_vm0 = vcmp.gt.f32.partialorder %v1984_v39, 0.0 }
 0x220   : > { %v1999_v46 = vmul.f32 0.2, %v1983_v48  ;;  %v2605_v47 = vadd.f32 %v1939_v45, %v1165_v22  ;;  %vm1991_vm2 = vcmp.gt.f32.partialorder %v1983_v48, 0.0 }
 0x221   : > { %v1986_v41 = vadd.f32 %v2604_v40, %v2334_v27  ;;  %v2008_v17 = vsel %vm1992_vm0, %v1984_v39, %v2000_v12 }
 0x222   : > { %v1985_v53 = vadd.f32 %v2605_v47, %v2334_v27  ;;  %v2582_v49 = vpop.f32.mrb[0].mxu1  ;;  %v2007_v59 = vsel %vm1991_vm2, %v1983_v48, %v1999_v46 }
 0x223   : > { %v2002_v50 = vmul.f32 0.2, %v1986_v41  ;;  %v2606_v55 = vadd.f32 %v2582_v49, %v2498_v30  ;;  %v1949_v56 = vpop.f32.mrb[1].mxu1  ;;  %2588 = vmatprep.mubr.msk.f32.mxu0 %vm452_vm1, %v2007_v59  ;;  %vm1994_vm5 = vcmp.gt.f32.partialorder %v1986_v41, 0.0 }
 0x224   : > { %v2001_v54 = vmul.f32 0.2, %v1985_v53  ;;  %v2607_v63 = vadd.f32 %v1949_v56, %v1017_v31  ;;  %2589 = vmatmul.mubr.msk.f32.vlgmr.msra.gmra.mrb[16].mxu0 %vm452_vm1, %v2008_v17  ;;  %vm1993_vm4 = vcmp.gt.f32.partialorder %v1985_v53, 0.0 }
 0x225   : > { %v1988_v61 = vadd.f32 %v2606_v55, %v2334_v27  ;;  %v2010_v25 = vsel %vm1994_vm5, %v1986_v41, %v2002_v50 }
 0x226   : > { %v1987_v37 = vadd.f32 %v2607_v63, %v2334_v27  ;;  %v2585_v20 = vpop.f32.mrb[2].mxu1  ;;  %v2009_v34 = vsel %vm1993_vm4, %v1985_v53, %v2001_v54 }
 0x227   : > { %v2004_v21 = vmul.f32 0.2, %v1988_v61  ;;  %v2608_v24 = vadd.f32 %v2585_v20, %v2501_v52  ;;  %v1959_v38 = vpop.f32.mrb[3].mxu1  ;;  %2591 = vmatprep.mubr.msk.f32.mxu0 %vm452_vm1, %v2009_v34  ;;  %vm1996_vm7 = vcmp.gt.f32.partialorder %v1988_v61, 0.0 }
 0x228   : > { %v2003_v33 = vmul.f32 0.2, %v1987_v37  ;;  %v2609_v36 = vadd.f32 %v1959_v38, %v1027_v0  ;;  %2592 = vmatmul.mubr.msk.f32.gmra.mrb[18].mxu0 %vm452_vm1, %v2010_v25  ;;  %vm1995_vm6 = vcmp.gt.f32.partialorder %v1987_v37, 0.0 }
 0x229   : > { %v1990_v43 = vadd.f32 %v2608_v24, %v2334_v27  ;;  %v2012_v51 = vsel %vm1996_vm7, %v1988_v61, %v2004_v21 }
 0x22a   : > { %v1989_v44 = vadd.f32 %v2609_v36, %v2334_v27  ;;  %v2011_v42 = vsel %vm1995_vm6, %v1987_v37, %v2003_v33 }
 0x22b   : > { %v2006_v15 = vmul.f32 0.2, %v1990_v43  ;;  %2594 = vmatprep.mubr.msk.f32.mxu0 %vm452_vm1, %v2011_v42  ;;  %vm1998_vm9 = vcmp.gt.f32.partialorder %v1990_v43, 0.0 }
 0x22c   : > { %v2005_v57 = vmul.f32 0.2, %v1989_v44  ;;  %2595 = vmatmul.mubr.msk.f32.gmra.mrb[20].mxu0 %vm452_vm1, %v2012_v51  ;;  %vm1997_vm8 = vcmp.gt.f32.partialorder %v1989_v44, 0.0 }
 0x22d   : > { %v2014_v62 = vsel %vm1998_vm9, %v1990_v43, %v2006_v15 }
 0x22e   : > { %v2013_v60 = vsel %vm1997_vm8, %v1989_v44, %v2005_v57 }
 0x22f   : > { %2597 = vmatprep.mubr.msk.f32.mxu0 %vm452_vm1, %v2013_v60 }
 0x230   : > { %2598 = vmatmul.mubr.msk.f32.gmra.mrb[22].mxu0 %vm452_vm1, %v2014_v62  ;;  %vm3341_vm1 = vmmov %vm3340_vm10 }
 0x231   : > { %vm3342_vm14 = vmmov %vm3341_vm1 }
 0x232   : > { %vm3343_vm3 = vmmov %vm3341_vm1 }
 0x233   : > { %vm3344_vm11 = vmmov %vm3341_vm1 }
 0x234   : > { %vm3345_vm12 = vmmov %vm3341_vm1 }
 0x235   : > { %vm3346_vm13 = vmmov %vm3341_vm1 }
 0x236   : > { %vm3347_vm15 = vmmov %vm3341_vm1 }
 0x2f7   : > { %v2590_v14 = vpop.f32.mrb[16].mxu0 }
 0x2f8   : > { %v2122_v16 = vadd.f32 %v2590_v14, %v2335_v11  ;;  %v2116_v18 = vpop.f32.mrb[17].mxu0 }
 0x2f9   : > { %v2117_v23 = vadd.f32 %v2335_v11, %v2116_v18 }
 0x2fa   : > { %v2156_v28 = vadd.f32 %v2122_v16, %v2745_v2 }
 0x2fb   : > { %v2155_v29 = vadd.f32 %v2117_v23, %v2743_v1  ;;  %v2593_v30 = vpop.f32.mrb[18].mxu0 }
 0x2fc   : > { %2164 = vst.msk [vmem:[%s280_s18 + $0x8] sm:$0xff] %vm3340_vm10, %v2156_v28  ;;  %v2132_v31 = vadd.f32 %v2593_v30, %v2335_v11  ;;  %v2126_v52 = vpop.f32.mrb[19].mxu0 }
 0x2fd   : > { %2163 = vst.msk [vmem:[%s280_s18] sm:$0xff] %vm3341_vm1, %v2155_v29  ;;  %v2127_v0 = vadd.f32 %v2335_v11, %v2126_v52 }
 0x2fe   : > { %v2158_v9 = vadd.f32 %v2132_v31, %v2755_v4 }
 0x2ff   : > { %v2157_v10 = vadd.f32 %v2127_v0, %v2747_v3  ;;  %v2596_v19 = vpop.f32.mrb[20].mxu0 }
 0x300   : > { %2166 = vst.msk [vmem:[%s280_s18 + $0x18] sm:$0xff] %vm3342_vm14, %v2158_v9  ;;  %v2142_v22 = vadd.f32 %v2596_v19, %v2335_v11  ;;  %v2136_v26 = vpop.f32.mrb[21].mxu0 }
 0x301   : > { %2165 = vst.msk [vmem:[%s280_s18 + $0x10] sm:$0xff] %vm3343_vm3, %v2157_v10  ;;  %v2137_v1 = vadd.f32 %v2335_v11, %v2136_v26 }
 0x302   : > { %v2160_v2 = vadd.f32 %v2142_v22, %v2763_v6 }
 0x303   : > { %v2159_v27 = vadd.f32 %v2137_v1, %v2757_v5  ;;  %v2599_v32 = vpop.f32.mrb[22].mxu0 }
 0x304   : > { %2168 = vst.msk [vmem:[%s280_s18 + $0x28] sm:$0xff] %vm3344_vm11, %v2160_v2  ;;  %v2152_v13 = vadd.f32 %v2599_v32, %v2335_v11  ;;  %v2146_v35 = vpop.f32.mrb[23].mxu0 }
 0x305   : > { %2167 = vst.msk [vmem:[%s280_s18 + $0x20] sm:$0xff] %vm3345_vm12, %v2159_v27  ;;  %v2147_v3 = vadd.f32 %v2335_v11, %v2146_v35 }
 0x306   : > { %v2162_v4 = vadd.f32 %v2152_v13, %v2771_v8 }
 0x307   : > { %v2161_v39 = vadd.f32 %v2147_v3, %v2765_v7 }
 0x308   : > { %2170 = vst.msk [vmem:[%s280_s18 + $0x38] sm:$0xff] %vm3346_vm13, %v2162_v4 }
 0x309   : > { %2169 = vst.msk [vmem:[%s280_s18 + $0x30] sm:$0xff] %vm3347_vm15, %v2161_v39 }
 0x30a PF: > { %s17_s24 = sadd.s32 1, %s2681_s24  }
 0x30b   : > { %p14_p4 = scmp.ge.s32.totalorder %s17_s24, 4  }
 0x30d   :  { %16 = sbr.rel (!%p14_p4) target bundleno = 1 (0x1), region = 86 }

// kernel: hourglass_forward.21
= control target key start
LH: loop header
LB: loop body
LE: loop exit
PB: predicated region body
PF: predicated region fallthrough
CT: control target
= control target key end

     0   :  { %s392_s9 = smov 0   ;;  %s484_s0 = inlined_call_operand.vmem [shape: f32[16,2,8,16], index: 0, kind: input, shape index: {}]   ;;  %s485_s1 = inlined_call_operand.vmem [shape: f32[16,8,8], index: 1, kind: input, shape index: {}]   ;;  %s486_s2 = inlined_call_operand.vmem [shape: f32[16,2,8,16], index: 2, kind: output, shape index: {}]  }
   0x1 LB: > { %s342_s10 = sadd.s32 4294967295, %s374_s9   ;;  %p346_p0 = scmp.ge.s32.totalorder %s374_s9, 1  ;;  %s374_s9 = sphi %s392_s9, %s12_s9  }
   0x2   : > { %p125_p1 = scmp.lt.s32.totalorder %s374_s9, 3 }
   0x4   : > { %p126_p2 = pnand %p346_p0, %p125_p1 }
   0x5   : > { %s347_s11 = sshll.u32 (!%p126_p2), %s342_s10, 3  ;;  %s376_s16 = smov (!%p126_p2), 8   ;;  %vm214_vm0 = vcmask (!%p126_p2), 64512   ;;  %vm255_vm1 = vcmask (!%p126_p2), 130048  }
   0x6   : > { %129 = sbr.rel (%p126_p2) target bundleno = 149 (0x95), region = 28  ;;  %p155_p3 = scmp.lt.s32.totalorder (!%p126_p2), %s347_s11, 15 }
   0xd   : > { %s488_s11 = smov (!%p155_p3, %s347_s11), 15 }
   0xe   : > { %s351_s12 = sshll.u32 %s488_s11, 3  ;;  %s357_s17 = sshll.u32 %s488_s11, 4 }
   0xf   : > { %s165_s15 = scalar_lea.vmem %s485_s1, %s351_s12  ;;  %s416_s20 = scalar_lea.vmem %s484_s0, %s357_s17 }
  0x10   : > { %v176_v0 = vld [vmem:[%s165_s15 + $0x10] sm:$0xff]  ;;  %v174_v1 = vld [vmem:[%s165_s15] sm:$0xff]  ;;  %v177_v2 = vld [vmem:[%s165_s15 + $0x18] sm:$0xff]  ;;  %s425_s23 = scalar_lea.vmem %s486_s2, %s357_s17 }
  0x11   : > { %194 = vrot.lane.b32.xlu1 %v176_v0, %s376_s16  ;;  %190 = vrot.lane.b32.xlu0 %v174_v1, %s376_s16  ;;  %v175_v3 = vld [vmem:[%s165_s15 + $0x8] sm:$0xff]  ;;  %v178_v5 = vld [vmem:[%s165_s15 + $0x20] sm:$0xff] }
  0x12   : > { %v179_v4 = vld [vmem:[%s165_s15 + $0x28] sm:$0xff]  ;;  %v406_v6 = vld [vmem:[%s165_s15 + $0x38] sm:$0xff]  ;;  %v408_v7 = vld [vmem:[%s165_s15 + $0x30] sm:$0xff] }
  0x13   : > { %v227_v8 = vld [vmem:[%s416_s20 + $0x20] sm:$0xff]  ;;  %v228_v9 = vld [vmem:[%s416_s20 + $0x28] sm:$0xff]  ;;  %v229_v20 = vld [vmem:[%s416_s20 + $0x30] sm:$0xff] }
  0x14   : > { %v223_v10 = vld [vmem:[%s416_s20] sm:$0xff]  ;;  %v224_v11 = vld [vmem:[%s416_s20 + $0x8] sm:$0xff]  ;;  %v230_v21 = vld [vmem:[%s416_s20 + $0x38] sm:$0xff] }
  0x15   : > { %196 = vrot.lane.b32.xlu1 %v177_v2, %s376_s16  ;;  %192 = vrot.lane.b32.xlu0 %v175_v3, %s376_s16  ;;  %v225_v22 = vld [vmem:[%s416_s20 + $0x10] sm:$0xff]  ;;  %v226_v23 = vld [vmem:[%s416_s20 + $0x18] sm:$0xff] }
  0x16   : > { %v233_v32 = vld [vmem:[%s416_s20 + $0x50] sm:$0xff]  ;;  %v234_v33 = vld [vmem:[%s416_s20 + $0x58] sm:$0xff]  ;;  %v231_v34 = vld [vmem:[%s416_s20 + $0x40] sm:$0xff] }
  0x17   : > { %v232_v35 = vld [vmem:[%s416_s20 + $0x48] sm:$0xff]  ;;  %v237_v44 = vld [vmem:[%s416_s20 + $0x70] sm:$0xff]  ;;  %v238_v45 = vld [vmem:[%s416_s20 + $0x78] sm:$0xff] }
  0x18   : > { %v235_v46 = vld [vmem:[%s416_s20 + $0x60] sm:$0xff]  ;;  %v236_v47 = vld [vmem:[%s416_s20 + $0x68] sm:$0xff] }
  0x19   : > { %200 = vrot.lane.b32.xlu1 %v179_v4, %s376_s16  ;;  %198 = vrot.lane.b32.xlu0 %v178_v5, %s376_s16 }
  0x1d   : > { %204 = vrot.lane.b32.xlu1 %v406_v6, %s376_s16  ;;  %202 = vrot.lane.b32.xlu0 %v408_v7, %s376_s16 }
  0x83   : > { %v195_v12 = vpop.permute.xlu1 %194  ;;  %v191_v13 = vpop.permute.xlu0 %190 }
  0x84   : > { %v217_v14 = vsel %vm214_vm0, %v176_v0, %v195_v12  ;;  %v215_v15 = vsel %vm214_vm0, %v174_v1, %v191_v13 }
  0x85   : > { %v243_v16 = vadd.f32 %v227_v8, %v217_v14  ;;  %v244_v17 = vadd.f32 %v228_v9, %v217_v14  ;;  %v239_v18 = vadd.f32 %v223_v10, %v215_v15  ;;  %v240_v19 = vadd.f32 %v224_v11, %v215_v15 }
  0x87   : > { %260 = vst.msk [vmem:[%s425_s23 + $0x20] sm:$0xff] %vm255_vm1, %v243_v16  ;;  %261 = vst.msk [vmem:[%s425_s23 + $0x28] sm:$0xff] %vm255_vm1, %v244_v17  ;;  %v197_v24 = vpop.permute.xlu1 %196  ;;  %v193_v25 = vpop.permute.xlu0 %192 }
  0x88   : > { %256 = vst.msk [vmem:[%s425_s23] sm:$0xff] %vm255_vm1, %v239_v18  ;;  %257 = vst.msk [vmem:[%s425_s23 + $0x8] sm:$0xff] %vm255_vm1, %v240_v19  ;;  %v218_v26 = vsel %vm214_vm0, %v177_v2, %v197_v24  ;;  %v216_v27 = vsel %vm214_vm0, %v175_v3, %v193_v25 }
  0x89   : > { %v245_v28 = vadd.f32 %v229_v20, %v218_v26  ;;  %v246_v29 = vadd.f32 %v230_v21, %v218_v26  ;;  %v241_v30 = vadd.f32 %v225_v22, %v216_v27  ;;  %v242_v31 = vadd.f32 %v226_v23, %v216_v27 }
  0x8b   : > { %262 = vst.msk [vmem:[%s425_s23 + $0x30] sm:$0xff] %vm255_vm1, %v245_v28  ;;  %263 = vst.msk [vmem:[%s425_s23 + $0x38] sm:$0xff] %vm255_vm1, %v246_v29  ;;  %v201_v36 = vpop.permute.xlu1 %200  ;;  %v199_v37 = vpop.permute.xlu0 %198 }
  0x8c   : > { %258 = vst.msk [vmem:[%s425_s23 + $0x10] sm:$0xff] %vm255_vm1, %v241_v30  ;;  %259 = vst.msk [vmem:[%s425_s23 + $0x18] sm:$0xff] %vm255_vm1, %v242_v31  ;;  %v220_v38 = vsel %vm214_vm0, %v179_v4, %v201_v36  ;;  %v219_v39 = vsel %vm214_vm0, %v178_v5, %v199_v37 }
  0x8d   : > { %v249_v40 = vadd.f32 %v233_v32, %v220_v38  ;;  %v250_v41 = vadd.f32 %v234_v33, %v220_v38  ;;  %v247_v42 = vadd.f32 %v231_v34, %v219_v39  ;;  %v248_v43 = vadd.f32 %v232_v35, %v219_v39 }
  0x8f   : > { %266 = vst.msk [vmem:[%s425_s23 + $0x50] sm:$0xff] %vm255_vm1, %v249_v40  ;;  %267 = vst.msk [vmem:[%s425_s23 + $0x58] sm:$0xff] %vm255_vm1, %v250_v41  ;;  %v205_v48 = vpop.permute.xlu1 %204  ;;  %v203_v49 = vpop.permute.xlu0 %202 }
  0x90   : > { %264 = vst.msk [vmem:[%s425_s23 + $0x40] sm:$0xff] %vm255_vm1, %v247_v42  ;;  %265 = vst.msk [vmem:[%s425_s23 + $0x48] sm:$0xff] %vm255_vm1, %v248_v43  ;;  %v222_v50 = vsel %vm214_vm0, %v406_v6, %v205_v48  ;;  %v221_v51 = vsel %vm214_vm0, %v408_v7, %v203_v49 }
  0x91   : > { %v253_v52 = vadd.f32 %v237_v44, %v222_v50  ;;  %v254_v53 = vadd.f32 %v238_v45, %v222_v50  ;;  %v251_v54 = vadd.f32 %v235_v46, %v221_v51  ;;  %v252_v55 = vadd.f32 %v236_v47, %v221_v51 }
  0x93   : > { %270 = vst.msk [vmem:[%s425_s23 + $0x70] sm:$0xff] %vm255_vm1, %v253_v52  ;;  %271 = vst.msk [vmem:[%s425_s23 + $0x78] sm:$0xff] %vm255_vm1, %v254_v53 }
  0x94   : > { %268 = vst.msk [vmem:[%s425_s23 + $0x60] sm:$0xff] %vm255_vm1, %v251_v54  ;;  %269 = vst.msk [vmem:[%s425_s23 + $0x68] sm:$0xff] %vm255_vm1, %v252_v55 }
  0x95 PF: > { %s12_s9 = sadd.s32 1, %s374_s9  }
  0x96   : > { %p9_p4 = scmp.ge.s32.totalorder %s12_s9, 4  }
  0x98   :  { %11 = sbr.rel (!%p9_p4) target bundleno = 1 (0x1), region = 61 }

// kernel: hourglass_forward.11
= control target key start
LH: loop header
LB: loop body
LE: loop exit
PB: predicated region body
PF: predicated region fallthrough
CT: control target
= control target key end

     0   :  { %s7166_s24 = smov 0   ;;  %s8928_s0 = inlined_call_operand.vmem [shape: f32[512,8], index: 0, kind: input, shape index: {}]   ;;  %s8929_s1 = inlined_call_operand.vmem [shape: f32[8,4], index: 1, kind: input, shape index: {}]   ;;  %s8930_s2 = inlined_call_operand.vmem [shape: f32[1,4], index: 2, kind: input, shape index: {}]   ;;  %s8931_s3 = inlined_call_operand.vmem [shape: f32[9,4,4], index: 3, kind: input, shape index: {}]   ;;  %s8932_s4 = inlined_call_operand.vmem [shape: f32[1,4], index: 4, kind: input, shape index: {}]   ;;  %s8933_s5 = inlined_call_operand.vmem [shape: f32[4,8], index: 5, kind: input, shape index: {}]   ;;  %s8934_s6 = inlined_call_operand.vmem [shape: f32[1,8], index: 6, kind: input, shape index: {}]   ;;  %s8935_s7 = inlined_call_operand.vmem [shape: f32[512,8], index: 7, kind: output, shape index: {}]  }
   0x1 LB: > { %s5519_s25 = sadd.s32 4294967295, %s7123_s24   ;;  %p5523_p0 = scmp.ge.s32.totalorder %s7123_s24, 1  ;;  %s7123_s24 = sphi %s7166_s24, %s17_s24  }
   0x2   : > { %p238_p1 = scmp.lt.s32.totalorder %s7123_s24, 3 }
   0x4   : > { %p239_p2 = pnand %p5523_p0, %p238_p1 }
   0x6   : > { %242 = sbr.rel (%p239_p2) target bundleno = 1077 (0x435), region = 48 }
   0xd   : > { %v314_v0 = vld [vmem:[%s8929_s1] sm:$0xff]  ;;  %s5524_s28 = sshll.u32 %s5519_s25, 5  ;;  %vm8936_vm0 = vcmask 64512   ;;  %vm9038_vm1 = vcmask 31744   ;;  %v7125_v33 = vmov 0.0   ;;  %vm8937_vm2 = vcmask 1043456  }
   0xe   : > { %6266 = vmatprep.subr.mxu0 %v314_v0  ;;  %p271_p3 = scmp.lt.s32.totalorder %s5524_s28, 63  ;;  %746 = vst.msk [vmem:[#allocation2 + $0x28] sm:$0xff] %vm9038_vm1, %v7125_v33  ;;  %742 = vst.msk [vmem:[#allocation2 + $0x8] sm:$0xff] %vm9038_vm1, %v7125_v33  ;;  %v5561_v34 = vld [vmem:[%s8931_s3 + $0x4] sm:$0xf]  ;;  %v813_v41 = vlaneseq }
   0xf   : > { %6267 = vmatpush3.msra.mxu0 %v314_v0  ;;  %743 = vst.msk [vmem:[#allocation2 + $0x10] sm:$0xff] %vm9038_vm1, %v7125_v33  ;;  %744 = vst.msk [vmem:[#allocation2 + $0x18] sm:$0xff] %vm9038_vm1, %v7125_v33  ;;  %v7299_v37 = vld [vmem:[%s8931_s3 + $0xc] sm:$0xf]  ;;  %v7308_v38 = vld [vmem:[%s8931_s3 + $0x10] sm:$0xf] }
  0x10   : > { %s9638_s28 = smov (!%p271_p3, %s5524_s28), 63  ;;  %745 = vst.msk [vmem:[#allocation2 + $0x20] sm:$0xff] %vm9038_vm1, %v7125_v33  ;;  %747 = vst.msk [vmem:[#allocation2 + $0x30] sm:$0xff] %vm9038_vm1, %v7125_v33  ;;  %6316 = vmatprep.subr.msk.mxu0 %vm8937_vm2, %v5561_v34  ;;  %6816 = vmatprep.subr.msk.mxu1 %vm8937_vm2, %v7299_v37  ;;  %v1358_v39 = vld [vmem:[%s8931_s3] sm:$0xf]  ;;  %v7324_v47 = vshrl.u32 %v813_v41, 7 }
  0x11   : > { %s5525_s29 = sshll.u32 %s9638_s28, 3  ;;  %748 = vst.msk [vmem:[#allocation2 + $0x38] sm:$0xff] %vm9038_vm1, %v7125_v33  ;;  %749 = vst.msk [vmem:[#allocation2 + $0x40] sm:$0xff] %vm9038_vm1, %v7125_v33  ;;  %6817 = vmatpush3.msk.msra.mxu1 %vm8937_vm2, %v7299_v37  ;;  %v7320_v40 = vld [vmem:[%s8930_s2] ss:$0 sm:$0xff] }
  0x12   : > { %s7185_s9 = scalar_lea.vmem %s8928_s0, %s5525_s29  ;;  %750 = vst.msk [vmem:[#allocation2 + $0x48] sm:$0xff] %vm9038_vm1, %v7125_v33  ;;  %751 = vst.msk [vmem:[#allocation2 + $0x50] sm:$0xff] %vm9038_vm1, %v7125_v33  ;;  %6516 = vmatprep.subr.msk.mxu1 %vm8937_vm2, %v7308_v38  ;;  %v816_v56 = vadd.s32 16, %v7324_v47  ;;  %v7335_v62 = vld [vmem:[%s8931_s3 + $0x8] sm:$0xf]  ;;  %v824_v41 = vadd.s32 80, %v7324_v47  ;;  %s8796_s21 = scalar_lea.vmem %s8935_s7, %s5525_s29 }
  0x13   : > { %v282_v1 = vld [vmem:[%s7185_s9] sm:$0xff]  ;;  %v283_v2 = vld [vmem:[%s7185_s9 + $0x8] sm:$0xff]  ;;  %v284_v3 = vld [vmem:[%s7185_s9 + $0x10] sm:$0xff]  ;;  %752 = vst.msk [vmem:[#allocation2 + $0x58] sm:$0xff] %vm9038_vm1, %v7125_v33 }
  0x14   : > { %6268 = vmatprep.mubr.msk.f32.mxu0 %vm8936_vm0, %v282_v1  ;;  %v285_v4 = vld [vmem:[%s7185_s9 + $0x18] sm:$0xff]  ;;  %v286_v5 = vld [vmem:[%s7185_s9 + $0x20] sm:$0xff]  ;;  %v287_v6 = vld [vmem:[%s7185_s9 + $0x28] sm:$0xff]  ;;  %753 = vst.msk [vmem:[#allocation2 + $0x60] sm:$0xff] %vm9038_vm1, %v7125_v33  ;;  %v815_v1 = vadd.s32 8, %v7324_v47 }
  0x15   : > { %6269 = vmatmul.mubr.msk.f32.vlgmr.msra.gmra.mrb[0].mxu0 %vm8936_vm0, %v283_v2  ;;  %v288_v7 = vld [vmem:[%s7185_s9 + $0x30] sm:$0xff]  ;;  %v289_v8 = vld [vmem:[%s7185_s9 + $0x38] sm:$0xff]  ;;  %v290_v9 = vld [vmem:[%s7185_s9 + $0x40] sm:$0xff]  ;;  %754 = vst.msk [vmem:[#allocation2 + $0x68] sm:$0xff] %vm9038_vm1, %v7125_v33 }
  0x16   : > { %6271 = vmatprep.mubr.msk.f32.mxu0 %vm8936_vm0, %v284_v3  ;;  %v291_v10 = vld [vmem:[%s7185_s9 + $0x48] sm:$0xff]  ;;  %v292_v11 = vld [vmem:[%s7185_s9 + $0x50] sm:$0xff]  ;;  %v293_v12 = vld [vmem:[%s7185_s9 + $0x58] sm:$0xff]  ;;  %755 = vst.msk [vmem:[#allocation2 + $0x70] sm:$0xff] %vm9038_vm1, %v7125_v33  ;;  %6317 = vmatpush3.msk.msra.mxu0 %vm8937_vm2, %v5561_v34  ;;  %v864_v3 = vand.u32 15, %v816_v56  ;;  %v7376_v34 = vadd.s32 56, %v7324_v47 }
  0x17   : > { %v294_v13 = vld [vmem:[%s7185_s9 + $0x60] sm:$0xff]  ;;  %v295_v14 = vld [vmem:[%s7185_s9 + $0x68] sm:$0xff]  ;;  %v296_v15 = vld [vmem:[%s7185_s9 + $0x70] sm:$0xff]  ;;  %756 = vst.msk [vmem:[#allocation2 + $0x78] sm:$0xff] %vm9038_vm1, %v7125_v33  ;;  %6366 = vmatprep.subr.msk.mxu0 %vm8937_vm2, %v1358_v39 }
  0x18   : > { %v297_v16 = vld [vmem:[%s7185_s9 + $0x78] sm:$0xff]  ;;  %v298_v17 = vld [vmem:[%s7185_s9 + $0x80] sm:$0xff]  ;;  %v299_v18 = vld [vmem:[%s7185_s9 + $0x88] sm:$0xff]  ;;  %757 = vst.msk [vmem:[#allocation2 + $0x80] sm:$0xff] %vm9038_vm1, %v7125_v33  ;;  %vm7356_vm10 = vcmp.ge.s32.totalorder %v864_v3, 1  ;;  %v826_v3 = vadd.s32 96, %v7324_v47 }
  0x19   : > { %6272 = vmatmul.mubr.msk.f32.gmra.mrb[2].mxu0 %vm8936_vm0, %v285_v4  ;;  %v300_v19 = vld [vmem:[%s7185_s9 + $0x90] sm:$0xff]  ;;  %v301_v20 = vld [vmem:[%s7185_s9 + $0x98] sm:$0xff]  ;;  %v302_v21 = vld [vmem:[%s7185_s9 + $0xa0] sm:$0xff]  ;;  %758 = vst.msk [vmem:[#allocation2 + $0x88] sm:$0xff] %vm9038_vm1, %v7125_v33  ;;  %v818_v4 = vadd.s32 32, %v7324_v47 }
  0x1a   : > { %6274 = vmatprep.mubr.msk.f32.mxu0 %vm8936_vm0, %v286_v5  ;;  %v303_v22 = vld [vmem:[%s7185_s9 + $0xa8] sm:$0xff]  ;;  %v304_v23 = vld [vmem:[%s7185_s9 + $0xb0] sm:$0xff]  ;;  %v305_v24 = vld [vmem:[%s7185_s9 + $0xb8] sm:$0xff]  ;;  %759 = vst.msk [vmem:[#allocation2 + $0x90] sm:$0xff] %vm9038_vm1, %v7125_v33 }
  0x1b   : > { %v306_v25 = vld [vmem:[%s7185_s9 + $0xc0] sm:$0xff]  ;;  %v307_v26 = vld [vmem:[%s7185_s9 + $0xc8] sm:$0xff]  ;;  %v308_v27 = vld [vmem:[%s7185_s9 + $0xd0] sm:$0xff]  ;;  %760 = vst.msk [vmem:[#allocation2 + $0x98] sm:$0xff] %vm9038_vm1, %v7125_v33 }
  0x1c   : > { %v309_v28 = vld [vmem:[%s7185_s9 + $0xd8] sm:$0xff]  ;;  %v310_v29 = vld [vmem:[%s7185_s9 + $0xe0] sm:$0xff]  ;;  %v311_v30 = vld [vmem:[%s7185_s9 + $0xe8] sm:$0xff]  ;;  %761 = vst.msk [vmem:[#allocation2 + $0xa0] sm:$0xff] %vm9038_vm1, %v7125_v33 }
  0x1d   : > { %6275 = vmatmul.mubr.msk.f32.gmra.mrb[4].mxu0 %vm8936_vm0, %v287_v6  ;;  %v312_v31 = vld [vmem:[%s7185_s9 + $0xf0] sm:$0xff]  ;;  %v313_v32 = vld [vmem:[%s7185_s9 + $0xf8] sm:$0xff]  ;;  %762 = vst.msk [vmem:[#allocation2 + $0xa8] sm:$0xff] %vm9038_vm1, %v7125_v33  ;;  %763 = vst.msk [vmem:[#allocation2 + $0xb0] sm:$0xff] %vm9038_vm1, %v7125_v33 }
  0x1e   : > { %6277 = vmatprep.mubr.msk.f32.mxu0 %vm8936_vm0, %v288_v7  ;;  %764 = vst.msk [vmem:[#allocation2 + $0xb8] sm:$0xff] %vm9038_vm1, %v7125_v33  ;;  %765 = vst.msk [vmem:[#allocation2 + $0xc0] sm:$0xff] %vm9038_vm1, %v7125_v33  ;;  %v1359_v35 = vld [vmem:[#allocation2 + $0x10] sm:$0xff]  ;;  %v1360_v36 = vld [vmem:[#allocation2 + $0x18] sm:$0xff] }
  0x1f   : > { %766 = vst.msk [vmem:[#allocation2 + $0xc8] sm:$0xff] %vm9038_vm1, %v7125_v33  ;;  %767 = vst.msk [vmem:[#allocation2 + $0xd0] sm:$0xff] %vm9038_vm1, %v7125_v33 }
  0x20   : > { %768 = vst.msk [vmem:[#allocation2 + $0xd8] sm:$0xff] %vm9038_vm1, %v7125_v33  ;;  %769 = vst.msk [vmem:[#allocation2 + $0xe0] sm:$0xff] %vm9038_vm1, %v7125_v33 }
  0x21   : > { %6278 = vmatmul.mubr.msk.f32.gmra.mrb[6].mxu0 %vm8936_vm0, %v289_v8  ;;  %770 = vst.msk [vmem:[#allocation2 + $0xe8] sm:$0xff] %vm9038_vm1, %v7125_v33  ;;  %771 = vst.msk [vmem:[#allocation2 + $0xf0] sm:$0xff] %vm9038_vm1, %v7125_v33 }
  0x22   : > { %6280 = vmatprep.mubr.msk.f32.mxu0 %vm8936_vm0, %v290_v9  ;;  %772 = vst.msk [vmem:[#allocation2 + $0xf8] sm:$0xff] %vm9038_vm1, %v7125_v33  ;;  %773 = vst.msk [vmem:[#allocation2 + $0x100] sm:$0xff] %vm9038_vm1, %v7125_v33 }
  0x23   : > { %774 = vst.msk [vmem:[#allocation2 + $0x108] sm:$0xff] %vm9038_vm1, %v7125_v33  ;;  %775 = vst.msk [vmem:[#allocation2 + $0x110] sm:$0xff] %vm9038_vm1, %v7125_v33 }
  0x24   : > { %776 = vst.msk [vmem:[#allocation2 + $0x118] sm:$0xff] %vm9038_vm1, %v7125_v33  ;;  %777 = vst.msk [vmem:[#allocation2 + $0x120] sm:$0xff] %vm9038_vm1, %v7125_v33 }
  0x25   : > { %6281 = vmatmul.mubr.msk.f32.gmra.mrb[8].mxu0 %vm8936_vm0, %v291_v10  ;;  %778 = vst.msk [vmem:[#allocation2 + $0x128] sm:$0xff] %vm9038_vm1, %v7125_v33  ;;  %779 = vst.msk [vmem:[#allocation2 + $0x130] sm:$0xff] %vm9038_vm1, %v7125_v33  ;;  %v820_v10 = vadd.s32 48, %v7324_v47  ;;  %v9099_v33 = vmov 0 }
  0x26   : > { %6283 = vmatprep.mubr.msk.f32.mxu0 %vm8936_vm0, %v292_v11  ;;  %9096 = vst [vmem:[#allocation3_spill] sm:$0xff] %v7324_v47  ;;  %v817_v11 = vadd.s32 24, %v7324_v47 }
  0x29   : > { %6284 = vmatmul.mubr.msk.f32.gmra.mrb[10].mxu0 %vm8936_vm0, %v293_v12 }
  0x2a   : > { %6286 = vmatprep.mubr.msk.f32.mxu0 %vm8936_vm0, %v294_v13 }
  0x2d   : > { %6287 = vmatmul.mubr.msk.f32.gmra.mrb[12].mxu0 %vm8936_vm0, %v295_v14 }
  0x2e   : > { %6289 = vmatprep.mubr.msk.f32.mxu0 %vm8936_vm0, %v296_v15  ;;  %v857_v15 = vand.u32 15, %v815_v1 }
  0x30   : > { %vm7371_vm12 = vcmp.le.s32.totalorder %v857_v15, 14 }
  0x31   : > { %6290 = vmatmul.mubr.msk.f32.gmra.mrb[14].mxu0 %vm8936_vm0, %v297_v16  ;;  %v9100_v33 = vsel %vm7371_vm12, 4294967295, %v9099_v33  ;;  %vm9149_vm12 = vcmask 1043456  }
  0x32   : > { %6292 = vmatprep.mubr.msk.f32.mxu0 %vm8936_vm0, %v298_v17  ;;  %9101 = vst [vmem:[#allocation4_spill] sm:$0xff] %v9100_v33 }
  0x35   : > { %6293 = vmatmul.mubr.msk.f32.gmra.mrb[16].mxu0 %vm8936_vm0, %v299_v18  ;;  %v9097_v18 = vmov 0 }
  0x36   : > { %6295 = vmatprep.mubr.msk.f32.mxu0 %vm8936_vm0, %v300_v19  ;;  %v9098_v18 = vsel %vm7356_vm10, 4294967295, %v9097_v18  ;;  %v878_v19 = vand.u32 15, %v818_v4  ;;  %v7427_v4 = vadd.s32 88, %v7324_v47 }
  0x38   : > { %vm7383_vm14 = vcmp.ge.s32.totalorder %v878_v19, 1 }
  0x39   : > { %6296 = vmatmul.mubr.msk.f32.gmra.mrb[18].mxu0 %vm8936_vm0, %v301_v20 }
  0x3a   : > { %6298 = vmatprep.mubr.msk.f32.mxu0 %vm8936_vm0, %v302_v21 }
  0x3d   : > { %6299 = vmatmul.mubr.msk.f32.gmra.mrb[20].mxu0 %vm8936_vm0, %v303_v22  ;;  %v822_v22 = vadd.s32 64, %v7324_v47 }
  0x3e   : > { %6301 = vmatprep.mubr.msk.f32.mxu0 %vm8936_vm0, %v304_v23  ;;  %v819_v23 = vadd.s32 40, %v7324_v47 }
  0x41   : > { %6302 = vmatmul.mubr.msk.f32.gmra.mrb[22].mxu0 %vm8936_vm0, %v305_v24 }
  0x42   : > { %6304 = vmatprep.mubr.msk.f32.mxu0 %vm8936_vm0, %v306_v25 }
  0x45   : > { %6305 = vmatmul.mubr.msk.f32.gmra.mrb[24].mxu0 %vm8936_vm0, %v307_v26 }
  0x46   : > { %6307 = vmatprep.mubr.msk.f32.mxu0 %vm8936_vm0, %v308_v27  ;;  %v892_v27 = vand.u32 15, %v820_v10 }
  0x49   : > { %6308 = vmatmul.mubr.msk.f32.gmra.mrb[26].mxu0 %vm8936_vm0, %v309_v28  ;;  %v871_v28 = vand.u32 15, %v817_v11 }
  0x4a   : > { %6310 = vmatprep.mubr.msk.f32.mxu0 %vm8936_vm0, %v310_v29 }
  0x4d   : > { %6311 = vmatmul.mubr.msk.f32.gmra.mrb[28].mxu0 %vm8936_vm0, %v311_v30 }
  0x4e   : > { %6313 = vmatprep.mubr.msk.f32.mxu0 %vm8936_vm0, %v312_v31 }
  0x51   : > { %6314 = vmatmul.mubr.msk.f32.gmra.mrb[30].mxu0 %vm8936_vm0, %v313_v32 }
  0x52   : > { %6318 = vmatprep.mubr.msk.f32.mxu0 %vm9038_vm1, %v1359_v35 }
  0x55   : > { %6319 = vmatmul.mubr.msk.f32.vlgmr.msra.gmra.mrb[32].mxu0 %vm9038_vm1, %v1360_v36 }
  0x56   : > { %6367 = vmatpush3.msk.msra.mxu0 %vm8937_vm2, %v1358_v39 }
  0x57   : > { %6416 = vmatprep.subr.msk.mxu0 %vm8937_vm2, %v7335_v62 }
  0xe8   : > { %v6270_v42 = vpop.f32.mrb[0].mxu0 }
  0xe9   : > { %v491_v43 = vadd.f32 %v6270_v42, %v7320_v40  ;;  %v485_v44 = vpop.f32.mrb[1].mxu0 }
  0xea   : > { %v486_v45 = vadd.f32 %v7320_v40, %v485_v44  ;;  %v906_v44 = vand.u32 15, %v822_v22  ;;  %v828_v22 = vadd.s32 112, %v7324_v47 }
  0xeb   : > { %vm645_vm3 = vcmp.gt.f32.partialorder %v491_v43, 0.0  ;;  %v677_v46 = vmul.f32 0.2, %v491_v43 }
  0xec   : > { %vm644_vm4 = vcmp.gt.f32.partialorder %v486_v45, 0.0  ;;  %v676_v48 = vmul.f32 0.2, %v486_v45  ;;  %v6273_v49 = vpop.f32.mrb[2].mxu0 }
  0xed   : > { %v709_v50 = vsel %vm645_vm3, %v491_v43, %v677_v46  ;;  %v501_v51 = vadd.f32 %v6273_v49, %v7320_v40  ;;  %v495_v52 = vpop.f32.mrb[3].mxu0  ;;  %vm7391_vm3 = vcmp.ge.s32.totalorder %v892_v27, 1  ;;  %v934_v27 = vand.u32 15, %v826_v3 }
  0xee   : > { %782 = vst.msk [vmem:[#allocation2 + $0x28] sm:$0xff] %vm9038_vm1, %v709_v50  ;;  %v708_v53 = vsel %vm644_vm4, %v486_v45, %v676_v48  ;;  %v496_v54 = vadd.f32 %v7320_v40, %v495_v52  ;;  %v885_v45 = vand.u32 15, %v819_v23  ;;  %vm7395_vm4 = vcmp.le.s32.totalorder %v871_v28, 14 }
  0xef   : > { %781 = vst.msk [vmem:[#allocation2 + $0x20] sm:$0xff] %vm9038_vm1, %v708_v53  ;;  %vm647_vm5 = vcmp.gt.f32.partialorder %v501_v51, 0.0  ;;  %v679_v55 = vmul.f32 0.2, %v501_v51  ;;  %v927_v28 = vand.u32 15, %v7427_v4  ;;  %v7503_v3 = vadd.s32 120, %v7324_v47 }
  0xf0   : > { %vm646_vm6 = vcmp.gt.f32.partialorder %v496_v54, 0.0  ;;  %v678_v57 = vmul.f32 0.2, %v496_v54  ;;  %v6276_v58 = vpop.f32.mrb[4].mxu0 }
  0xf1   : > { %v711_v59 = vsel %vm647_vm5, %v501_v51, %v679_v55  ;;  %v511_v60 = vadd.f32 %v6276_v58, %v7320_v40  ;;  %v505_v61 = vpop.f32.mrb[5].mxu0  ;;  %v9106_v51 = vmov 0  ;;  %v7410_v58 = vadd.s32 72, %v7324_v47 }
  0xf2   : > { %784 = vst.msk [vmem:[#allocation2 + $0x38] sm:$0xff] %vm9038_vm1, %v711_v59  ;;  %v710_v63 = vsel %vm646_vm6, %v496_v54, %v678_v57  ;;  %v506_v0 = vadd.f32 %v7320_v40, %v505_v61  ;;  %v9107_v51 = vsel %vm7395_vm4, 4294967295, %v9106_v51  ;;  %v899_v57 = vand.u32 15, %v7376_v34 }
  0xf3   : > { %783 = vst.msk [vmem:[#allocation2 + $0x30] sm:$0xff] %vm9038_vm1, %v710_v63  ;;  %vm649_vm7 = vcmp.gt.f32.partialorder %v511_v60, 0.0  ;;  %v681_v2 = vmul.f32 0.2, %v511_v60  ;;  %9108 = vst [vmem:[#allocation5_spill] sm:$0xff] %v9107_v51  ;;  %v920_v61 = vand.u32 15, %v824_v41 }
  0xf4   : > { %vm648_vm8 = vcmp.gt.f32.partialorder %v506_v0, 0.0  ;;  %v680_v5 = vmul.f32 0.2, %v506_v0  ;;  %v6279_v6 = vpop.f32.mrb[6].mxu0  ;;  %vm7542_vm2 = vcmp.le.s32.totalorder %v927_v28, 14  ;;  %v7559_v28 = vadd.s32 136, %v7324_v47 }
  0xf5   : > { %v713_v7 = vsel %vm649_vm7, %v511_v60, %v681_v2  ;;  %v521_v8 = vadd.f32 %v6279_v6, %v7320_v40  ;;  %v515_v9 = vpop.f32.mrb[7].mxu0  ;;  %v7354_v17 = vld [vmem:[#allocation2 + $0x28] sm:$0xff]  ;;  %vm7421_vm7 = vcmp.ge.s32.totalorder %v906_v44, 1 }
  0xf6   : > { %786 = vst.msk [vmem:[#allocation2 + $0x48] sm:$0xff] %vm9038_vm1, %v713_v7  ;;  %v712_v12 = vsel %vm648_vm8, %v506_v0, %v680_v5  ;;  %v516_v13 = vadd.f32 %v7320_v40, %v515_v9  ;;  %v7349_v14 = vld [vmem:[#allocation2 + $0x20] sm:$0xff]  ;;  %vm7430_vm8 = vcmp.le.s32.totalorder %v885_v45, 14 }
  0xf7   : > { %785 = vst.msk [vmem:[#allocation2 + $0x40] sm:$0xff] %vm9038_vm1, %v712_v12  ;;  %vm651_vm9 = vcmp.gt.f32.partialorder %v521_v8, 0.0  ;;  %v683_v16 = vmul.f32 0.2, %v521_v8  ;;  %6321 = vmatprep.mubr.msk.f32.mxu0 %vm9038_vm1, %v7349_v14 }
  0xf8   : > { %vm650_vm11 = vcmp.gt.f32.partialorder %v516_v13, 0.0  ;;  %v682_v20 = vmul.f32 0.2, %v516_v13  ;;  %v6282_v21 = vpop.f32.mrb[8].mxu0  ;;  %6322 = vmatmul.mubr.msk.f32.gmra.mrb[34].mxu0 %vm9038_vm1, %v7354_v17 }
  0xf9   : > { %v715_v24 = vsel %vm651_vm9, %v521_v8, %v683_v16  ;;  %v531_v25 = vadd.f32 %v6282_v21, %v7320_v40  ;;  %v525_v26 = vpop.f32.mrb[9].mxu0  ;;  %v7381_v36 = vld [vmem:[#allocation2 + $0x38] sm:$0xff]  ;;  %v9112_v8 = vmov 0  ;;  %v913_v16 = vand.u32 15, %v7410_v58 }
  0xfa   : > { %788 = vst.msk [vmem:[#allocation2 + $0x58] sm:$0xff] %vm9038_vm1, %v715_v24  ;;  %v714_v29 = vsel %vm650_vm11, %v516_v13, %v682_v20  ;;  %v526_v30 = vadd.f32 %v7320_v40, %v525_v26  ;;  %v7367_v31 = vld [vmem:[#allocation2 + $0x30] sm:$0xff]  ;;  %v9113_v8 = vsel %vm7430_vm8, 4294967295, %v9112_v8 }
  0xfb   : > { %v7369_v32 = vld [vmem:[#allocation2 + $0x2f] sm:$0xff]  ;;  %787 = vst.msk [vmem:[#allocation2 + $0x50] sm:$0xff] %vm9038_vm1, %v714_v29  ;;  %vm653_vm13 = vcmp.gt.f32.partialorder %v531_v25, 0.0  ;;  %v685_v35 = vmul.f32 0.2, %v531_v25  ;;  %6324 = vmatprep.mubr.msk.f32.mxu0 %vm9038_vm1, %v7367_v31  ;;  %9114 = vst [vmem:[#allocation7_spill] sm:$0xff] %v9113_v8 }
  0xfc   : > { %vm652_vm15 = vcmp.gt.f32.partialorder %v526_v30, 0.0  ;;  %v684_v42 = vmul.f32 0.2, %v526_v30  ;;  %v6285_v43 = vpop.f32.mrb[10].mxu0  ;;  %6325 = vmatmul.mubr.msk.f32.gmra.mrb[36].mxu0 %vm9038_vm1, %v7381_v36 }
  0xfd   : > { %v717_v46 = vsel %vm653_vm13, %v531_v25, %v685_v35  ;;  %v541_v48 = vadd.f32 %v6285_v43, %v7320_v40  ;;  %v535_v49 = vpop.f32.mrb[11].mxu0  ;;  %v7415_v60 = vld [vmem:[#allocation2 + $0x48] sm:$0xff]  ;;  %vm7460_vm13 = vcmp.ge.s32.totalorder %v920_v61, 1  ;;  %v9118_v35 = vmov 0 }
  0xfe   : > { %790 = vst.msk [vmem:[#allocation2 + $0x68] sm:$0xff] %vm9038_vm1, %v717_v46  ;;  %v716_v53 = vsel %vm652_vm15, %v526_v30, %v684_v42  ;;  %v536_v54 = vadd.f32 %v7320_v40, %v535_v49  ;;  %v7404_v55 = vld [vmem:[#allocation2 + $0x40] sm:$0xff]  ;;  %vm7466_vm15 = vcmp.le.s32.totalorder %v899_v57, 14  ;;  %v948_v57 = vand.u32 15, %v828_v22 }
  0xff   : > { %v7406_v56 = vld [vmem:[#allocation2 + $0x3f] sm:$0xff]  ;;  %789 = vst.msk [vmem:[#allocation2 + $0x60] sm:$0xff] %vm9038_vm1, %v716_v53  ;;  %vm655_vm5 = vcmp.gt.f32.partialorder %v541_v48, 0.0  ;;  %v687_v59 = vmul.f32 0.2, %v541_v48  ;;  %6327 = vmatprep.mubr.msk.f32.mxu0 %vm9038_vm1, %v7404_v55  ;;  %v9119_v35 = vsel %vm7466_vm15, 4294967295, %v9118_v35 }
 0x100   : > { %v7417_v63 = vld [vmem:[#allocation2 + $0x39] sm:$0xff]  ;;  %vm654_vm6 = vcmp.gt.f32.partialorder %v536_v54, 0.0  ;;  %v686_v0 = vmul.f32 0.2, %v536_v54  ;;  %v6288_v1 = vpop.f32.mrb[12].mxu0  ;;  %6328 = vmatmul.mubr.msk.f32.gmra.mrb[38].mxu0 %vm9038_vm1, %v7415_v60  ;;  %9120 = vst [vmem:[#allocation9_spill] sm:$0xff] %v9119_v35 }
 0x101   : > { %9109 = vst [vmem:[#allocation6_spill] sm:$0xff] %v7417_v63  ;;  %v719_v5 = vsel %vm655_vm5, %v541_v48, %v687_v59  ;;  %v551_v6 = vadd.f32 %v6288_v1, %v7320_v40  ;;  %v545_v7 = vpop.f32.mrb[13].mxu0  ;;  %v7453_v21 = vld [vmem:[#allocation2 + $0x58] sm:$0xff]  ;;  %v7483_v48 = vadd.s32 104, %v7324_v47  ;;  %vm7536_vm0 = vcmp.ge.s32.totalorder %v948_v57, 1 }
 0x102   : > { %792 = vst.msk [vmem:[#allocation2 + $0x78] sm:$0xff] %vm9038_vm1, %v719_v5  ;;  %v718_v11 = vsel %vm654_vm6, %v536_v54, %v686_v0  ;;  %v546_v12 = vadd.f32 %v7320_v40, %v545_v7  ;;  %v7442_v13 = vld [vmem:[#allocation2 + $0x50] sm:$0xff]  ;;  %v830_v0 = vadd.s32 128, %v7324_v47  ;;  %v9124_v7 = vmov 0 }
 0x103   : > { %v7444_v15 = vld [vmem:[#allocation2 + $0x4f] sm:$0xff]  ;;  %791 = vst.msk [vmem:[#allocation2 + $0x70] sm:$0xff] %vm9038_vm1, %v718_v11  ;;  %vm657_vm9 = vcmp.gt.f32.partialorder %v551_v6, 0.0  ;;  %v689_v20 = vmul.f32 0.2, %v551_v6  ;;  %6330 = vmatprep.mubr.msk.f32.mxu0 %vm9038_vm1, %v7442_v13  ;;  %v9136_v49 = vmov 0 }
 0x104   : > { %v7456_v23 = vld [vmem:[#allocation2 + $0x49] sm:$0xff]  ;;  %vm656_vm11 = vcmp.gt.f32.partialorder %v546_v12, 0.0  ;;  %v688_v24 = vmul.f32 0.2, %v546_v12  ;;  %v6291_v25 = vpop.f32.mrb[14].mxu0  ;;  %6331 = vmatmul.mubr.msk.f32.gmra.mrb[40].mxu0 %vm9038_vm1, %v7453_v21  ;;  %v9156_v63 = vmov 0 }
 0x105   : > { %9115 = vst [vmem:[#allocation8_spill] sm:$0xff] %v7456_v23  ;;  %v721_v29 = vsel %vm657_vm9, %v551_v6, %v689_v20  ;;  %v561_v30 = vadd.f32 %v6291_v25, %v7320_v40  ;;  %v555_v34 = vpop.f32.mrb[15].mxu0  ;;  %v7491_v54 = vld [vmem:[#allocation2 + $0x68] sm:$0xff]  ;;  %vm7498_vm9 = vcmp.ge.s32.totalorder %v934_v27, 1  ;;  %v9130_v27 = vmov 0 }
 0x106   : > { %794 = vst.msk [vmem:[#allocation2 + $0x88] sm:$0xff] %vm9038_vm1, %v721_v29  ;;  %v720_v43 = vsel %vm656_vm11, %v546_v12, %v688_v24  ;;  %v556_v44 = vadd.f32 %v7320_v40, %v555_v34  ;;  %v7478_v45 = vld [vmem:[#allocation2 + $0x60] sm:$0xff]  ;;  %vm7506_vm11 = vcmp.le.s32.totalorder %v913_v16, 14  ;;  %v941_v16 = vand.u32 15, %v7483_v48 }
 0x107   : > { %v7480_v46 = vld [vmem:[#allocation2 + $0x5f] sm:$0xff]  ;;  %793 = vst.msk [vmem:[#allocation2 + $0x80] sm:$0xff] %vm9038_vm1, %v720_v43  ;;  %vm659_vm5 = vcmp.gt.f32.partialorder %v561_v30, 0.0  ;;  %v691_v53 = vmul.f32 0.2, %v561_v30  ;;  %6333 = vmatprep.mubr.msk.f32.mxu0 %vm9038_vm1, %v7478_v45  ;;  %v9125_v7 = vsel %vm7506_vm11, 4294967295, %v9124_v7 }
 0x108   : > { %v7493_v58 = vld [vmem:[#allocation2 + $0x59] sm:$0xff]  ;;  %vm658_vm6 = vcmp.gt.f32.partialorder %v556_v44, 0.0  ;;  %v690_v59 = vmul.f32 0.2, %v556_v44  ;;  %v6294_v61 = vpop.f32.mrb[16].mxu0  ;;  %6334 = vmatmul.mubr.msk.f32.gmra.mrb[42].mxu0 %vm9038_vm1, %v7491_v54  ;;  %9126 = vst [vmem:[#allocation11_spill] sm:$0xff] %v9125_v7 }
 0x109   : > { %9121 = vst [vmem:[#allocation10_spill] sm:$0xff] %v7493_v58  ;;  %v723_v4 = vsel %vm659_vm5, %v561_v30, %v691_v53  ;;  %v571_v5 = vadd.f32 %v6294_v61, %v7320_v40  ;;  %v565_v6 = vpop.f32.mrb[17].mxu0  ;;  %v7529_v30 = vld [vmem:[#allocation2 + $0x78] sm:$0xff]  ;;  %v832_v34 = vadd.s32 144, %v7324_v47  ;;  %v962_v53 = vand.u32 15, %v830_v0 }
 0x10a   : > { %796 = vst.msk [vmem:[#allocation2 + $0x98] sm:$0xff] %vm9038_vm1, %v723_v4  ;;  %v722_v20 = vsel %vm658_vm6, %v556_v44, %v690_v59  ;;  %v566_v22 = vadd.f32 %v7320_v40, %v565_v6  ;;  %v7518_v24 = vld [vmem:[#allocation2 + $0x70] sm:$0xff]  ;;  %v955_v61 = vand.u32 15, %v7503_v3  ;;  %v9131_v27 = vsel %vm7542_vm2, 4294967295, %v9130_v27 }
 0x10b   : > { %v7520_v25 = vld [vmem:[#allocation2 + $0x6f] sm:$0xff]  ;;  %795 = vst.msk [vmem:[#allocation2 + $0x90] sm:$0xff] %vm9038_vm1, %v722_v20  ;;  %vm661_vm5 = vcmp.gt.f32.partialorder %v571_v5, 0.0  ;;  %v693_v29 = vmul.f32 0.2, %v571_v5  ;;  %6336 = vmatprep.mubr.msk.f32.mxu0 %vm9038_vm1, %v7518_v24  ;;  %9132 = vst [vmem:[#allocation13_spill] sm:$0xff] %v9131_v27 }
 0x10c   : > { %v7532_v43 = vld [vmem:[#allocation2 + $0x69] sm:$0xff]  ;;  %vm660_vm6 = vcmp.gt.f32.partialorder %v566_v22, 0.0  ;;  %v692_v44 = vmul.f32 0.2, %v566_v22  ;;  %v6297_v48 = vpop.f32.mrb[18].mxu0  ;;  %6337 = vmatmul.mubr.msk.f32.gmra.mrb[44].mxu0 %vm9038_vm1, %v7529_v30  ;;  %vm7573_vm8 = vcmp.ge.s32.totalorder %v962_v53, 1 }
 0x10d   : > { %9127 = vst [vmem:[#allocation12_spill] sm:$0xff] %v7532_v43  ;;  %v725_v4 = vsel %vm661_vm5, %v571_v5, %v693_v29  ;;  %v581_v6 = vadd.f32 %v6297_v48, %v7320_v40  ;;  %v575_v20 = vpop.f32.mrb[19].mxu0  ;;  %v9134_v48 = vmov 0  ;;  %vm7580_vm15 = vcmp.le.s32.totalorder %v941_v16, 14 }
 0x10e   : > { %798 = vst.msk [vmem:[#allocation2 + $0xa8] sm:$0xff] %vm9038_vm1, %v725_v4  ;;  %v724_v0 = vsel %vm660_vm6, %v566_v22, %v692_v44  ;;  %v576_v3 = vadd.f32 %v7320_v40, %v575_v20  ;;  %v7554_v5 = vld [vmem:[#allocation2 + $0x80] sm:$0xff]  ;;  %v7567_v22 = vld [vmem:[#allocation2 + $0x88] sm:$0xff]  ;;  %v976_v44 = vand.u32 15, %v832_v34  ;;  %v9135_v48 = vsel %vm7573_vm8, 4294967295, %v9134_v48 }
 0x10f   : > { %v7556_v29 = vld [vmem:[#allocation2 + $0x7f] sm:$0xff]  ;;  %797 = vst.msk [vmem:[#allocation2 + $0xa0] sm:$0xff] %vm9038_vm1, %v724_v0  ;;  %vm663_vm5 = vcmp.gt.f32.partialorder %v581_v6, 0.0  ;;  %v695_v19 = vmul.f32 0.2, %v581_v6  ;;  %6339 = vmatprep.mubr.msk.f32.mxu0 %vm9038_vm1, %v7554_v5  ;;  %v7578_v0 = vadd.s32 160, %v7324_v47 }
 0x110   : > { %v7569_v4 = vld [vmem:[#allocation2 + $0x79] sm:$0xff]  ;;  %vm662_vm6 = vcmp.gt.f32.partialorder %v576_v3, 0.0  ;;  %v694_v20 = vmul.f32 0.2, %v576_v3  ;;  %v6300_v57 = vpop.f32.mrb[20].mxu0  ;;  %6340 = vmatmul.mubr.msk.f32.gmra.mrb[46].mxu0 %vm9038_vm1, %v7567_v22  ;;  %v9137_v49 = vsel %vm7580_vm15, 4294967295, %v9136_v49 }
 0x111   : > { %9133 = vst [vmem:[#allocation14_spill] sm:$0xff] %v7569_v4  ;;  %9138 = vst [vmem:[#allocation15_spill] sm:$0xff] %v9137_v49  ;;  %v727_v34 = vsel %vm663_vm5, %v581_v6, %v695_v19  ;;  %v591_v12 = vadd.f32 %v6300_v57, %v7320_v40  ;;  %v585_v11 = vpop.f32.mrb[21].mxu0  ;;  %v969_v19 = vand.u32 15, %v7559_v28  ;;  %vm7615_vm11 = vcmp.le.s32.totalorder %v955_v61, 14 }
 0x112   : > { %800 = vst.msk [vmem:[#allocation2 + $0xb8] sm:$0xff] %vm9038_vm1, %v727_v34  ;;  %v726_v41 = vsel %vm662_vm6, %v576_v3, %v694_v20  ;;  %v586_v16 = vadd.f32 %v7320_v40, %v585_v11  ;;  %v7593_v10 = vld [vmem:[#allocation2 + $0x90] sm:$0xff]  ;;  %v7604_v3 = vld [vmem:[#allocation2 + $0x98] sm:$0xff]  ;;  %vm7606_vm6 = vcmp.ge.s32.totalorder %v976_v44, 1  ;;  %v9139_v11 = vmov 0 }
 0x113   : > { %v7595_v9 = vld [vmem:[#allocation2 + $0x8f] sm:$0xff]  ;;  %799 = vst.msk [vmem:[#allocation2 + $0xb0] sm:$0xff] %vm9038_vm1, %v726_v41  ;;  %vm665_vm5 = vcmp.gt.f32.partialorder %v591_v12, 0.0  ;;  %v697_v57 = vmul.f32 0.2, %v591_v12  ;;  %6342 = vmatprep.mubr.msk.f32.mxu0 %vm9038_vm1, %v7593_v10  ;;  %v9140_v11 = vsel %vm7606_vm6, 4294967295, %v9139_v11 }
 0x114   : > { %v7610_v20 = vld [vmem:[#allocation2 + $0x89] sm:$0xff]  ;;  %vm664_vm4 = vcmp.gt.f32.partialorder %v586_v16, 0.0  ;;  %v696_v28 = vmul.f32 0.2, %v586_v16  ;;  %v6303_v34 = vpop.f32.mrb[22].mxu0  ;;  %6343 = vmatmul.mubr.msk.f32.gmra.mrb[48].mxu0 %vm9038_vm1, %v7604_v3  ;;  %v990_v41 = vand.u32 15, %v7578_v0 }
 0x115   : > { %9141 = vst [vmem:[#allocation16_spill] sm:$0xff] %v7610_v20  ;;  %v9142_v6 = vmov 0  ;;  %v833_v53 = vadd.s32 152, %v7324_v47  ;;  %v729_v44 = vsel %vm665_vm5, %v591_v12, %v697_v57  ;;  %v601_v42 = vadd.f32 %v6303_v34, %v7320_v40  ;;  %v595_v52 = vpop.f32.mrb[23].mxu0  ;;  %v7637_v57 = vld [vmem:[%s8931_s3 + $0x14] sm:$0xf] }
 0x116   : > { %v9143_v6 = vsel %vm7615_vm11, 4294967295, %v9142_v6  ;;  %802 = vst.msk [vmem:[#allocation2 + $0xc8] sm:$0xff] %vm9038_vm1, %v729_v44  ;;  %v728_v61 = vsel %vm664_vm4, %v586_v16, %v696_v28  ;;  %v596_v0 = vadd.f32 %v7320_v40, %v595_v52  ;;  %v7629_v7 = vld [vmem:[#allocation2 + $0xa0] sm:$0xff]  ;;  %v836_v12 = vadd.s32 176, %v7324_v47  ;;  %v7645_v52 = vld [vmem:[#allocation2 + $0xa8] sm:$0xff] }
 0x117   : > { %9144 = vst [vmem:[#allocation17_spill] sm:$0xff] %v9143_v6  ;;  %v7631_v58 = vld [vmem:[#allocation2 + $0x9f] sm:$0xff]  ;;  %801 = vst.msk [vmem:[#allocation2 + $0xc0] sm:$0xff] %vm9038_vm1, %v728_v61  ;;  %vm667_vm4 = vcmp.gt.f32.partialorder %v601_v42, 0.0  ;;  %v699_v16 = vmul.f32 0.2, %v601_v42  ;;  %6345 = vmatprep.mubr.msk.f32.mxu0 %vm9038_vm1, %v7629_v7 }
 0x118   : > { %v2512_v28 = vsel %vm7573_vm8, %v7631_v58, 0.0  ;;  %v7650_v44 = vld [vmem:[#allocation2 + $0x99] sm:$0xff]  ;;  %vm666_vm5 = vcmp.gt.f32.partialorder %v596_v0, 0.0  ;;  %v698_v43 = vmul.f32 0.2, %v596_v0  ;;  %v6306_v4 = vpop.f32.mrb[24].mxu0  ;;  %6346 = vmatmul.mubr.msk.f32.gmra.mrb[50].mxu0 %vm9038_vm1, %v7645_v52 }
 0x119   : > { %9145 = vst [vmem:[#allocation18_spill] sm:$0xff] %v7650_v44  ;;  %6492 = vmatprep.mubr.msk.f32.mxu1 %vm9038_vm1, %v2512_v28  ;;  %v7655_v61 = vld [vmem:[#allocation2 + $0xa7] sm:$0xff]  ;;  %vm7657_vm2 = vcmp.le.s32.totalorder %v969_v19, 14  ;;  %v9146_v34 = vmov 0  ;;  %v731_v20 = vsel %vm667_vm4, %v601_v42, %v699_v16  ;;  %v611_v27 = vadd.f32 %v6306_v4, %v7320_v40  ;;  %v605_v35 = vpop.f32.mrb[25].mxu0 }
 0x11a   : > { %v9147_v34 = vsel %vm7657_vm2, 4294967295, %v9146_v34  ;;  %6493 = vmatmul.mubr.msk.f32.vlgmr.msra.gmra.mrb[0].mxu1 %vm9038_vm1, %v7655_v61  ;;  %v983_v23 = vand.u32 15, %v833_v53  ;;  %804 = vst.msk [vmem:[#allocation2 + $0xd8] sm:$0xff] %vm9038_vm1, %v731_v20  ;;  %v730_v28 = vsel %vm666_vm5, %v596_v0, %v698_v43  ;;  %v606_v19 = vadd.f32 %v7320_v40, %v605_v35  ;;  %v7671_v42 = vld [vmem:[#allocation2 + $0xb0] sm:$0xff]  ;;  %v7682_v35 = vld [vmem:[#allocation2 + $0xb8] sm:$0xff] }
 0x11b   : > { %9148 = vst [vmem:[#allocation19_spill] sm:$0xff] %v9147_v34  ;;  %6517 = vmatpush3.msk.msra.mxu1 %vm9149_vm12, %v7308_v38  ;;  %9150 = vst [vmem:[#allocation20_spill] sm:$0xff] %v7671_v42  ;;  %v7673_v4 = vld [vmem:[#allocation2 + $0xaf] sm:$0xff]  ;;  %vm7675_vm4 = vcmp.ge.s32.totalorder %v990_v41, 1  ;;  %v9151_v16 = vmov 0  ;;  %v1004_v53 = vand.u32 15, %v836_v12  ;;  %6348 = vmatprep.mubr.msk.f32.mxu0 %vm9038_vm1, %v7671_v42 }
 0x11c   : > { %v9152_v16 = vsel %vm7675_vm4, 4294967295, %v9151_v16  ;;  %803 = vst.msk [vmem:[#allocation2 + $0xd0] sm:$0xff] %vm9038_vm1, %v730_v28  ;;  %vm669_vm15 = vcmp.gt.f32.partialorder %v611_v27, 0.0  ;;  %v701_v8 = vmul.f32 0.2, %v611_v27  ;;  %9153 = vst [vmem:[#allocation21_spill] sm:$0xff] %v7682_v35  ;;  %6566 = vmatprep.subr.msk.mxu1 %vm9149_vm12, %v7637_v57  ;;  %6349 = vmatmul.mubr.msk.f32.gmra.mrb[52].mxu0 %vm9038_vm1, %v7682_v35 }
 0x11d   : > { %v2514_v38 = vsel %vm7606_vm6, %v7673_v4, 0.0  ;;  %v7689_v43 = vld [vmem:[#allocation2 + $0xa9] sm:$0xff]  ;;  %vm668_vm5 = vcmp.gt.f32.partialorder %v606_v19, 0.0  ;;  %v700_v20 = vmul.f32 0.2, %v606_v19  ;;  %v6309_v41 = vpop.f32.mrb[26].mxu0 }
 0x11e   : > { %9154 = vst [vmem:[#allocation22_spill] sm:$0xff] %v7689_v43  ;;  %6495 = vmatprep.mubr.msk.f32.mxu1 %vm9038_vm1, %v2514_v38  ;;  %v7694_v0 = vld [vmem:[#allocation2 + $0xb7] sm:$0xff]  ;;  %v838_v12 = vadd.s32 192, %v7324_v47  ;;  %v733_v28 = vsel %vm669_vm15, %v611_v27, %v701_v8  ;;  %v621_v44 = vadd.f32 %v6309_v41, %v7320_v40  ;;  %v615_v49 = vpop.f32.mrb[27].mxu0  ;;  %vm7700_vm12 = vcmp.le.s32.totalorder %v983_v23, 14  ;;  %v7709_v8 = vld [vmem:[#allocation2 + $0xc0] sm:$0xff] }
 0x11f   : > { %9155 = vst [vmem:[#allocation23_spill] sm:$0xff] %v7694_v0  ;;  %6496 = vmatmul.mubr.msk.f32.gmra.mrb[2].mxu1 %vm9038_vm1, %v7694_v0  ;;  %v9157_v63 = vsel %vm7700_vm12, 4294967295, %v9156_v63  ;;  %806 = vst.msk [vmem:[#allocation2 + $0xe8] sm:$0xff] %vm9038_vm1, %v733_v28  ;;  %v732_v38 = vsel %vm668_vm5, %v606_v19, %v700_v20  ;;  %v616_v33 = vadd.f32 %v7320_v40, %v615_v49  ;;  %v7711_v27 = vld [vmem:[#allocation2 + $0xbf] sm:$0xff]  ;;  %vm7713_vm15 = vcmp.ge.s32.totalorder %v1004_v53, 1  ;;  %v7723_v19 = vld [vmem:[#allocation2 + $0xc8] sm:$0xff] }
 0x120   : > { %9158 = vst [vmem:[#allocation24_spill] sm:$0xff] %v9157_v63  ;;  %9159 = vst [vmem:[#allocation25_spill] sm:$0xff] %v7709_v8  ;;  %v9161_v41 = vmov 0  ;;  %v7718_v23 = vadd.s32 168, %v7324_v47  ;;  %vm671_vm6 = vcmp.gt.f32.partialorder %v621_v44, 0.0  ;;  %6351 = vmatprep.mubr.msk.f32.mxu0 %vm9038_vm1, %v7709_v8  ;;  %v2516_v49 = vsel %vm7675_vm4, %v7711_v27, 0.0 }
 0x121   : > { %9160 = vst [vmem:[#allocation26_spill] sm:$0xff] %v7711_v27  ;;  %v9162_v41 = vsel %vm7713_vm15, 4294967295, %v9161_v41  ;;  %805 = vst.msk [vmem:[#allocation2 + $0xe0] sm:$0xff] %vm9038_vm1, %v732_v38  ;;  %v703_v51 = vmul.f32 0.2, %v621_v44  ;;  %v7728_v53 = vld [vmem:[#allocation2 + $0xb9] sm:$0xff]  ;;  %6352 = vmatmul.mubr.msk.f32.gmra.mrb[54].mxu0 %vm9038_vm1, %v7723_v19  ;;  %6498 = vmatprep.mubr.msk.f32.mxu1 %vm9038_vm1, %v2516_v49 }
 0x122   : > { %9163 = vst [vmem:[#allocation27_spill] sm:$0xff] %v9162_v41  ;;  %9164 = vst [vmem:[#allocation28_spill] sm:$0xff] %v7723_v19  ;;  %vm670_vm5 = vcmp.gt.f32.partialorder %v616_v33, 0.0  ;;  %v702_v20 = vmul.f32 0.2, %v616_v33  ;;  %v6312_v28 = vpop.f32.mrb[28].mxu0 }
 0x123   : > { %9165 = vst [vmem:[#allocation29_spill] sm:$0xff] %v7728_v53  ;;  %v7733_v38 = vld [vmem:[#allocation2 + $0xc7] sm:$0xff]  ;;  %v1018_v43 = vand.u32 15, %v838_v12  ;;  %v735_v6 = vsel %vm671_vm6, %v621_v44, %v703_v51  ;;  %v631_v8 = vadd.f32 %v6312_v28, %v7320_v40  ;;  %v625_v35 = vpop.f32.mrb[29].mxu0  ;;  %v840_v27 = vadd.s32 208, %v7324_v47  ;;  %v7744_v42 = vld [vmem:[#allocation2 + $0xd0] sm:$0xff] }
 0x124   : > { %9166 = vst [vmem:[#allocation30_spill] sm:$0xff] %v7733_v38  ;;  %6499 = vmatmul.mubr.msk.f32.gmra.mrb[4].mxu1 %vm9038_vm1, %v7733_v38  ;;  %808 = vst.msk [vmem:[#allocation2 + $0xf8] sm:$0xff] %vm9038_vm1, %v735_v6  ;;  %v734_v19 = vsel %vm670_vm5, %v616_v33, %v702_v20  ;;  %v626_v49 = vadd.f32 %v7320_v40, %v625_v35  ;;  %v7746_v51 = vld [vmem:[#allocation2 + $0xcf] sm:$0xff]  ;;  %v997_v44 = vand.u32 15, %v7718_v23  ;;  %v7750_v12 = vadd.s32 184, %v7324_v47  ;;  %v7755_v6 = vld [vmem:[#allocation2 + $0xd8] sm:$0xff] }
 0x125   : > { %9167 = vst [vmem:[#allocation31_spill] sm:$0xff] %v7744_v42  ;;  %9168 = vst [vmem:[#allocation32_spill] sm:$0xff] %v7746_v51  ;;  %vm673_vm6 = vcmp.gt.f32.partialorder %v631_v8, 0.0  ;;  %v705_v28 = vmul.f32 0.2, %v631_v8  ;;  %6354 = vmatprep.mubr.msk.f32.mxu0 %vm9038_vm1, %v7744_v42  ;;  %v2518_v33 = vsel %vm7713_vm15, %v7746_v51, 0.0 }
 0x126   : > { %807 = vst.msk [vmem:[#allocation2 + $0xf0] sm:$0xff] %vm9038_vm1, %v734_v19  ;;  %9169 = vst [vmem:[#allocation33_spill] sm:$0xff] %v7755_v6  ;;  %v7760_v35 = vld [vmem:[#allocation2 + $0xc9] sm:$0xff]  ;;  %vm672_vm5 = vcmp.gt.f32.partialorder %v626_v49, 0.0  ;;  %v704_v23 = vmul.f32 0.2, %v626_v49  ;;  %6355 = vmatmul.mubr.msk.f32.gmra.mrb[56].mxu0 %vm9038_vm1, %v7755_v6  ;;  %6501 = vmatprep.mubr.msk.f32.mxu1 %vm9038_vm1, %v2518_v33 }
 0x127   : > { %9170 = vst [vmem:[#allocation34_spill] sm:$0xff] %v7760_v35  ;;  %v6315_v20 = vpop.f32.mrb[30].mxu0  ;;  %v7765_v19 = vld [vmem:[#allocation2 + $0xd7] sm:$0xff]  ;;  %vm7767_vm2 = vcmp.ge.s32.totalorder %v1018_v43, 1  ;;  %v9171_v0 = vmov 0  ;;  %v737_v53 = vsel %vm673_vm6, %v631_v8, %v705_v28  ;;  %v1032_v51 = vand.u32 15, %v840_v27 }
 0x128   : > { %v9172_v0 = vsel %vm7767_vm2, 4294967295, %v9171_v0  ;;  %v641_v34 = vadd.f32 %v6315_v20, %v7320_v40  ;;  %v635_v42 = vpop.f32.mrb[31].mxu0  ;;  %6502 = vmatmul.mubr.msk.f32.gmra.mrb[6].mxu1 %vm9038_vm1, %v7765_v19  ;;  %810 = vst.msk [vmem:[#allocation2 + $0x108] sm:$0xff] %vm9038_vm1, %v737_v53  ;;  %v736_v33 = vsel %vm672_vm5, %v626_v49, %v704_v23  ;;  %v7779_v38 = vld [vmem:[#allocation2 + $0xe0] sm:$0xff]  ;;  %v842_v8 = vadd.s32 224, %v7324_v47  ;;  %v7788_v20 = vld [vmem:[#allocation2 + $0xe8] sm:$0xff] }
 0x129   : > { %v636_v43 = vadd.f32 %v7320_v40, %v635_v42  ;;  %9173 = vst [vmem:[#allocation35_spill] sm:$0xff] %v7779_v38  ;;  %v7781_v41 = vld [vmem:[#allocation2 + $0xdf] sm:$0xff]  ;;  %v839_v28 = vadd.s32 200, %v7324_v47  ;;  %809 = vst.msk [vmem:[#allocation2 + $0x100] sm:$0xff] %vm9038_vm1, %v736_v33  ;;  %6357 = vmatprep.mubr.msk.f32.mxu0 %vm9038_vm1, %v7779_v38  ;;  %v7798_v49 = vld [vmem:[#allocation2 + $0xe7] sm:$0xff]  ;;  %vm7800_vm12 = vcmp.le.s32.totalorder %v997_v44, 14 }
 0x12a   : > { %vm675_vm6 = vcmp.gt.f32.partialorder %v641_v34, 0.0  ;;  %v707_v27 = vmul.f32 0.2, %v641_v34  ;;  %9174 = vst [vmem:[#allocation36_spill] sm:$0xff] %v7788_v20  ;;  %v2520_v40 = vsel %vm7767_vm2, %v7781_v41, 0.0  ;;  %v7793_v42 = vld [vmem:[#allocation2 + $0xd9] sm:$0xff]  ;;  %6358 = vmatmul.mubr.msk.f32.gmra.mrb[58].mxu0 %vm9038_vm1, %v7788_v20 }
 0x12b   : > { %9175 = vst [vmem:[#allocation37_spill] sm:$0xff] %v7793_v42  ;;  %vm674_vm5 = vcmp.gt.f32.partialorder %v636_v43, 0.0  ;;  %v706_v53 = vmul.f32 0.2, %v636_v43  ;;  %6504 = vmatprep.mubr.msk.f32.mxu1 %vm9038_vm1, %v2520_v40  ;;  %v9176_v23 = vmov 0  ;;  %v1011_v33 = vand.u32 15, %v7750_v12 }
 0x12c   : > { %v9177_v23 = vsel %vm7800_vm12, 4294967295, %v9176_v23  ;;  %v739_v6 = vsel %vm675_vm6, %v641_v34, %v707_v27  ;;  %6505 = vmatmul.mubr.msk.f32.gmra.mrb[8].mxu1 %vm9038_vm1, %v7798_v49  ;;  %v850_v35 = vand.u32 15, %v7324_v47  ;;  %v843_v63 = vadd.s32 232, %v7324_v47  ;;  %v7825_v40 = vld [vmem:[#allocation2 + $0xf8] sm:$0xff]  ;;  %v3718_v59 = vld [vmem:[#allocation2 + $0xcf] sm:$0xff] }
 0x12d   : > { %9178 = vst [vmem:[#allocation38_spill] sm:$0xff] %v9177_v23  ;;  %812 = vst.msk [vmem:[#allocation2 + $0x118] sm:$0xff] %vm9038_vm1, %v739_v6  ;;  %v738_v44 = vsel %vm674_vm5, %v636_v43, %v706_v53  ;;  %v7813_v20 = vld [vmem:[#allocation2 + $0xf0] sm:$0xff]  ;;  %vm7815_vm11 = vcmp.ge.s32.totalorder %v1032_v51, 1  ;;  %v9179_v38 = vmov 0  ;;  %v1046_v12 = vand.u32 15, %v842_v8 }
 0x12e   : > { %v9180_v38 = vsel %vm7815_vm11, 4294967295, %v9179_v38  ;;  %v7819_v34 = vld [vmem:[#allocation2 + $0xef] sm:$0xff]  ;;  %v844_v27 = vadd.s32 240, %v7324_v47  ;;  %811 = vst.msk [vmem:[#allocation2 + $0x110] sm:$0xff] %vm9038_vm1, %v738_v44  ;;  %6360 = vmatprep.mubr.msk.f32.mxu0 %vm9038_vm1, %v7813_v20  ;;  %9181 = vst [vmem:[#allocation39_spill] sm:$0xff] %v7825_v40  ;;  %v1025_v43 = vand.u32 15, %v839_v28 }
 0x12f   : > { %v2522_v6 = vsel %vm7815_vm11, %v7819_v34, 0.0  ;;  %v1294_v51 = vld [vmem:[#allocation2 + $0xf] sm:$0xff]  ;;  %v841_v53 = vadd.s32 216, %v7324_v47  ;;  %6361 = vmatmul.mubr.msk.f32.gmra.mrb[60].mxu0 %vm9038_vm1, %v7825_v40  ;;  %v7836_v8 = vld [vmem:[#allocation2 + $0xf7] sm:$0xff]  ;;  %vm7838_vm6 = vcmp.le.s32.totalorder %v1011_v33, 14  ;;  %v9184_v44 = vmov 0 }
 0x130   : > { %v7831_v42 = vld [vmem:[#allocation2 + $0xe9] sm:$0xff]  ;;  %6507 = vmatprep.mubr.msk.f32.mxu1 %vm9038_vm1, %v2522_v6  ;;  %9183 = vst [vmem:[#allocation41_spill] sm:$0xff] %v7836_v8  ;;  %v9185_v44 = vsel %vm7838_vm6, 4294967295, %v9184_v44  ;;  %vm7844_vm5 = vcmp.ge.s32.totalorder %v850_v35, 1  ;;  %v9187_v28 = vmov 0  ;;  %v1053_v47 = vand.u32 15, %v843_v63 }
 0x131   : > { %9182 = vst [vmem:[#allocation40_spill] sm:$0xff] %v7831_v42  ;;  %9186 = vst [vmem:[#allocation42_spill] sm:$0xff] %v9185_v44  ;;  %6508 = vmatmul.mubr.msk.f32.gmra.mrb[10].mxu1 %vm9038_vm1, %v7836_v8  ;;  %v9188_v28 = vsel %vm7844_vm5, 4294967295, %v9187_v28  ;;  %v7851_v40 = vld [vmem:[#allocation2 + $0x100] sm:$0xff]  ;;  %vm7853_vm12 = vcmp.ge.s32.totalorder %v1046_v12, 1  ;;  %v9190_v6 = vmov 0 }
 0x132   : > { %9189 = vst [vmem:[#allocation43_spill] sm:$0xff] %v9188_v28  ;;  %v9191_v6 = vsel %vm7853_vm12, 4294967295, %v9190_v6  ;;  %v7857_v33 = vld [vmem:[#allocation2 + $0xff] sm:$0xff]  ;;  %v1326_v8 = vsel %vm7844_vm5, %v1294_v51, 0.0  ;;  %v1060_v35 = vand.u32 15, %v844_v27  ;;  %6363 = vmatprep.mubr.msk.f32.mxu0 %vm9038_vm1, %v7851_v40  ;;  %v7863_v63 = vld [vmem:[#allocation2 + $0x108] sm:$0xff] }
 0x133   : > { %9192 = vst [vmem:[#allocation44_spill] sm:$0xff] %v7863_v63  ;;  %v2524_v23 = vsel %vm7853_vm12, %v7857_v33, 0.0  ;;  %vm7868_vm6 = vcmp.le.s32.totalorder %v1025_v43, 14  ;;  %v9193_v12 = vmov 0  ;;  %v1039_v42 = vand.u32 15, %v841_v53  ;;  %v7872_v44 = vld [vmem:[#allocation2 + $0xf9] sm:$0xff]  ;;  %6364 = vmatmul.mubr.msk.f32.gmra.mrb[62].mxu0 %vm9038_vm1, %v7863_v63 }
 0x134   : > { %v9194_v12 = vsel %vm7868_vm6, 4294967295, %v9193_v12  ;;  %9196 = vst [vmem:[#allocation46_spill] sm:$0xff] %v7872_v44  ;;  %6510 = vmatprep.mubr.msk.f32.mxu1 %vm9038_vm1, %v2524_v23  ;;  %v7880_v51 = vld [vmem:[#allocation2 + $0x107] sm:$0xff]  ;;  %6368 = vmatprep.mubr.msk.f32.mxu0 %vm9038_vm1, %v1326_v8  ;;  %v1295_v53 = vld [vmem:[#allocation2 + $0x17] sm:$0xff]  ;;  %v7888_v28 = vld [vmem:[#allocation2 + $0x1f] sm:$0xff]  ;;  %vm7890_vm5 = vcmp.le.s32.totalorder %v1053_v47, 14 }
 0x135   : > { %9195 = vst [vmem:[#allocation45_spill] sm:$0xff] %v9194_v12  ;;  %6511 = vmatmul.mubr.msk.f32.gmra.mrb[12].mxu1 %vm9038_vm1, %v7880_v51  ;;  %v9197_v27 = vmov 0  ;;  %v7894_v63 = vld [vmem:[#allocation2 + $0x119] sm:$0xff]  ;;  %vm7896_vm11 = vcmp.ge.s32.totalorder %v1060_v35, 1  ;;  %v9201_v23 = vmov 0  ;;  %v7900_v12 = vld [vmem:[#allocation2 + $0x10f] sm:$0xff] }
 0x136   : > { %v9198_v27 = vsel %vm7890_vm5, 4294967295, %v9197_v27  ;;  %9200 = vst [vmem:[#allocation48_spill] sm:$0xff] %v7894_v63  ;;  %v9202_v23 = vsel %vm7896_vm11, 4294967295, %v9201_v23  ;;  %v2526_v8 = vsel %vm7896_vm11, %v7900_v12, 0.0  ;;  %vm7908_vm1 = vcmp.le.s32.totalorder %v1039_v42, 14  ;;  %v7912_v44 = vld [vmem:[#allocation2 + $0x109] sm:$0xff] }
 0x137   : > { %9199 = vst [vmem:[#allocation47_spill] sm:$0xff] %v9198_v27  ;;  %v9203_v47 = vmov 0  ;;  %vm9206_vm6 = vcmask 31744   ;;  %v1328_v43 = vsel %vm7356_vm10, %v7888_v28, 0.0  ;;  %v7922_v63 = vld [vmem:[#allocation2 + $0x117] sm:$0xff]  ;;  %v9417_v39 = vsel %vm7391_vm3, %v7480_v46, 0.0 }
 0x138   : > { %v9204_v47 = vsel %vm7908_vm1, 4294967295, %v9203_v47  ;;  %6369 = vmatmul.mubr.msk.f32.vlgmr.msra.gmra.mrb[32].mxu0 %vm9206_vm6, %v1295_v53  ;;  %vm9207_vm2 = vmmov %vm9206_vm6  ;;  %v7934_v53 = vld [vmem:[#allocation2 + $0x27] sm:$0xff]  ;;  %v9333_v42 = vld [vmem:[#allocation17_spill] sm:$0xff]  ;;  %v9423_v50 = vsel %vm7421_vm7, %v7520_v25, 0.0  ;;  %v9428_v2 = vsel %vm7460_vm13, %v7556_v29, 0.0  ;;  %v9434_v26 = vsel %vm7498_vm9, %v7595_v9, 0.0 }
 0x139   : > { %9205 = vst [vmem:[#allocation49_spill] sm:$0xff] %v9204_v47  ;;  %6513 = vmatprep.mubr.msk.f32.mxu1 %vm9207_vm2, %v2526_v8  ;;  %vm9208_vm5 = vmmov %vm9207_vm2  ;;  %v7946_v8 = vld [vmem:[%s8931_s3 + $0x18] sm:$0xf]  ;;  %v3716_v1 = vld [vmem:[#allocation2 + $0xbf] sm:$0xff] }
 0x13a   : > { %6371 = vmatprep.mubr.msk.f32.mxu0 %vm9208_vm5, %v1328_v43  ;;  %vm9209_vm11 = vmmov %vm9207_vm2  ;;  %v1330_v43 = vsel %vm7383_vm14, %v7369_v32, 0.0 }
 0x13b   : > { %6514 = vmatmul.mubr.msk.f32.gmra.mrb[14].mxu1 %vm9209_vm11, %v7922_v63  ;;  %vm9210_vm12 = vmmov %vm9207_vm2  ;;  %vm9211_vm2 = vcmask 1043456  }
 0x13c   : > { %6518 = vmatprep.mubr.msk.f32.mxu1 %vm9210_vm12, %v7349_v14  ;;  %6417 = vmatpush3.msk.msra.mxu0 %vm9211_vm2, %v7335_v62  ;;  %vm9212_vm6 = vmmov %vm9211_vm2  ;;  %v1332_v62 = vsel %vm7391_vm3, %v7406_v56, 0.0  ;;  %v7969_v14 = vld [vmem:[#allocation2 + $0x47] sm:$0xff] }
 0x13d   : > { %6466 = vmatprep.subr.msk.mxu0 %vm9212_vm6, %v7299_v37  ;;  %vm9213_vm10 = vmmov %vm9208_vm5  ;;  %v7955_v37 = vld [vmem:[#allocation2 + $0x37] sm:$0xff] }
 0x13e   : > { %6372 = vmatmul.mubr.msk.f32.gmra.mrb[34].mxu0 %vm9213_vm10, %v7934_v53  ;;  %vm9214_vm11 = vmmov %vm9208_vm5 }
 0x13f   : > { %6374 = vmatprep.mubr.msk.f32.mxu0 %vm9214_vm11, %v1330_v43  ;;  %vm9215_vm12 = vmmov %vm9208_vm5 }
 0x140   : > { %6519 = vmatmul.mubr.msk.f32.vlgmr.msra.gmra.mrb[16].mxu1 %vm9215_vm12, %v7354_v17  ;;  %vm9216_vm5 = vmmov %vm9211_vm2  ;;  %v1334_v17 = vsel %vm7421_vm7, %v7444_v15, 0.0 }
 0x141   : > { %6567 = vmatpush3.msk.msra.mxu1 %vm9216_vm5, %v7637_v57  ;;  %vm9217_vm2 = vmmov %vm9213_vm10  ;;  %v9253_v57 = vld [vmem:[#allocation21_spill] sm:$0xff] }
 0x142   : > { %6521 = vmatprep.mubr.msk.f32.mxu1 %vm9217_vm2, %v7367_v31  ;;  %vm9218_vm10 = vmmov %vm9216_vm5  ;;  %v7981_v31 = vld [vmem:[#allocation2 + $0x57] sm:$0xff] }
 0x143   : > { %6616 = vmatprep.subr.msk.mxu1 %vm9218_vm10, %v7946_v8  ;;  %vm9219_vm6 = vmmov %vm9217_vm2 }
 0x144   : > { %6375 = vmatmul.mubr.msk.f32.gmra.mrb[36].mxu0 %vm9219_vm6, %v7955_v37  ;;  %vm9220_vm11 = vmmov %vm9217_vm2 }
 0x145   : > { %6377 = vmatprep.mubr.msk.f32.mxu0 %vm9220_vm11, %v1332_v62  ;;  %vm9221_vm12 = vmmov %vm9217_vm2  ;;  %v9261_v62 = vld [vmem:[#allocation28_spill] sm:$0xff] }
 0x146   : > { %6522 = vmatmul.mubr.msk.f32.gmra.mrb[18].mxu1 %vm9221_vm12, %v7381_v36  ;;  %vm9222_vm5 = vmmov %vm9217_vm2  ;;  %v1336_v36 = vsel %vm7460_vm13, %v7480_v46, 0.0 }
 0x147   : > { %6524 = vmatprep.mubr.msk.f32.mxu1 %vm9222_vm5, %v7404_v55  ;;  %vm9223_vm10 = vmmov %vm9217_vm2  ;;  %v7993_v55 = vld [vmem:[#allocation2 + $0x67] sm:$0xff] }
 0x148   : > { %6378 = vmatmul.mubr.msk.f32.gmra.mrb[38].mxu0 %vm9217_vm2, %v7969_v14  ;;  %vm9224_vm6 = vmmov %vm9217_vm2 }
 0x149   : > { %6380 = vmatprep.mubr.msk.f32.mxu0 %vm9223_vm10, %v1334_v17  ;;  %vm9225_vm11 = vmmov %vm9217_vm2  ;;  %v9263_v17 = vld [vmem:[#allocation31_spill] sm:$0xff] }
 0x14a   : > { %6525 = vmatmul.mubr.msk.f32.gmra.mrb[20].mxu1 %vm9224_vm6, %v7415_v60  ;;  %vm9226_vm12 = vmmov %vm9217_vm2  ;;  %v1338_v60 = vsel %vm7498_vm9, %v7520_v25, 0.0 }
 0x14b   : > { %6527 = vmatprep.mubr.msk.f32.mxu1 %vm9225_vm11, %v7442_v13  ;;  %vm9227_vm5 = vmmov %vm9217_vm2  ;;  %v8005_v13 = vld [vmem:[#allocation2 + $0x77] sm:$0xff] }
 0x14c   : > { %6381 = vmatmul.mubr.msk.f32.gmra.mrb[40].mxu0 %vm9226_vm12, %v7981_v31  ;;  %vm9228_vm10 = vmmov %vm9217_vm2 }
 0x14d   : > { %6383 = vmatprep.mubr.msk.f32.mxu0 %vm9227_vm5, %v1336_v36  ;;  %vm9229_vm6 = vmmov %vm9217_vm2 }
 0x14e   : > { %6528 = vmatmul.mubr.msk.f32.gmra.mrb[22].mxu1 %vm9217_vm2, %v7453_v21  ;;  %vm9230_vm11 = vmmov %vm9217_vm2  ;;  %v1340_v21 = vsel %vm7536_vm0, %v7556_v29, 0.0 }
 0x14f   : > { %6530 = vmatprep.mubr.msk.f32.mxu1 %vm9228_vm10, %v7478_v45  ;;  %vm9231_vm12 = vmmov %vm9217_vm2  ;;  %v8017_v45 = vld [vmem:[#allocation2 + $0x87] sm:$0xff] }
 0x150   : > { %6384 = vmatmul.mubr.msk.f32.gmra.mrb[42].mxu0 %vm9229_vm6, %v7993_v55  ;;  %vm9232_vm5 = vmmov %vm9217_vm2 }
 0x151   : > { %6386 = vmatprep.mubr.msk.f32.mxu0 %vm9230_vm11, %v1338_v60  ;;  %vm9233_vm10 = vmmov %vm9217_vm2  ;;  %v9267_v60 = vld [vmem:[#allocation33_spill] sm:$0xff] }
 0x152   : > { %6531 = vmatmul.mubr.msk.f32.gmra.mrb[24].mxu1 %vm9231_vm12, %v7491_v54  ;;  %vm9234_vm6 = vmmov %vm9217_vm2  ;;  %v1342_v54 = vsel %vm7573_vm8, %v7595_v9, 0.0 }
 0x153   : > { %6533 = vmatprep.mubr.msk.f32.mxu1 %vm9232_vm5, %v7518_v24  ;;  %vm9235_vm11 = vmmov %vm9217_vm2  ;;  %v8029_v24 = vld [vmem:[#allocation2 + $0x97] sm:$0xff] }
 0x154   : > { %6387 = vmatmul.mubr.msk.f32.gmra.mrb[44].mxu0 %vm9217_vm2, %v8005_v13  ;;  %vm9236_vm12 = vmmov %vm9217_vm2 }
 0x155   : > { %6389 = vmatprep.mubr.msk.f32.mxu0 %vm9233_vm10, %v1340_v21  ;;  %vm9237_vm5 = vmmov %vm9217_vm2  ;;  %v9269_v21 = vld [vmem:[#allocation35_spill] sm:$0xff] }
 0x156   : > { %6534 = vmatmul.mubr.msk.f32.gmra.mrb[26].mxu1 %vm9234_vm6, %v7529_v30  ;;  %vm9238_vm10 = vmmov %vm9217_vm2 }
 0x157   : > { %6536 = vmatprep.mubr.msk.f32.mxu1 %vm9235_vm11, %v7554_v5  ;;  %vm9239_vm6 = vmmov %vm9217_vm2  ;;  %vm9240_vm11 = vnez %v9140_v11  ;;  %v9248_v5 = vld [vmem:[#allocation23_spill] sm:$0xff]  ;;  %v3722_v11 = vld [vmem:[#allocation2 + $0xef] sm:$0xff] }
 0x158   : > { %6390 = vmatmul.mubr.msk.f32.gmra.mrb[46].mxu0 %vm9236_vm12, %v8017_v45  ;;  %v1344_v30 = vsel %vm9240_vm11, %v7631_v58, 0.0  ;;  %vm9241_vm12 = vmmov %vm9217_vm2  ;;  %v9246_v58 = vld [vmem:[#allocation20_spill] sm:$0xff] }
 0x159   : > { %6392 = vmatprep.mubr.msk.f32.mxu0 %vm9237_vm5, %v1342_v54  ;;  %vm9242_vm8 = vmmov %vm9217_vm2 }
 0x15a   : > { %6537 = vmatmul.mubr.msk.f32.gmra.mrb[28].mxu1 %vm9217_vm2, %v7567_v22  ;;  %vm9243_vm5 = vmmov %vm9217_vm2  ;;  %v9250_v22 = vld [vmem:[#allocation26_spill] sm:$0xff] }
 0x15b   : > { %6539 = vmatprep.mubr.msk.f32.mxu1 %vm9238_vm10, %v7593_v10  ;;  %v1346_v10 = vsel %vm7675_vm4, %v7673_v4, 0.0  ;;  %vm9244_vm10 = vmmov %vm9217_vm2  ;;  %v9256_v4 = vld [vmem:[#allocation30_spill] sm:$0xff] }
 0x15c   : > { %6393 = vmatmul.mubr.msk.f32.gmra.mrb[48].mxu0 %vm9239_vm6, %v8029_v24  ;;  %vm9245_vm6 = vmmov %vm9217_vm2 }
 0x15d   : > { %6395 = vmatprep.mubr.msk.f32.mxu0 %vm9241_vm12, %v1344_v30  ;;  %vm9247_vm12 = vmmov %vm9217_vm2 }
 0x15e   : > { %6540 = vmatmul.mubr.msk.f32.gmra.mrb[30].mxu1 %vm9242_vm8, %v7604_v3  ;;  %vm9249_vm8 = vmmov %vm9217_vm2  ;;  %v1348_v3 = vsel %vm7713_vm15, %v9250_v22, 0.0 }
 0x15f   : > { %6542 = vmatprep.mubr.msk.f32.mxu1 %vm9243_vm5, %v7629_v7  ;;  %v9251_v7 = vld [vmem:[#allocation27_spill] sm:$0xff]  ;;  %vm9252_vm5 = vmmov %vm9217_vm2 }
 0x160   : > { %6396 = vmatmul.mubr.msk.f32.gmra.mrb[50].mxu0 %vm9217_vm2, %v7655_v61  ;;  %v9254_v61 = vld [vmem:[#allocation25_spill] sm:$0xff]  ;;  %vm9262_vm4 = vmmov %vm9217_vm2 }
 0x161   : > { %6398 = vmatprep.mubr.msk.f32.mxu0 %vm9244_vm10, %v1346_v10  ;;  %vm9255_vm10 = vmmov %vm9217_vm2  ;;  %v9283_v10 = vld [vmem:[#allocation44_spill] sm:$0xff] }
 0x162   : > { %6543 = vmatmul.mubr.msk.f32.gmra.mrb[0].mxu1 %vm9245_vm6, %v7645_v52  ;;  %vm9257_vm6 = vmmov %vm9217_vm2  ;;  %v9258_v52 = vld [vmem:[#allocation32_spill] sm:$0xff] }
 0x163   : > { %6545 = vmatprep.mubr.msk.f32.mxu1 %vm9247_vm12, %v9246_v58  ;;  %vm9259_vm12 = vnez %v9172_v0  ;;  %vm9268_vm15 = vmmov %vm9217_vm2  ;;  %v8105_v58 = vld [vmem:[#allocation2 + $0x110] sm:$0xff] }
 0x164   : > { %6399 = vmatmul.mubr.msk.f32.gmra.mrb[52].mxu0 %vm9249_vm8, %v9248_v5  ;;  %v1350_v43 = vsel %vm9259_vm12, %v9258_v52, 0.0  ;;  %vm9260_vm8 = vmmov %vm9217_vm2  ;;  %v9287_v5 = vld [vmem:[#allocation4_spill] sm:$0xff] }
 0x165   : > { %6401 = vmatprep.mubr.msk.f32.mxu0 %vm9252_vm5, %v1348_v3  ;;  %vm9264_vm5 = vmmov %vm9217_vm2  ;;  %v8113_v3 = vld [vmem:[#allocation2 + $0x118] sm:$0xff] }
 0x166   : > { %6546 = vmatmul.mubr.msk.f32.gmra.mrb[2].mxu1 %vm9217_vm2, %v9253_v57  ;;  %vm9274_vm12 = vmmov %vm9217_vm2  ;;  %v2045_v57 = vld [vmem:[#allocation2 + $0x29] sm:$0xff] }
 0x167   : > { %6548 = vmatprep.mubr.msk.f32.mxu1 %vm9255_vm10, %v9254_v61  ;;  %vm9265_vm10 = vnez %v9180_v38  ;;  %v7083_v61 = vld [vmem:[%s8931_s3 + $0xc] sm:$0xf] }
 0x168   : > { %6402 = vmatmul.mubr.msk.f32.gmra.mrb[54].mxu0 %vm9257_vm6, %v9256_v4  ;;  %v1352_v36 = vsel %vm9265_vm10, %v7781_v41, 0.0  ;;  %vm9266_vm6 = vmmov %vm9217_vm2  ;;  %v9276_v41 = vld [vmem:[#allocation41_spill] sm:$0xff] }
 0x169   : > { %6404 = vmatprep.mubr.msk.f32.mxu0 %vm9260_vm8, %v1350_v43  ;;  %vm9270_vm8 = vmmov %vm9217_vm2  ;;  %v9293_v4 = vld [vmem:[#allocation5_spill] sm:$0xff] }
 0x16a   : > { %6549 = vmatmul.mubr.msk.f32.gmra.mrb[4].mxu1 %vm9262_vm4, %v9261_v62  ;;  %vm9271_vm4 = vmmov %vm9217_vm2  ;;  %v8126_v43 = vld [vmem:[#allocation2 + $0x31] sm:$0xff] }
 0x16b   : > { %6551 = vmatprep.mubr.msk.f32.mxu1 %vm9264_vm5, %v9263_v17  ;;  %vm9272_vm5 = vnez %v9191_v6  ;;  %vm9281_vm10 = vmmov %vm9217_vm2  ;;  %v8133_v17 = vld [vmem:[%s8931_s3 + $0x1c] sm:$0xf] }
 0x16c   : > { %6405 = vmatmul.mubr.msk.f32.gmra.mrb[56].mxu0 %vm9217_vm2, %v7765_v19  ;;  %v1354_v54 = vsel %vm9272_vm5, %v7819_v34, 0.0  ;;  %v9273_v19 = vld [vmem:[#allocation36_spill] sm:$0xff]  ;;  %v2042_v34 = vld [vmem:[#allocation2 + $0x11] sm:$0xff]  ;;  %vm9303_vm5 = vmmov %vm9217_vm2 }
 0x16d   : > { %6407 = vmatprep.mubr.msk.f32.mxu0 %vm9266_vm6, %v1352_v36  ;;  %vm9275_vm6 = vmmov %vm9217_vm2  ;;  %v9299_v36 = vld [vmem:[#allocation6_spill] sm:$0xff] }
 0x16e   : > { %6552 = vmatmul.mubr.msk.f32.gmra.mrb[6].mxu1 %vm9268_vm15, %v9267_v60  ;;  %vm9277_vm15 = vmmov %vm9217_vm2  ;;  %v9300_v60 = vld [vmem:[#allocation7_spill] sm:$0xff] }
 0x16f   : > { %6554 = vmatprep.mubr.msk.f32.mxu1 %vm9270_vm8, %v9269_v21  ;;  %vm9278_vm8 = vnez %v9202_v23 }
 0x170   : > { %6408 = vmatmul.mubr.msk.f32.gmra.mrb[58].mxu0 %vm9271_vm4, %v7798_v49  ;;  %v1356_v30 = vsel %vm9278_vm8, %v7857_v33, 0.0  ;;  %vm9279_vm4 = vmmov %vm9217_vm2  ;;  %v9280_v49 = vld [vmem:[#allocation39_spill] sm:$0xff] }
 0x171   : > { %6410 = vmatprep.mubr.msk.f32.mxu0 %vm9217_vm2, %v1354_v54  ;;  %vm9289_vm8 = vmmov %vm9217_vm2  ;;  %v8148_v54 = vld [vmem:[#allocation2 + $0x41] sm:$0xff] }
 0x172   : > { %6555 = vmatmul.mubr.msk.f32.gmra.mrb[8].mxu1 %vm9274_vm12, %v9273_v19  ;;  %vm9282_vm12 = vmmov %vm9217_vm2 }
 0x173   : > { %6557 = vmatprep.mubr.msk.f32.mxu1 %vm9275_vm6, %v7813_v20  ;;  %v2043_v20 = vld [vmem:[#allocation2 + $0x19] sm:$0xff]  ;;  %vm9284_vm6 = vmmov %vm9217_vm2 }
 0x174   : > { %6411 = vmatmul.mubr.msk.f32.gmra.mrb[60].mxu0 %vm9277_vm15, %v9276_v41  ;;  %vm9285_vm15 = vmmov %vm9217_vm2  ;;  %v9307_v41 = vld [vmem:[#allocation9_spill] sm:$0xff] }
 0x175   : > { %6413 = vmatprep.mubr.msk.f32.mxu0 %vm9279_vm4, %v1356_v30  ;;  %vm9286_vm4 = vmmov %vm9217_vm2 }
 0x176   : > { %6558 = vmatmul.mubr.msk.f32.gmra.mrb[10].mxu1 %vm9281_vm10, %v9280_v49  ;;  %vm9288_vm10 = vnez %v9287_v5  ;;  %v8162_v49 = vld [vmem:[#allocation2 + $0x51] sm:$0xff] }
 0x177   : > { %6560 = vmatprep.mubr.msk.f32.mxu1 %vm9217_vm2, %v7851_v40  ;;  %v2075_v22 = vsel %vm9288_vm10, %v2043_v20, 0.0  ;;  %v2044_v40 = vld [vmem:[#allocation2 + $0x21] sm:$0xff]  ;;  %v3309_v62 = vsel %vm9288_vm10, %v2045_v57, 0.0  ;;  %v9312_v20 = vld [vmem:[#allocation10_spill] sm:$0xff] }
 0x178   : > { %6414 = vmatmul.mubr.msk.f32.gmra.mrb[62].mxu0 %vm9282_vm12, %v7880_v51  ;;  %vm9290_vm12 = vmmov %vm9217_vm2 }
 0x179   : > { %6418 = vmatprep.mubr.msk.f32.mxu0 %vm9285_vm15, %v2042_v34  ;;  %vm9292_vm15 = vcmask 1043456  }
 0x17a   : > { %6561 = vmatmul.mubr.msk.f32.gmra.mrb[12].mxu1 %vm9284_vm6, %v9283_v10  ;;  %vm9291_vm6 = vmmov %vm9217_vm2  ;;  %v9313_v10 = vld [vmem:[#allocation11_spill] sm:$0xff] }
 0x17b   : > { %6563 = vmatprep.mubr.msk.f32.mxu1 %vm9286_vm4, %v8105_v58  ;;  %vm9294_vm4 = vnez %v9293_v4 }
 0x17c   : > { %6419 = vmatmul.mubr.msk.f32.vlgmr.msra.gmra.mrb[32].mxu0 %vm9289_vm8, %v2075_v22  ;;  %v2077_v52 = vsel %vm9294_vm4, %v2045_v57, 0.0  ;;  %vm9295_vm8 = vmmov %vm9217_vm2  ;;  %v3311_v19 = vsel %vm9294_vm4, %v9299_v36, 0.0 }
 0x17d   : > { %6421 = vmatprep.mubr.msk.f32.mxu0 %vm9217_vm2, %v2044_v40  ;;  %6467 = vmatpush3.msk.msra.mxu0 %vm9292_vm15, %v7083_v61  ;;  %vm9315_vm4 = vmmov %vm9217_vm2  ;;  %v9318_v61 = vld [vmem:[#allocation12_spill] sm:$0xff] }
 0x17e   : > { %6564 = vmatmul.mubr.msk.f32.gmra.mrb[14].mxu1 %vm9290_vm12, %v8113_v3  ;;  %vm9296_vm12 = vmmov %vm9217_vm2 }
 0x17f   : > { %6568 = vmatprep.mubr.msk.f32.mxu1 %vm9291_vm6, %v2044_v40  ;;  %vm9297_vm6 = vmmov %vm9292_vm15  ;;  %v8176_v40 = vld [vmem:[#allocation2 + $0x61] sm:$0xff] }
 0x180   : > { %6422 = vmatmul.mubr.msk.f32.gmra.mrb[34].mxu0 %vm9295_vm8, %v2077_v52  ;;  %vm9298_vm15 = vmmov %vm9217_vm2  ;;  %vm9301_vm8 = vnez %v9300_v60  ;;  %v9319_v52 = vld [vmem:[#allocation13_spill] sm:$0xff] }
 0x181   : > { %6424 = vmatprep.mubr.msk.f32.mxu0 %vm9217_vm2, %v8126_v43  ;;  %v2079_v21 = vsel %vm9301_vm8, %v9299_v36, 0.0  ;;  %vm9302_vm10 = vmmov %vm9297_vm6 }
 0x182   : > { %6569 = vmatmul.mubr.msk.f32.vlgmr.msra.gmra.mrb[16].mxu1 %vm9296_vm12, %v3309_v62  ;;  %vm9304_vm12 = vmmov %vm9217_vm2 }
 0x183   : > { %6617 = vmatpush3.msk.msra.mxu1 %vm9297_vm6, %v7946_v8  ;;  %6571 = vmatprep.mubr.msk.f32.mxu1 %vm9298_vm15, %v8126_v43  ;;  %vm9305_vm6 = vmmov %vm9217_vm2  ;;  %v9306_v8 = vld [vmem:[#allocation8_spill] sm:$0xff]  ;;  %vm9308_vm15 = vnez %v9307_v41 }
 0x184   : > { %6666 = vmatprep.subr.msk.mxu1 %vm9302_vm10, %v8133_v17  ;;  %6425 = vmatmul.mubr.msk.f32.gmra.mrb[36].mxu0 %vm9303_vm5, %v2079_v21  ;;  %v2081_v30 = vsel %vm9308_vm15, %v9306_v8, 0.0  ;;  %vm9309_vm10 = vmmov %vm9217_vm2  ;;  %v3313_v34 = vsel %vm9301_vm8, %v9306_v8, 0.0  ;;  %v3315_v57 = vsel %vm9308_vm15, %v9312_v20, 0.0  ;;  %v8190_v21 = vld [vmem:[#allocation2 + $0x71] sm:$0xff] }
 0x185   : > { %6427 = vmatprep.mubr.msk.f32.mxu0 %vm9217_vm2, %v8148_v54  ;;  %vm9310_vm5 = vmmov %vm9217_vm2 }
 0x186   : > { %6572 = vmatmul.mubr.msk.f32.gmra.mrb[18].mxu1 %vm9304_vm12, %v3311_v19  ;;  %vm9311_vm12 = vmmov %vm9217_vm2 }
 0x187   : > { %6574 = vmatprep.mubr.msk.f32.mxu1 %vm9305_vm6, %v8148_v54  ;;  %vm9314_vm6 = vnez %v9313_v10  ;;  %vm9321_vm8 = vmmov %vm9217_vm2 }
 0x188   : > { %6428 = vmatmul.mubr.msk.f32.gmra.mrb[38].mxu0 %vm9309_vm10, %v2081_v30  ;;  %v2083_v22 = vsel %vm9314_vm6, %v9312_v20, 0.0  ;;  %vm9316_vm10 = vmmov %vm9217_vm2  ;;  %v3317_v19 = vsel %vm9314_vm6, %v9318_v61, 0.0  ;;  %v9325_v30 = vld [vmem:[#allocation14_spill] sm:$0xff] }
 0x189   : > { %6430 = vmatprep.mubr.msk.f32.mxu0 %vm9310_vm5, %v8162_v49  ;;  %vm9317_vm5 = vmmov %vm9217_vm2 }
 0x18a   : > { %6575 = vmatmul.mubr.msk.f32.gmra.mrb[20].mxu1 %vm9217_vm2, %v3313_v34  ;;  %v9326_v34 = vld [vmem:[#allocation15_spill] sm:$0xff] }
 0x18b   : > { %6577 = vmatprep.mubr.msk.f32.mxu1 %vm9311_vm12, %v8162_v49  ;;  %vm9320_vm12 = vnez %v9319_v52 }
 0x18c   : > { %6431 = vmatmul.mubr.msk.f32.gmra.mrb[40].mxu0 %vm9315_vm4, %v2083_v22  ;;  %v2085_v62 = vsel %vm9320_vm12, %v9318_v61, 0.0  ;;  %vm9322_vm4 = vmmov %vm9217_vm2 }
 0x18d   : > { %6433 = vmatprep.mubr.msk.f32.mxu0 %vm9316_vm10, %v8176_v40  ;;  %vm9323_vm10 = vmmov %vm9217_vm2 }
 0x18e   : > { %6578 = vmatmul.mubr.msk.f32.gmra.mrb[22].mxu1 %vm9317_vm5, %v3315_v57  ;;  %vm9324_vm5 = vmmov %vm9217_vm2  ;;  %v8204_v57 = vld [vmem:[#allocation2 + $0x81] sm:$0xff] }
 0x18f   : > { %6580 = vmatprep.mubr.msk.f32.mxu1 %vm9217_vm2, %v8176_v40  ;;  %vm9327_vm2 = vnez %v9326_v34  ;;  %vm9328_vm15 = vmmov %vm9322_vm4  ;;  %9329 = vst [vmem:[#allocation20_spill] sm:$0xff] %v8204_v57 }
 0x190   : > { %6434 = vmatmul.mubr.msk.f32.gmra.mrb[42].mxu0 %vm9321_vm8, %v2085_v62  ;;  %v2087_v22 = vsel %vm9327_vm2, %v9325_v30, 0.0  ;;  %v3319_v62 = vsel %vm9320_vm12, %v9325_v30, 0.0  ;;  %vm9330_vm8 = vmmov %vm9322_vm4 }
 0x191   : > { %6436 = vmatprep.mubr.msk.f32.mxu0 %vm9322_vm4, %v8190_v21  ;;  %vm9335_vm6 = vmmov %vm9322_vm4 }
 0x192   : > { %6581 = vmatmul.mubr.msk.f32.gmra.mrb[24].mxu1 %vm9323_vm10, %v3317_v19  ;;  %vm9331_vm10 = vmmov %vm9322_vm4  ;;  %v9332_v19 = vld [vmem:[#allocation16_spill] sm:$0xff] }
 0x193   : > { %6583 = vmatprep.mubr.msk.f32.mxu1 %vm9324_vm5, %v8190_v21  ;;  %vm9334_vm5 = vnez %v9333_v42  ;;  %v3321_v52 = vsel %vm9327_vm2, %v9332_v19, 0.0  ;;  %vm9342_vm12 = vmmov %vm9322_vm4 }
 0x194   : > { %6437 = vmatmul.mubr.msk.f32.gmra.mrb[44].mxu0 %vm9328_vm15, %v2087_v22  ;;  %v2089_v35 = vsel %vm9334_vm5, %v9332_v19, 0.0  ;;  %v8218_v22 = vld [vmem:[#allocation2 + $0x91] sm:$0xff]  ;;  %vm9337_vm15 = vmmov %vm9322_vm4 }
 0x195   : > { %6439 = vmatprep.mubr.msk.f32.mxu0 %vm9330_vm8, %v8204_v57  ;;  %9336 = vst [vmem:[#allocation23_spill] sm:$0xff] %v8218_v22  ;;  %vm9338_vm8 = vmmov %vm9322_vm4 }
 0x196   : > { %6584 = vmatmul.mubr.msk.f32.gmra.mrb[26].mxu1 %vm9322_vm4, %v3319_v62  ;;  %v9339_v62 = vld [vmem:[#allocation18_spill] sm:$0xff] }
 0x197   : > { %6586 = vmatprep.mubr.msk.f32.mxu1 %vm9331_vm10, %v8204_v57  ;;  %v9340_v57 = vld [vmem:[#allocation19_spill] sm:$0xff]  ;;  %v3323_v34 = vsel %vm9334_vm5, %v9339_v62, 0.0 }
 0x198   : > { %6440 = vmatmul.mubr.msk.f32.gmra.mrb[46].mxu0 %vm9335_vm6, %v2089_v35  ;;  %vm9341_vm10 = vnez %v9340_v57  ;;  %v8232_v35 = vld [vmem:[#allocation2 + $0xa1] sm:$0xff]  ;;  %vm9344_vm6 = vmmov %vm9322_vm4 }
 0x199   : > { %6442 = vmatprep.mubr.msk.f32.mxu0 %vm9337_vm15, %v8218_v22  ;;  %v2091_v30 = vsel %vm9341_vm10, %v9339_v62, 0.0  ;;  %9343 = vst [vmem:[#allocation26_spill] sm:$0xff] %v8232_v35  ;;  %vm9345_vm15 = vmmov %vm9322_vm4 }
 0x19a   : > { %6587 = vmatmul.mubr.msk.f32.gmra.mrb[28].mxu1 %vm9338_vm8, %v3321_v52  ;;  %vm9346_vm8 = vmmov %vm9322_vm4  ;;  %v9347_v52 = vld [vmem:[#allocation22_spill] sm:$0xff] }
 0x19b   : > { %6589 = vmatprep.mubr.msk.f32.mxu1 %vm9322_vm4, %v8218_v22  ;;  %v9348_v22 = vld [vmem:[#allocation24_spill] sm:$0xff]  ;;  %vm9350_vm2 = vmmov %vm9344_vm6  ;;  %v3325_v42 = vsel %vm9341_vm10, %v9347_v52, 0.0 }
 0x19c   : > { %6443 = vmatmul.mubr.msk.f32.gmra.mrb[48].mxu0 %vm9342_vm12, %v2091_v30  ;;  %vm9349_vm4 = vnez %v9348_v22  ;;  %v8246_v30 = vld [vmem:[#allocation2 + $0xb1] sm:$0xff]  ;;  %vm9352_vm12 = vmmov %vm9350_vm2 }
 0x19d   : > { %6445 = vmatprep.mubr.msk.f32.mxu0 %vm9344_vm6, %v8232_v35  ;;  %v2093_v19 = vsel %vm9349_vm4, %v9347_v52, 0.0  ;;  %9351 = vst [vmem:[#allocation27_spill] sm:$0xff] %v8246_v30  ;;  %vm9353_vm6 = vmmov %vm9350_vm2 }
 0x19e   : > { %6590 = vmatmul.mubr.msk.f32.gmra.mrb[30].mxu1 %vm9345_vm15, %v3323_v34  ;;  %vm9354_vm15 = vmmov %vm9350_vm2  ;;  %v9355_v34 = vld [vmem:[#allocation29_spill] sm:$0xff] }
 0x19f   : > { %6592 = vmatprep.mubr.msk.f32.mxu1 %vm9346_vm8, %v8232_v35  ;;  %v9356_v35 = vld [vmem:[#allocation38_spill] sm:$0xff]  ;;  %vm9358_vm5 = vmmov %vm9350_vm2  ;;  %v3327_v57 = vsel %vm9349_vm4, %v9355_v34, 0.0 }
 0x1a0   : > { %6446 = vmatmul.mubr.msk.f32.gmra.mrb[50].mxu0 %vm9350_vm2, %v2093_v19  ;;  %vm9357_vm8 = vnez %v9356_v35  ;;  %v8260_v19 = vld [vmem:[#allocation2 + $0xc1] sm:$0xff]  ;;  %vm9365_vm10 = vmmov %vm9350_vm2 }
 0x1a1   : > { %6448 = vmatprep.mubr.msk.f32.mxu0 %vm9352_vm12, %v8246_v30  ;;  %v2095_v62 = vsel %vm9357_vm8, %v9355_v34, 0.0  ;;  %9359 = vst [vmem:[#allocation21_spill] sm:$0xff] %v8260_v19  ;;  %vm9360_vm12 = vmmov %vm9350_vm2 }
 0x1a2   : > { %6593 = vmatmul.mubr.msk.f32.gmra.mrb[0].mxu1 %vm9353_vm6, %v3325_v42  ;;  %vm9361_vm6 = vmmov %vm9350_vm2  ;;  %v9362_v42 = vld [vmem:[#allocation34_spill] sm:$0xff] }
 0x1a3   : > { %6595 = vmatprep.mubr.msk.f32.mxu1 %vm9354_vm15, %v8246_v30  ;;  %v9363_v30 = vld [vmem:[#allocation42_spill] sm:$0xff]  ;;  %v3329_v22 = vsel %vm9357_vm8, %v9362_v42, 0.0  ;;  %vm9372_vm4 = vmmov %vm9350_vm2 }
 0x1a4   : > { %6449 = vmatmul.mubr.msk.f32.gmra.mrb[52].mxu0 %vm9358_vm5, %v2095_v62  ;;  %vm9364_vm15 = vnez %v9363_v30  ;;  %v8274_v62 = vld [vmem:[#allocation2 + $0xd1] sm:$0xff]  ;;  %vm9367_vm5 = vmmov %vm9350_vm2 }
 0x1a5   : > { %6451 = vmatprep.mubr.msk.f32.mxu0 %vm9350_vm2, %v8260_v19  ;;  %v2097_v52 = vsel %vm9364_vm15, %v9362_v42, 0.0  ;;  %9366 = vst [vmem:[#allocation25_spill] sm:$0xff] %v8274_v62  ;;  %v9374_v42 = vld [vmem:[#allocation3_spill] sm:$0xff] }
 0x1a6   : > { %6596 = vmatmul.mubr.msk.f32.gmra.mrb[2].mxu1 %vm9360_vm12, %v3327_v57  ;;  %vm9368_vm12 = vmmov %vm9350_vm2  ;;  %v9369_v57 = vld [vmem:[#allocation37_spill] sm:$0xff]  ;;  %v845_v10 = vadd.s32 248, %v9374_v42 }
 0x1a7   : > { %6598 = vmatprep.mubr.msk.f32.mxu1 %vm9361_vm6, %v8260_v19  ;;  %v9370_v19 = vld [vmem:[#allocation45_spill] sm:$0xff]  ;;  %v3331_v35 = vsel %vm9364_vm15, %v9369_v57, 0.0 }
 0x1a8   : > { %6452 = vmatmul.mubr.msk.f32.gmra.mrb[54].mxu0 %vm9365_vm10, %v2097_v52  ;;  %vm9371_vm6 = vnez %v9370_v19  ;;  %v8288_v52 = vld [vmem:[#allocation2 + $0xe1] sm:$0xff]  ;;  %vm9375_vm10 = vmmov %vm9350_vm2  ;;  %v1067_v30 = vand.u32 15, %v845_v10 }
 0x1a9   : > { %6454 = vmatprep.mubr.msk.f32.mxu0 %vm9367_vm5, %v8274_v62  ;;  %v2099_v34 = vsel %vm9371_vm6, %v9369_v57, 0.0  ;;  %9373 = vst [vmem:[#allocation30_spill] sm:$0xff] %v8288_v52  ;;  %vm9376_vm5 = vmmov %vm9350_vm2 }
 0x1aa   : > { %6599 = vmatmul.mubr.msk.f32.gmra.mrb[4].mxu1 %vm9350_vm2, %v3329_v22  ;;  %v9377_v22 = vld [vmem:[#allocation40_spill] sm:$0xff] }
 0x1ab   : > { %6601 = vmatprep.mubr.msk.f32.mxu1 %vm9368_vm12, %v8274_v62  ;;  %v8303_v62 = vld [vmem:[#allocation2 + $0xf1] sm:$0xff]  ;;  %v3333_v42 = vsel %vm9371_vm6, %v9377_v22, 0.0  ;;  %vm9379_vm12 = vmmov %vm9350_vm2  ;;  %vm8322_vm6 = vcmp.le.s32.totalorder %v1067_v30, 14 }
 0x1ac   : > { %6455 = vmatmul.mubr.msk.f32.gmra.mrb[56].mxu0 %vm9372_vm4, %v2099_v34  ;;  %v2101_v34 = vsel %vm7908_vm1, %v9377_v22, 0.0  ;;  %vm9378_vm4 = vmmov %vm9350_vm2 }
 0x1ad   : > { %6457 = vmatprep.mubr.msk.f32.mxu0 %vm9375_vm10, %v8288_v52  ;;  %vm9380_vm10 = vmmov %vm9350_vm2 }
 0x1ae   : > { %6602 = vmatmul.mubr.msk.f32.gmra.mrb[6].mxu1 %vm9376_vm5, %v3331_v35  ;;  %vm9381_vm5 = vmmov %vm9350_vm2  ;;  %v9382_v35 = vld [vmem:[#allocation46_spill] sm:$0xff] }
 0x1af   : > { %6604 = vmatprep.mubr.msk.f32.mxu1 %vm9350_vm2, %v8288_v52  ;;  %vm9383_vm2 = vnez %v9198_v27  ;;  %v3335_v10 = vsel %vm7908_vm1, %v9382_v35, 0.0  ;;  %vm9394_vm15 = vmmov %vm9378_vm4 }
 0x1b0   : > { %6458 = vmatmul.mubr.msk.f32.gmra.mrb[58].mxu0 %vm9378_vm4, %v2101_v34  ;;  %v2103_v52 = vsel %vm9383_vm2, %v9382_v35, 0.0  ;;  %v8317_v34 = vld [vmem:[#allocation2 + $0x101] sm:$0xff]  ;;  %v3337_v47 = vsel %vm9383_vm2, %v7912_v44, 0.0 }
 0x1b1   : > { %6460 = vmatprep.mubr.msk.f32.mxu0 %vm9379_vm12, %v8303_v62  ;;  %vm9386_vm12 = vmmov %vm9378_vm4 }
 0x1b2   : > { %6605 = vmatmul.mubr.msk.f32.gmra.mrb[8].mxu1 %vm9380_vm10, %v3333_v42  ;;  %vm9387_vm10 = vmmov %vm9378_vm4  ;;  %v9389_v42 = vld [vmem:[#allocation43_spill] sm:$0xff] }
 0x1b3   : > { %6607 = vmatprep.mubr.msk.f32.mxu1 %vm9381_vm5, %v8303_v62  ;;  %vm9388_vm5 = vmmov %vm9378_vm4  ;;  %vm9390_vm1 = vnez %v9389_v42  ;;  %v9409_v42 = vsel %vm7391_vm3, %v7444_v15, 0.0 }
 0x1b4   : > { %6461 = vmatmul.mubr.msk.f32.gmra.mrb[60].mxu0 %vm9378_vm4, %v2103_v52  ;;  %v2105_v52 = vsel %vm8322_vm6, %v7912_v44, 0.0  ;;  %v2496_v30 = vsel %vm9390_vm1, %v7888_v28, 0.0 }
 0x1b5   : > { %6463 = vmatprep.mubr.msk.f32.mxu0 %vm9386_vm12, %v8317_v34  ;;  %vm9391_vm12 = vmmov %vm9378_vm4 }
 0x1b6   : > { %6608 = vmatmul.mubr.msk.f32.gmra.mrb[10].mxu1 %vm9387_vm10, %v3335_v10  ;;  %vm9392_vm10 = vmmov %vm9378_vm4  ;;  %v8343_v10 = vld [vmem:[#allocation2 + $0x111] sm:$0xff] }
 0x1b7   : > { %6610 = vmatprep.mubr.msk.f32.mxu1 %vm9388_vm5, %v8317_v34  ;;  %vm9393_vm5 = vmmov %vm9378_vm4 }
 0x1b8   : > { %6464 = vmatmul.mubr.msk.f32.gmra.mrb[62].mxu0 %vm9378_vm4, %v2105_v52  ;;  %v9395_v52 = vld [vmem:[#allocation48_spill] sm:$0xff]  ;;  %vm9396_vm4 = vnez %v9098_v18  ;;  %vm9398_vm2 = vmmov %vm9393_vm5  ;;  %v9411_v18 = vsel %vm7383_vm14, %v7444_v15, 0.0  ;;  %v9420_v15 = vsel %vm7460_vm13, %v7520_v25, 0.0  ;;  %v9431_v25 = vsel %vm7536_vm0, %v7595_v9, 0.0 }
 0x1b9   : > { %6468 = vmatprep.mubr.msk.f32.mxu0 %vm9391_vm12, %v2496_v30  ;;  %v3339_v28 = vsel %vm8322_vm6, %v9395_v52, 0.0  ;;  %v9397_v27 = vsel %vm9396_vm4, %v7369_v32, 0.0  ;;  %vm9399_vm12 = vmmov %vm9398_vm2  ;;  %v9402_v32 = vsel %vm7383_vm14, %v7406_v56, 0.0 }
 0x1ba   : > { %6611 = vmatmul.mubr.msk.f32.gmra.mrb[12].mxu1 %vm9392_vm10, %v3337_v47  ;;  %v7084_v47 = vld [vmem:[#allocation2 + $0x2f] sm:$0xff]  ;;  %vm9400_vm10 = vmmov %vm9398_vm2 }
 0x1bb   : > { %6613 = vmatprep.mubr.msk.f32.mxu1 %vm9393_vm5, %v8343_v10  ;;  %v3730_v30 = vsel %vm9390_vm1, %v7084_v47, 0.0  ;;  %vm9403_vm5 = vmmov %vm9398_vm2  ;;  %vm9404_vm1 = vcmask 1043456   ;;  %v3721_v47 = vld [vmem:[#allocation2 + $0xe7] sm:$0xff] }
 0x1bc   : > { %6469 = vmatmul.mubr.msk.f32.vlgmr.msra.gmra.mrb[32].mxu0 %vm9394_vm15, %v7934_v53  ;;  %vm9401_vm15 = vmmov %vm9398_vm2  ;;  %v8366_v53 = vld [vmem:[%s8931_s3 + $0x20] sm:$0xf] }
 0x1bd   : > { %6471 = vmatprep.mubr.msk.f32.mxu0 %vm9398_vm2, %v9397_v27  ;;  %v9405_v27 = vsel %vm9396_vm4, %v7406_v56, 0.0  ;;  %vm9412_vm4 = vmmov %vm9398_vm2  ;;  %v9414_v56 = vsel %vm7421_vm7, %v7480_v46, 0.0  ;;  %v9426_v46 = vsel %vm7498_vm9, %v7556_v29, 0.0  ;;  %v3712_v29 = vld [vmem:[#allocation2 + $0x9f] sm:$0xff]  ;;  %vm9440_vm9 = vnez %v9135_v48 }
 0x1be   : > { %6614 = vmatmul.mubr.msk.f32.gmra.mrb[14].mxu1 %vm9399_vm12, %v3339_v28  ;;  %vm9406_vm12 = vmmov %vm9398_vm2  ;;  %v3720_v48 = vld [vmem:[#allocation2 + $0xdf] sm:$0xff] }
 0x1bf   : > { %6618 = vmatprep.mubr.msk.f32.mxu1 %vm9400_vm10, %v3730_v30  ;;  %vm9407_vm10 = vmmov %vm9404_vm1 }
 0x1c0   : > { %6472 = vmatmul.mubr.msk.f32.gmra.mrb[34].mxu0 %vm9401_vm15, %v7955_v37  ;;  %vm9408_vm15 = vmmov %vm9398_vm2 }
 0x1c1   : > { %6474 = vmatprep.mubr.msk.f32.mxu0 %vm9398_vm2, %v9402_v32 }
 0x1c2   : > { %6619 = vmatmul.mubr.msk.f32.vlgmr.msra.gmra.mrb[16].mxu1 %vm9403_vm5, %v7955_v37  ;;  %vm9410_vm5 = vmmov %vm9398_vm2  ;;  %v3744_v37 = vsel %vm7536_vm0, %v3712_v29, 0.0  ;;  %v4137_v29 = vld [vmem:[#allocation2 + $0xb8] sm:$0xff] }
 0x1c3   : > { %6667 = vmatpush3.msk.msra.mxu1 %vm9404_vm1, %v8133_v17  ;;  %6621 = vmatprep.mubr.msk.f32.mxu1 %vm9406_vm12, %v9405_v27  ;;  %vm9413_vm1 = vmmov %vm9398_vm2  ;;  %v3719_v17 = vld [vmem:[#allocation2 + $0xd7] sm:$0xff] }
 0x1c4   : > { %6716 = vmatprep.subr.msk.mxu1 %vm9407_vm10, %v8366_v53  ;;  %6475 = vmatmul.mubr.msk.f32.gmra.mrb[36].mxu0 %vm9408_vm15, %v7969_v14  ;;  %vm9415_vm12 = vmmov %vm9413_vm1  ;;  %v4120_v27 = vld [vmem:[#allocation2 + $0x30] sm:$0xff] }
 0x1c5   : > { %6477 = vmatprep.mubr.msk.f32.mxu0 %vm9398_vm2, %v9409_v42  ;;  %vm9416_vm10 = vmmov %vm9413_vm1  ;;  %v4126_v42 = vld [vmem:[#allocation2 + $0x60] sm:$0xff] }
 0x1c6   : > { %6622 = vmatmul.mubr.msk.f32.gmra.mrb[18].mxu1 %vm9410_vm5, %v7969_v14  ;;  %vm9418_vm15 = vmmov %vm9413_vm1  ;;  %v3714_v14 = vld [vmem:[#allocation2 + $0xaf] sm:$0xff] }
 0x1c7   : > { %6624 = vmatprep.mubr.msk.f32.mxu1 %vm9412_vm4, %v9411_v18  ;;  %vm9419_vm14 = vmmov %vm9413_vm1  ;;  %v3746_v9 = vsel %vm9440_vm9, %v3714_v14, 0.0  ;;  %vm9453_vm9 = vnez %v9180_v38  ;;  %v4127_v18 = vld [vmem:[#allocation2 + $0x68] sm:$0xff] }
 0x1c8   : > { %6478 = vmatmul.mubr.msk.f32.gmra.mrb[38].mxu0 %vm9413_vm1, %v7981_v31  ;;  %vm9421_vm2 = vmmov %vm9413_vm1  ;;  %v9454_v32 = vsel %vm9453_vm9, %v7857_v33, 0.0  ;;  %v3729_v33 = vld [vmem:[#allocation2 + $0x127] sm:$0xff] }
 0x1c9   : > { %6480 = vmatprep.mubr.msk.f32.mxu0 %vm9415_vm12, %v9414_v56  ;;  %vm9422_vm5 = vmmov %vm9413_vm1  ;;  %v4128_v56 = vld [vmem:[#allocation2 + $0x70] sm:$0xff]  ;;  %v4139_v14 = vld [vmem:[#allocation2 + $0xc8] sm:$0xff] }
 0x1ca   : > { %6625 = vmatmul.mubr.msk.f32.gmra.mrb[20].mxu1 %vm9416_vm10, %v7981_v31  ;;  %vm9424_vm4 = vmmov %vm9413_vm1  ;;  %v3713_v31 = vld [vmem:[#allocation2 + $0xa7] sm:$0xff] }
 0x1cb   : > { %6627 = vmatprep.mubr.msk.f32.mxu1 %vm9418_vm15, %v9417_v39  ;;  %vm9425_vm3 = vmmov %vm9413_vm1  ;;  %v4130_v39 = vld [vmem:[#allocation2 + $0x80] sm:$0xff] }
 0x1cc   : > { %6481 = vmatmul.mubr.msk.f32.gmra.mrb[40].mxu0 %vm9419_vm14, %v7993_v55  ;;  %vm9427_vm12 = vmmov %vm9413_vm1 }
 0x1cd   : > { %6483 = vmatprep.mubr.msk.f32.mxu0 %vm9421_vm2, %v9420_v15  ;;  %vm9429_vm10 = vmmov %vm9413_vm1  ;;  %v4131_v15 = vld [vmem:[#allocation2 + $0x88] sm:$0xff] }
 0x1ce   : > { %6628 = vmatmul.mubr.msk.f32.gmra.mrb[22].mxu1 %vm9422_vm5, %v7993_v55  ;;  %vm9430_vm7 = vmmov %vm9413_vm1  ;;  %v3715_v55 = vld [vmem:[#allocation2 + $0xb7] sm:$0xff] }
 0x1cf   : > { %6630 = vmatprep.mubr.msk.f32.mxu1 %vm9424_vm4, %v9423_v50  ;;  %vm9432_vm15 = vmmov %vm9413_vm1  ;;  %v4132_v50 = vld [vmem:[#allocation2 + $0x90] sm:$0xff] }
 0x1d0   : > { %6484 = vmatmul.mubr.msk.f32.gmra.mrb[42].mxu0 %vm9425_vm3, %v8005_v13  ;;  %vm9433_vm14 = vmmov %vm9413_vm1 }
 0x1d1   : > { %6486 = vmatprep.mubr.msk.f32.mxu0 %vm9413_vm1, %v9426_v46  ;;  %vm9435_vm2 = vmmov %vm9413_vm1  ;;  %v4133_v46 = vld [vmem:[#allocation2 + $0x98] sm:$0xff] }
 0x1d2   : > { %6631 = vmatmul.mubr.msk.f32.gmra.mrb[24].mxu1 %vm9427_vm12, %v8005_v13  ;;  %vm9436_vm13 = vmmov %vm9413_vm1  ;;  %v3748_v13 = vsel %vm9240_vm11, %v3716_v1, 0.0  ;;  %v4142_v1 = vld [vmem:[#allocation2 + $0xe0] sm:$0xff] }
 0x1d3   : > { %6633 = vmatprep.mubr.msk.f32.mxu1 %vm9429_vm10, %v9428_v2  ;;  %vm9437_vm5 = vmmov %vm9413_vm1  ;;  %v4134_v2 = vld [vmem:[#allocation2 + $0xa0] sm:$0xff] }
 0x1d4   : > { %6487 = vmatmul.mubr.msk.f32.gmra.mrb[44].mxu0 %vm9430_vm7, %v8017_v45  ;;  %vm9438_vm4 = vmmov %vm9413_vm1  ;;  %vm9444_vm7 = vnez %v9152_v16  ;;  %v3723_v16 = vld [vmem:[#allocation2 + $0xf7] sm:$0xff] }
 0x1d5   : > { %6489 = vmatprep.mubr.msk.f32.mxu0 %vm9432_vm15, %v9431_v25  ;;  %vm9439_vm3 = vmmov %vm9413_vm1  ;;  %v4135_v25 = vld [vmem:[#allocation2 + $0xa8] sm:$0xff] }
 0x1d6   : > { %6634 = vmatmul.mubr.msk.f32.gmra.mrb[26].mxu1 %vm9433_vm14, %v8017_v45  ;;  %vm9441_vm12 = vmmov %vm9413_vm1  ;;  %v3717_v45 = vld [vmem:[#allocation2 + $0xc7] sm:$0xff] }
 0x1d7   : > { %6636 = vmatprep.mubr.msk.f32.mxu1 %vm9435_vm2, %v9434_v26  ;;  %vm9442_vm10 = vmmov %vm9413_vm1  ;;  %vm9447_vm2 = vnez %v9251_v7  ;;  %v4136_v26 = vld [vmem:[#allocation2 + $0xb0] sm:$0xff] }
 0x1d8   : > { %6490 = vmatmul.mubr.msk.f32.gmra.mrb[46].mxu0 %vm9436_vm13, %v8029_v24  ;;  %vm9443_vm0 = vmmov %vm9413_vm1  ;;  %v3752_v28 = vsel %vm9447_vm2, %v3720_v48, 0.0  ;;  %v4147_v48 = vld [vmem:[#allocation2 + $0x108] sm:$0xff] }
 0x1d9   : > { %vm9445_vm15 = vmmov %vm9443_vm0 }
 0x1da   : > { %6637 = vmatmul.mubr.msk.f32.gmra.mrb[28].mxu1 %vm9437_vm5, %v8029_v24  ;;  %v3750_v24 = vsel %vm9444_vm7, %v3718_v59, 0.0  ;;  %vm9446_vm14 = vmmov %vm9443_vm0  ;;  %vm9450_vm5 = vnez %v9172_v0  ;;  %v3728_v0 = vld [vmem:[#allocation2 + $0x11f] sm:$0xff]  ;;  %v4144_v59 = vld [vmem:[#allocation2 + $0xf0] sm:$0xff] }
 0x1db   : > { %6639 = vmatprep.mubr.msk.f32.mxu1 %vm9438_vm4, %v3744_v37  ;;  %vm9448_vm13 = vmmov %vm9443_vm0  ;;  %v3754_v30 = vsel %vm9450_vm5, %v3722_v11, 0.0  ;;  %vm9465_vm5 = vcmask 1043456   ;;  %v4138_v37 = vld [vmem:[#allocation2 + $0xc0] sm:$0xff] }
 0x1dc   : > { %vm9449_vm11 = vmmov %vm9443_vm0 }
 0x1dd   : > { %vm9451_vm4 = vmmov %vm9443_vm0 }
 0x1de   : > { %6640 = vmatmul.mubr.msk.f32.gmra.mrb[30].mxu1 %vm9439_vm3, %v3713_v31  ;;  %vm9452_vm3 = vmmov %vm9443_vm0  ;;  %v4140_v31 = vld [vmem:[#allocation2 + $0xd0] sm:$0xff] }
 0x1df   : > { %6642 = vmatprep.mubr.msk.f32.mxu1 %vm9413_vm1, %v3746_v9  ;;  %vm9455_vm1 = vmmov %vm9443_vm0  ;;  %v4141_v9 = vld [vmem:[#allocation2 + $0xd8] sm:$0xff] }
 0x1e0   : > { %vm9459_vm7 = vmmov %vm9443_vm0 }
 0x1e1   : > { %vm9462_vm2 = vmmov %vm9443_vm0 }
 0x1e2   : > { %6643 = vmatmul.mubr.msk.f32.gmra.mrb[0].mxu1 %vm9441_vm12, %v3715_v55  ;;  %vm9456_vm12 = vmmov %vm9443_vm0  ;;  %v4143_v55 = vld [vmem:[#allocation2 + $0xe8] sm:$0xff] }
 0x1e3   : > { %6645 = vmatprep.mubr.msk.f32.mxu1 %vm9442_vm10, %v3748_v13  ;;  %vm9457_vm10 = vnez %v9191_v6  ;;  %v4121_v6 = vld [vmem:[#allocation2 + $0x38] sm:$0xff]  ;;  %vm9468_vm9 = vmmov %vm9443_vm0  ;;  %v5067_v13 = vld [vmem:[%s8933_s5] sm:$0xf] }
 0x1e4   : > { %v9458_v7 = vsel %vm9457_vm10, %v7900_v12, 0.0  ;;  %v4122_v12 = vld [vmem:[#allocation2 + $0x40] sm:$0xff]  ;;  %vm9471_vm10 = vmmov %vm9443_vm0 }
 0x1e6   : > { %6646 = vmatmul.mubr.msk.f32.gmra.mrb[2].mxu1 %vm9443_vm0, %v3717_v45  ;;  %v4145_v45 = vld [vmem:[#allocation2 + $0xf8] sm:$0xff] }
 0x1e7   : > { %6648 = vmatprep.mubr.msk.f32.mxu1 %vm9445_vm15, %v3750_v24  ;;  %vm9460_vm15 = vnez %v9202_v23  ;;  %v4125_v23 = vld [vmem:[#allocation2 + $0x58] sm:$0xff]  ;;  %v4146_v24 = vld [vmem:[#allocation2 + $0x100] sm:$0xff] }
 0x1e8   : > { %v3760_v38 = vsel %vm9460_vm15, %v3728_v0, 0.0  ;;  %vm9473_vm15 = vmmov %vm9443_vm0  ;;  %v9541_v0 = vld [vmem:[#allocation29_spill] sm:$0xff] }
 0x1ea   : > { %6649 = vmatmul.mubr.msk.f32.gmra.mrb[4].mxu1 %vm9446_vm14, %v3719_v17  ;;  %vm9461_vm14 = vmmov %vm9443_vm0  ;;  %v4150_v17 = vld [vmem:[#allocation2 + $0x120] sm:$0xff] }
 0x1eb   : > { %6651 = vmatprep.mubr.msk.f32.mxu1 %vm9448_vm13, %v3752_v28  ;;  %vm9463_vm13 = vmmov %vm9443_vm0  ;;  %v4151_v28 = vld [vmem:[#allocation2 + $0x128] sm:$0xff] }
 0x1ee   : > { %6652 = vmatmul.mubr.msk.f32.gmra.mrb[6].mxu1 %vm9449_vm11, %v3721_v47  ;;  %vm9464_vm11 = vmmov %vm9443_vm0  ;;  %v9532_v47 = vld [vmem:[#allocation17_spill] sm:$0xff] }
 0x1ef   : > { %6654 = vmatprep.mubr.msk.f32.mxu1 %vm9451_vm4, %v3754_v30  ;;  %vm9466_vm4 = vmmov %vm9443_vm0  ;;  %v9534_v30 = vld [vmem:[#allocation22_spill] sm:$0xff] }
 0x1f2   : > { %6655 = vmatmul.mubr.msk.f32.gmra.mrb[8].mxu1 %vm9452_vm3, %v3723_v16  ;;  %vm9467_vm3 = vmmov %vm9443_vm0 }
 0x1f3   : > { %6657 = vmatprep.mubr.msk.f32.mxu1 %vm9455_vm1, %v9454_v32  ;;  %vm9469_vm1 = vmmov %vm9443_vm0  ;;  %v9537_v32 = vld [vmem:[#allocation27_spill] sm:$0xff] }
 0x1f6   : > { %6658 = vmatmul.mubr.msk.f32.gmra.mrb[10].mxu1 %vm9456_vm12, %v7880_v51  ;;  %v4124_v51 = vld [vmem:[#allocation2 + $0x50] sm:$0xff]  ;;  %vm9470_vm12 = vmmov %vm9443_vm0 }
 0x1f7   : > { %6660 = vmatprep.mubr.msk.f32.mxu1 %vm9443_vm0, %v9458_v7  ;;  %v9539_v7 = vld [vmem:[#allocation19_spill] sm:$0xff] }
 0x1fa   : > { %6661 = vmatmul.mubr.msk.f32.gmra.mrb[12].mxu1 %vm9459_vm7, %v7922_v63  ;;  %v4123_v63 = vld [vmem:[#allocation2 + $0x48] sm:$0xff]  ;;  %vm9472_vm7 = vmmov %vm9443_vm0 }
 0x1fb   : > { %6663 = vmatprep.mubr.msk.f32.mxu1 %vm9461_vm14, %v3760_v38  ;;  %vm9474_vm14 = vmmov %vm9443_vm0 }
 0x1fe   : > { %6664 = vmatmul.mubr.msk.f32.gmra.mrb[14].mxu1 %vm9462_vm2, %v3729_v33  ;;  %vm9475_vm2 = vmmov %vm9443_vm0  ;;  %v9544_v33 = vld [vmem:[#allocation21_spill] sm:$0xff] }
 0x1ff   : > { %6668 = vmatprep.mubr.msk.f32.mxu1 %vm9463_vm13, %v4120_v27  ;;  %vm9476_vm13 = vmmov %vm9443_vm0  ;;  %v9546_v27 = vld [vmem:[#allocation24_spill] sm:$0xff] }
 0x202   : > { %6669 = vmatmul.mubr.msk.f32.vlgmr.msra.gmra.mrb[16].mxu1 %vm9464_vm11, %v4121_v6  ;;  %vm9477_vm11 = vmmov %vm9443_vm0  ;;  %v9548_v6 = vld [vmem:[#allocation34_spill] sm:$0xff] }
 0x203   : > { %6717 = vmatpush3.msk.msra.mxu1 %vm9465_vm5, %v8366_v53  ;;  %6671 = vmatprep.mubr.msk.f32.mxu1 %vm9466_vm4, %v4122_v12  ;;  %v4129_v53 = vld [vmem:[#allocation2 + $0x78] sm:$0xff]  ;;  %vm9478_vm5 = vmmov %vm9443_vm0 }
 0x204   : > { %vm9479_vm4 = vmmov %vm9443_vm0 }
 0x206   : > { %6672 = vmatmul.mubr.msk.f32.gmra.mrb[18].mxu1 %vm9467_vm3, %v4123_v63  ;;  %vm9480_vm3 = vmmov %vm9443_vm0  ;;  %v9551_v63 = vld [vmem:[#allocation25_spill] sm:$0xff] }
 0x207   : > { %6674 = vmatprep.mubr.msk.f32.mxu1 %vm9468_vm9, %v4124_v51  ;;  %vm9481_vm9 = vmmov %vm9443_vm0 }
 0x20a   : > { %6675 = vmatmul.mubr.msk.f32.gmra.mrb[20].mxu1 %vm9469_vm1, %v4125_v23  ;;  %vm9482_vm1 = vmmov %vm9443_vm0  ;;  %v9554_v23 = vsel %vm9357_vm8, %v9369_v57, 0.0 }
 0x20b   : > { %6677 = vmatprep.mubr.msk.f32.mxu1 %vm9470_vm12, %v4126_v42  ;;  %vm9483_vm12 = vmmov %vm9443_vm0  ;;  %v9556_v42 = vld [vmem:[#allocation30_spill] sm:$0xff] }
 0x20e   : > { %6678 = vmatmul.mubr.msk.f32.gmra.mrb[22].mxu1 %vm9471_vm10, %v4127_v18  ;;  %vm9484_vm10 = vmmov %vm9443_vm0  ;;  %v9558_v18 = vld [vmem:[#allocation42_spill] sm:$0xff] }
 0x20f   : > { %6680 = vmatprep.mubr.msk.f32.mxu1 %vm9443_vm0, %v4128_v56 }
 0x212   : > { %6681 = vmatmul.mubr.msk.f32.gmra.mrb[24].mxu1 %vm9472_vm7, %v4129_v53  ;;  %vm9485_vm7 = vmmov %vm9443_vm0 }
 0x213   : > { %6683 = vmatprep.mubr.msk.f32.mxu1 %vm9473_vm15, %v4130_v39  ;;  %vm9486_vm15 = vcmask 1043456  }
 0x214   : > { %6766 = vmatprep.subr.msk.mxu0 %vm9486_vm15, %v5067_v13 }
 0x216   : > { %6684 = vmatmul.mubr.msk.f32.gmra.mrb[26].mxu1 %vm9474_vm14, %v4131_v15  ;;  %vm9487_vm14 = vmmov %vm9443_vm0  ;;  %v9563_v15 = vld [vmem:[#allocation45_spill] sm:$0xff] }
 0x217   : > { %6686 = vmatprep.mubr.msk.f32.mxu1 %vm9475_vm2, %v4132_v50  ;;  %vm9488_vm2 = vmmov %vm9486_vm15  ;;  %vm9500_vm15 = vnez %v9293_v4  ;;  %v9512_v4 = vld [vmem:[#allocation11_spill] sm:$0xff]  ;;  %vm9564_vm8 = vnez %v9563_v15 }
 0x218   : > { %6767 = vmatpush3.msk.msra.mxu0 %vm9488_vm2, %v5067_v13  ;;  %vm9503_vm2 = vmmov %vm9443_vm0  ;;  %v9565_v57 = vsel %vm9564_vm8, %v9382_v35, 0.0  ;;  %v4540_v35 = vld [vmem:[#allocation2 + $0x121] sm:$0xff] }
 0x21a   : > { %6687 = vmatmul.mubr.msk.f32.gmra.mrb[28].mxu1 %vm9476_vm13, %v4133_v46  ;;  %vm9489_vm13 = vmmov %vm9443_vm0  ;;  %v9568_v46 = vld [vmem:[#allocation49_spill] sm:$0xff] }
 0x21b   : > { %6689 = vmatprep.mubr.msk.f32.mxu1 %vm9477_vm11, %v4134_v2  ;;  %vm9490_vm11 = vmmov %vm9443_vm0 }
 0x21e   : > { %6690 = vmatmul.mubr.msk.f32.gmra.mrb[30].mxu1 %vm9478_vm5, %v4135_v25  ;;  %vm9491_vm5 = vmmov %vm9443_vm0  ;;  %v4541_v25 = vld [vmem:[#allocation2 + $0x129] sm:$0xff] }
 0x21f   : > { %6692 = vmatprep.mubr.msk.f32.mxu1 %vm9479_vm4, %v4136_v26  ;;  %vm9492_vm4 = vmmov %vm9443_vm0 }
 0x222   : > { %6693 = vmatmul.mubr.msk.f32.gmra.mrb[0].mxu1 %vm9480_vm3, %v4137_v29  ;;  %vm9493_vm3 = vmmov %vm9443_vm0 }
 0x223   : > { %6695 = vmatprep.mubr.msk.f32.mxu1 %vm9481_vm9, %v4138_v37  ;;  %vm9494_vm9 = vmmov %vm9443_vm0 }
 0x226   : > { %6696 = vmatmul.mubr.msk.f32.gmra.mrb[2].mxu1 %vm9482_vm1, %v4139_v14  ;;  %vm9495_vm1 = vmmov %vm9443_vm0 }
 0x227   : > { %6698 = vmatprep.mubr.msk.f32.mxu1 %vm9483_vm12, %v4140_v31  ;;  %vm9496_vm12 = vmmov %vm9443_vm0 }
 0x22a   : > { %6699 = vmatmul.mubr.msk.f32.gmra.mrb[4].mxu1 %vm9484_vm10, %v4141_v9  ;;  %vm9497_vm10 = vnez %v9287_v5 }
 0x22b   : > { %6701 = vmatprep.mubr.msk.f32.mxu1 %vm9443_vm0, %v4142_v1  ;;  %v9498_v11 = vsel %vm9497_vm10, %v9299_v36, 0.0  ;;  %vm9518_vm10 = vmmov %vm9443_vm0 }
 0x22e   : > { %6702 = vmatmul.mubr.msk.f32.gmra.mrb[6].mxu1 %vm9485_vm7, %v4143_v55  ;;  %vm9499_vm7 = vmmov %vm9443_vm0 }
 0x22f   : > { %6704 = vmatprep.mubr.msk.f32.mxu1 %vm9487_vm14, %v4144_v59  ;;  %vm9502_vm14 = vmmov %vm9443_vm0 }
 0x232   : > { %6705 = vmatmul.mubr.msk.f32.gmra.mrb[8].mxu1 %vm9489_vm13, %v4145_v45  ;;  %vm9504_vm13 = vnez %v9300_v60  ;;  %v9517_v60 = vld [vmem:[#allocation20_spill] sm:$0xff] }
 0x233   : > { %6707 = vmatprep.mubr.msk.f32.mxu1 %vm9490_vm11, %v4146_v24  ;;  %v9505_v5 = vsel %vm9504_vm13, %v9312_v20, 0.0  ;;  %vm9506_vm11 = vmmov %vm9443_vm0  ;;  %v9526_v20 = vld [vmem:[#allocation15_spill] sm:$0xff] }
 0x234   : > { %vm9531_vm13 = vmmov %vm9503_vm2 }
 0x236   : > { %6708 = vmatmul.mubr.msk.f32.gmra.mrb[10].mxu1 %vm9491_vm5, %v4147_v48  ;;  %vm9507_vm5 = vmmov %vm9443_vm0 }
 0x237   : > { %6710 = vmatprep.mubr.msk.f32.mxu1 %vm9492_vm4, %v8105_v58  ;;  %v9501_v58 = vsel %vm9500_vm15, %v9306_v8, 0.0  ;;  %vm9508_vm4 = vnez %v9307_v41  ;;  %v9521_v8 = vld [vmem:[#allocation16_spill] sm:$0xff]  ;;  %vm9525_vm15 = vmmov %vm9503_vm2 }
 0x23a   : > { %6711 = vmatmul.mubr.msk.f32.gmra.mrb[12].mxu1 %vm9493_vm3, %v8113_v3  ;;  %v9509_v3 = vsel %vm9508_vm4, %v9318_v61, 0.0  ;;  %vm9510_vm3 = vmmov %vm9443_vm0 }
 0x23b   : > { %6713 = vmatprep.mubr.msk.f32.mxu1 %vm9494_vm9, %v4150_v17  ;;  %vm9511_vm9 = vmmov %vm9443_vm0 }
 0x23c   : > { %vm9538_vm4 = vmmov %vm9503_vm2 }
 0x23e   : > { %6714 = vmatmul.mubr.msk.f32.gmra.mrb[14].mxu1 %vm9495_vm1, %v4151_v28  ;;  %vm9513_vm1 = vnez %v9512_v4 }
 0x23f   : > { %6718 = vmatprep.mubr.msk.f32.mxu1 %vm9496_vm12, %v8126_v43  ;;  %v9514_v43 = vld [vmem:[#allocation14_spill] sm:$0xff]  ;;  %vm9516_vm12 = vmmov %vm9443_vm0 }
 0x240   : > { %v9515_v36 = vsel %vm9513_vm1, %v9514_v43, 0.0  ;;  %vm9545_vm1 = vmmov %vm9503_vm2 }
 0x242   : > { %6719 = vmatmul.mubr.msk.f32.vlgmr.msra.gmra.mrb[16].mxu1 %vm9443_vm0, %v9498_v11 }
 0x243   : > { %6721 = vmatprep.mubr.msk.f32.mxu1 %vm9499_vm7, %v8148_v54  ;;  %v9519_v54 = vld [vmem:[#allocation13_spill] sm:$0xff]  ;;  %vm9523_vm7 = vmmov %vm9503_vm2 }
 0x244   : > { %vm9520_vm0 = vnez %v9519_v54 }
 0x245   : > { %v9522_v41 = vsel %vm9520_vm0, %v9521_v8, 0.0  ;;  %vm9552_vm0 = vmmov %vm9545_vm1 }
 0x246   : > { %6722 = vmatmul.mubr.msk.f32.gmra.mrb[18].mxu1 %vm9502_vm14, %v9501_v58  ;;  %vm9527_vm14 = vnez %v9526_v20  ;;  %vm9580_vm8 = vmmov %vm9552_vm0 }
 0x247   : > { %6724 = vmatprep.mubr.msk.f32.mxu1 %vm9503_vm2, %v8162_v49  ;;  %v9524_v49 = vld [vmem:[#allocation23_spill] sm:$0xff] }
 0x24a   : > { %6725 = vmatmul.mubr.msk.f32.gmra.mrb[20].mxu1 %vm9506_vm11, %v9505_v5  ;;  %vm9533_vm11 = vnez %v9532_v47 }
 0x24b   : > { %6727 = vmatprep.mubr.msk.f32.mxu1 %vm9507_vm5, %v8176_v40  ;;  %v9528_v40 = vld [vmem:[#allocation18_spill] sm:$0xff]  ;;  %v9535_v16 = vsel %vm9533_vm11, %v9534_v30, 0.0  ;;  %vm9536_vm5 = vmmov %vm9503_vm2 }
 0x24c   : > { %v9529_v61 = vsel %vm9527_vm14, %v9528_v40, 0.0  ;;  %vm9559_vm14 = vnez %v9558_v18  ;;  %vm9566_vm11 = vmmov %vm9552_vm0 }
 0x24d   : > { %v9560_v56 = vsel %vm9559_vm14, %v9377_v22, 0.0  ;;  %vm9579_vm14 = vmmov %vm9552_vm0 }
 0x24e   : > { %6728 = vmatmul.mubr.msk.f32.gmra.mrb[22].mxu1 %vm9510_vm3, %v9509_v3  ;;  %vm9540_vm3 = vnez %v9539_v7 }
 0x24f   : > { %6730 = vmatprep.mubr.msk.f32.mxu1 %vm9511_vm9, %v8190_v21  ;;  %v9530_v21 = vld [vmem:[#allocation26_spill] sm:$0xff]  ;;  %v9542_v38 = vsel %vm9540_vm3, %v9541_v0, 0.0  ;;  %vm9543_vm9 = vmmov %vm9503_vm2 }
 0x250   : > { %vm9571_vm3 = vmmov %vm9552_vm0 }
 0x252   : > { %6731 = vmatmul.mubr.msk.f32.gmra.mrb[24].mxu1 %vm9516_vm12, %v9515_v36  ;;  %vm9547_vm12 = vnez %v9546_v27 }
 0x253   : > { %6733 = vmatprep.mubr.msk.f32.mxu1 %vm9518_vm10, %v9517_v60  ;;  %v9549_v12 = vsel %vm9547_vm12, %v9548_v6, 0.0  ;;  %vm9550_vm10 = vmmov %vm9545_vm1 }
 0x254   : > { %vm9576_vm12 = vmmov %vm9552_vm0 }
 0x256   : > { %6734 = vmatmul.mubr.msk.f32.gmra.mrb[26].mxu1 %vm9523_vm7, %v9522_v41  ;;  %vm9555_vm7 = vmmov %vm9552_vm0 }
 0x257   : > { %6736 = vmatprep.mubr.msk.f32.mxu1 %vm9525_vm15, %v9524_v49  ;;  %vm9557_vm15 = vmmov %vm9552_vm0  ;;  %v8697_v49 = vld [vmem:[%s8932_s4] ss:$0 sm:$0xff] }
 0x25a   : > { %6737 = vmatmul.mubr.msk.f32.gmra.mrb[28].mxu1 %vm9503_vm2, %v9529_v61  ;;  %vm9561_vm2 = vmmov %vm9552_vm0 }
 0x25b   : > { %6739 = vmatprep.mubr.msk.f32.mxu1 %vm9531_vm13, %v9530_v21  ;;  %vm9562_vm13 = vmmov %vm9552_vm0 }
 0x25e   : > { %6740 = vmatmul.mubr.msk.f32.gmra.mrb[30].mxu1 %vm9536_vm5, %v9535_v16  ;;  %vm9567_vm5 = vmmov %vm9552_vm0 }
 0x25f   : > { %6742 = vmatprep.mubr.msk.f32.mxu1 %vm9538_vm4, %v9537_v32  ;;  %vm9569_vm4 = vnez %v9568_v46 }
 0x262   : > { %6743 = vmatmul.mubr.msk.f32.gmra.mrb[0].mxu1 %vm9543_vm9, %v9542_v38  ;;  %vm9572_vm9 = vmmov %vm9552_vm0 }
 0x263   : > { %6745 = vmatprep.mubr.msk.f32.mxu1 %vm9545_vm1, %v9544_v33 }
 0x266   : > { %6746 = vmatmul.mubr.msk.f32.gmra.mrb[2].mxu1 %vm9550_vm10, %v9549_v12  ;;  %vm9577_vm10 = vmmov %vm9552_vm0 }
 0x267   : > { %6748 = vmatprep.mubr.msk.f32.mxu1 %vm9552_vm0, %v9551_v63 }
 0x26a   : > { %6749 = vmatmul.mubr.msk.f32.gmra.mrb[4].mxu1 %vm9555_vm7, %v9554_v23 }
 0x26b   : > { %6751 = vmatprep.mubr.msk.f32.mxu1 %vm9557_vm15, %v9556_v42  ;;  %vm9578_vm15 = vmmov %vm9552_vm0 }
 0x26e   : > { %6752 = vmatmul.mubr.msk.f32.gmra.mrb[6].mxu1 %vm9561_vm2, %v9560_v56 }
 0x26f   : > { %6754 = vmatprep.mubr.msk.f32.mxu1 %vm9562_vm13, %v8303_v62  ;;  %v8627_v53 = vpop.f32.mrb[48].mxu0  ;;  %v9570_v62 = vsel %vm9569_vm4, %v7912_v44, 0.0  ;;  %v4573_v44 = vsel %vm8322_vm6, %v4541_v25, 0.0 }
 0x270   : > { %v8629_v39 = vpop.f32.mrb[49].mxu0 }
 0x272   : > { %6755 = vmatmul.mubr.msk.f32.gmra.mrb[8].mxu1 %vm9566_vm11, %v9565_v57  ;;  %vm9581_vm11 = vmmov %vm9552_vm0 }
 0x273   : > { %6757 = vmatprep.mubr.msk.f32.mxu1 %vm9567_vm5, %v8317_v34  ;;  %v8638_v50 = vpop.f32.mrb[50].mxu0  ;;  %v9573_v34 = vld [vmem:[#allocation47_spill] sm:$0xff] }
 0x274   : > { %v8640_v22 = vpop.f32.mrb[51].mxu0  ;;  %vm9574_vm1 = vnez %v9573_v34 }
 0x275   : > { %v9575_v29 = vsel %vm9574_vm1, %v9395_v52, 0.0 }
 0x276   : > { %6758 = vmatmul.mubr.msk.f32.gmra.mrb[10].mxu1 %vm9571_vm3, %v9570_v62  ;;  %vm9582_vm3 = vmmov %vm9552_vm0 }
 0x277   : > { %6760 = vmatprep.mubr.msk.f32.mxu1 %vm9572_vm9, %v8343_v10  ;;  %v8649_v2 = vpop.f32.mrb[52].mxu0  ;;  %vm9583_vm9 = vmmov %vm9552_vm0 }
 0x278   : > { %v8651_v26 = vpop.f32.mrb[53].mxu0 }
 0x27a   : > { %6761 = vmatmul.mubr.msk.f32.gmra.mrb[12].mxu1 %vm9576_vm12, %v9575_v29 }
 0x27b   : > { %6763 = vmatprep.mubr.msk.f32.mxu1 %vm9577_vm10, %v4540_v35  ;;  %v8661_v37 = vpop.f32.mrb[54].mxu0  ;;  %vm9584_vm10 = vmmov %vm9552_vm0 }
 0x27c   : > { %v8663_v10 = vpop.f32.mrb[55].mxu0 }
 0x27e   : > { %6764 = vmatmul.mubr.msk.f32.gmra.mrb[14].mxu1 %vm9552_vm0, %v4573_v44 }
 0x27f   : > { %v8666_v14 = vpop.f32.mrb[56].mxu0 }
 0x280   : > { %v8668_v31 = vpop.f32.mrb[57].mxu0 }
 0x283   : > { %v8670_v9 = vpop.f32.mrb[58].mxu0 }
 0x284   : > { %v8672_v52 = vpop.f32.mrb[59].mxu0 }
 0x287   : > { %v8674_v1 = vpop.f32.mrb[60].mxu0 }
 0x288   : > { %v8676_v55 = vpop.f32.mrb[61].mxu0 }
 0x28b   : > { %v8678_v19 = vpop.f32.mrb[62].mxu0 }
 0x28c   : > { %v8680_v13 = vpop.f32.mrb[63].mxu0 }
 0x28f   : > { %v6470_v59 = vpop.f32.mrb[32].mxu0 }
 0x290   : > { %v2695_v45 = vpop.f32.mrb[33].mxu0 }
 0x293   : > { %v6473_v24 = vpop.f32.mrb[34].mxu0 }
 0x294   : > { %v2705_v48 = vpop.f32.mrb[35].mxu0 }
 0x297   : > { %v6476_v17 = vpop.f32.mrb[36].mxu0 }
 0x298   : > { %v2715_v28 = vpop.f32.mrb[37].mxu0 }
 0x29b   : > { %v6479_v11 = vpop.f32.mrb[38].mxu0 }
 0x29c   : > { %v2725_v58 = vpop.f32.mrb[39].mxu0 }
 0x29f   : > { %v6482_v5 = vpop.f32.mrb[40].mxu0 }
 0x2a0   : > { %v2735_v3 = vpop.f32.mrb[41].mxu0 }
 0x2a3   : > { %v8682_v4 = vpop.f32.mrb[42].mxu0 }
 0x2a4   : > { %v8684_v43 = vpop.f32.mrb[43].mxu0 }
 0x2a7   : > { %v8686_v36 = vpop.f32.mrb[44].mxu0 }
 0x2a8   : > { %v8688_v60 = vpop.f32.mrb[45].mxu0 }
 0x2ab   : > { %v8690_v54 = vpop.f32.mrb[46].mxu0 }
 0x2ac   : > { %v8692_v8 = vpop.f32.mrb[47].mxu0 }
 0x315   : > { %v6720_v41 = vpop.f32.mrb[16].mxu1 }
 0x316   : > { %v6818_v20 = vadd.f32 %v6720_v41, %v6470_v59  ;;  %v4741_v40 = vpop.f32.mrb[17].mxu1 }
 0x317   : > { %v6819_v61 = vadd.f32 %v4741_v40, %v2695_v45 }
 0x318   : > { %v4940_v21 = vadd.f32 %v6818_v20, %v8697_v49 }
 0x319   : > { %v4939_v47 = vadd.f32 %v6819_v61, %v8697_v49  ;;  %v6723_v30 = vpop.f32.mrb[18].mxu1 }
 0x31a   : > { %v5004_v16 = vmul.f32 0.2, %v4940_v21  ;;  %v6820_v32 = vadd.f32 %v6723_v30, %v6473_v24  ;;  %v4751_v7 = vpop.f32.mrb[19].mxu1  ;;  %vm4972_vm6 = vcmp.gt.f32.partialorder %v4940_v21, 0.0 }
 0x31b   : > { %v5003_v0 = vmul.f32 0.2, %v4939_v47  ;;  %v6821_v38 = vadd.f32 %v4751_v7, %v2705_v48  ;;  %vm4971_vm7 = vcmp.gt.f32.partialorder %v4939_v47, 0.0 }
 0x31c   : > { %v4942_v33 = vadd.f32 %v6820_v32, %v8697_v49  ;;  %v5036_v63 = vsel %vm4972_vm6, %v4940_v21, %v5004_v16 }
 0x31d   : > { %v4941_v27 = vadd.f32 %v6821_v38, %v8697_v49  ;;  %v6726_v6 = vpop.f32.mrb[20].mxu1  ;;  %v5035_v12 = vsel %vm4971_vm7, %v4939_v47, %v5003_v0 }
 0x31e   : > { %v5006_v51 = vmul.f32 0.2, %v4942_v33  ;;  %v6822_v23 = vadd.f32 %v6726_v6, %v6476_v17  ;;  %v4761_v42 = vpop.f32.mrb[21].mxu1  ;;  %6768 = vmatprep.mubr.msk.f32.mxu0 %vm9578_vm15, %v5035_v12  ;;  %vm4974_vm13 = vcmp.gt.f32.partialorder %v4942_v33, 0.0  ;;  %vm9585_vm15 = vmmov %vm9552_vm0 }
 0x31f   : > { %v5005_v18 = vmul.f32 0.2, %v4941_v27  ;;  %v6823_v56 = vadd.f32 %v4761_v42, %v2715_v28  ;;  %6769 = vmatmul.mubr.msk.f32.vlgmr.msra.gmra.mrb[64].mxu0 %vm9579_vm14, %v5036_v63  ;;  %vm4973_vm2 = vcmp.gt.f32.partialorder %v4941_v27, 0.0  ;;  %vm9586_vm14 = vmmov %vm9552_vm0 }
 0x320   : > { %v4944_v15 = vadd.f32 %v6822_v23, %v8697_v49  ;;  %v5038_v29 = vsel %vm4974_vm13, %v4942_v33, %v5006_v51 }
 0x321   : > { %v4943_v57 = vadd.f32 %v6823_v56, %v8697_v49  ;;  %v6729_v46 = vpop.f32.mrb[22].mxu1  ;;  %v5037_v62 = vsel %vm4973_vm2, %v4941_v27, %v5005_v18 }
 0x322   : > { %v5008_v35 = vmul.f32 0.2, %v4944_v15  ;;  %v6824_v25 = vadd.f32 %v6729_v46, %v6479_v11  ;;  %v4771_v34 = vpop.f32.mrb[23].mxu1  ;;  %6771 = vmatprep.mubr.msk.f32.mxu0 %vm9580_vm8, %v5037_v62  ;;  %vm4976_vm4 = vcmp.gt.f32.partialorder %v4944_v15, 0.0  ;;  %vm9587_vm8 = vmmov %vm9552_vm0 }
 0x323   : > { %v5007_v44 = vmul.f32 0.2, %v4943_v57  ;;  %v6825_v59 = vadd.f32 %v4771_v34, %v2725_v58  ;;  %6772 = vmatmul.mubr.msk.f32.gmra.mrb[66].mxu0 %vm9581_vm11, %v5038_v29  ;;  %vm4975_vm5 = vcmp.gt.f32.partialorder %v4943_v57, 0.0  ;;  %vm9588_vm11 = vmmov %vm9552_vm0 }
 0x324   : > { %v4946_v45 = vadd.f32 %v6824_v25, %v8697_v49  ;;  %v5040_v11 = vsel %vm4976_vm4, %v4944_v15, %v5008_v35 }
 0x325   : > { %v4945_v24 = vadd.f32 %v6825_v59, %v8697_v49  ;;  %v6732_v48 = vpop.f32.mrb[24].mxu1  ;;  %v5039_v17 = vsel %vm4975_vm5, %v4943_v57, %v5007_v44 }
 0x326   : > { %v5010_v28 = vmul.f32 0.2, %v4946_v45  ;;  %v6826_v41 = vadd.f32 %v6732_v48, %v6482_v5  ;;  %v4781_v20 = vpop.f32.mrb[25].mxu1  ;;  %6774 = vmatprep.mubr.msk.f32.mxu0 %vm9582_vm3, %v5039_v17  ;;  %vm4978_vm12 = vcmp.gt.f32.partialorder %v4946_v45, 0.0  ;;  %vm9589_vm3 = vmmov %vm9552_vm0 }
 0x327   : > { %v5009_v40 = vmul.f32 0.2, %v4945_v24  ;;  %v6827_v61 = vadd.f32 %v4781_v20, %v2735_v3  ;;  %6775 = vmatmul.mubr.msk.f32.gmra.mrb[68].mxu0 %vm9583_vm9, %v5040_v11  ;;  %vm4977_vm1 = vcmp.gt.f32.partialorder %v4945_v24, 0.0  ;;  %vm9590_vm9 = vmmov %vm9552_vm0 }
 0x328   : > { %v4948_v58 = vadd.f32 %v6826_v41, %v8697_v49  ;;  %v5042_v7 = vsel %vm4978_vm12, %v4946_v45, %v5010_v28 }
 0x329   : > { %v4947_v21 = vadd.f32 %v6827_v61, %v8697_v49  ;;  %v6735_v47 = vpop.f32.mrb[26].mxu1  ;;  %v5041_v30 = vsel %vm4977_vm1, %v4945_v24, %v5009_v40 }
 0x32a   : > { %v5012_v16 = vmul.f32 0.2, %v4948_v58  ;;  %v6828_v32 = vadd.f32 %v6735_v47, %v8682_v4  ;;  %v4791_v5 = vpop.f32.mrb[27].mxu1  ;;  %6777 = vmatprep.mubr.msk.f32.mxu0 %vm9584_vm10, %v5041_v30  ;;  %vm4980_vm7 = vcmp.gt.f32.partialorder %v4948_v58, 0.0  ;;  %vm9591_vm10 = vmmov %vm9552_vm0 }
 0x32b   : > { %v5011_v0 = vmul.f32 0.2, %v4947_v21  ;;  %v6829_v3 = vadd.f32 %v4791_v5, %v8684_v43  ;;  %6778 = vmatmul.mubr.msk.f32.gmra.mrb[70].mxu0 %vm9552_vm0, %v5042_v7  ;;  %vm4979_vm6 = vcmp.gt.f32.partialorder %v4947_v21, 0.0 }
 0x32c   : > { %v4950_v38 = vadd.f32 %v6828_v32, %v8697_v49  ;;  %v5044_v51 = vsel %vm4980_vm7, %v4948_v58, %v5012_v16 }
 0x32d   : > { %v4949_v33 = vadd.f32 %v6829_v3, %v8697_v49  ;;  %v6738_v27 = vpop.f32.mrb[28].mxu1  ;;  %v5043_v6 = vsel %vm4979_vm6, %v4947_v21, %v5011_v0 }
 0x32e   : > { %v5014_v12 = vmul.f32 0.2, %v4950_v38  ;;  %v6830_v4 = vadd.f32 %v6738_v27, %v8686_v36  ;;  %v4801_v63 = vpop.f32.mrb[29].mxu1  ;;  %6780 = vmatprep.mubr.msk.f32.mxu0 %vm9585_vm15, %v5043_v6  ;;  %vm4982_vm13 = vcmp.gt.f32.partialorder %v4950_v38, 0.0  ;;  %vm9592_vm15 = vmmov %vm9552_vm0 }
 0x32f   : > { %v5013_v23 = vmul.f32 0.2, %v4949_v33  ;;  %v6831_v43 = vadd.f32 %v4801_v63, %v8688_v60  ;;  %6781 = vmatmul.mubr.msk.f32.gmra.mrb[72].mxu0 %vm9586_vm14, %v5044_v51  ;;  %vm4981_vm2 = vcmp.gt.f32.partialorder %v4949_v33, 0.0  ;;  %vm9593_vm14 = vmmov %vm9552_vm0 }
 0x330   : > { %v4952_v42 = vadd.f32 %v6830_v4, %v8697_v49  ;;  %v5046_v62 = vsel %vm4982_vm13, %v4950_v38, %v5014_v12 }
 0x331   : > { %v4951_v18 = vadd.f32 %v6831_v43, %v8697_v49  ;;  %v6741_v56 = vpop.f32.mrb[30].mxu1  ;;  %v5045_v15 = vsel %vm4981_vm2, %v4949_v33, %v5013_v23 }
 0x332   : > { %v5016_v57 = vmul.f32 0.2, %v4952_v42  ;;  %v6832_v36 = vadd.f32 %v6741_v56, %v8690_v54  ;;  %v4811_v46 = vpop.f32.mrb[31].mxu1  ;;  %6783 = vmatprep.mubr.msk.f32.mxu0 %vm9587_vm8, %v5045_v15  ;;  %vm4984_vm4 = vcmp.gt.f32.partialorder %v4952_v42, 0.0  ;;  %vm9594_vm8 = vmmov %vm9552_vm0 }
 0x333   : > { %v5015_v35 = vmul.f32 0.2, %v4951_v18  ;;  %v6833_v60 = vadd.f32 %v4811_v46, %v8692_v8  ;;  %6784 = vmatmul.mubr.msk.f32.gmra.mrb[74].mxu0 %vm9588_vm11, %v5046_v62  ;;  %vm4983_vm5 = vcmp.gt.f32.partialorder %v4951_v18, 0.0  ;;  %vm9595_vm11 = vmmov %vm9552_vm0 }
 0x334   : > { %v4954_v25 = vadd.f32 %v6832_v36, %v8697_v49  ;;  %v5048_v24 = vsel %vm4984_vm4, %v4952_v42, %v5016_v57 }
 0x335   : > { %v4953_v34 = vadd.f32 %v6833_v60, %v8697_v49  ;;  %v6744_v29 = vpop.f32.mrb[0].mxu1  ;;  %v5047_v44 = vsel %vm4983_vm5, %v4951_v18, %v5015_v35 }
 0x336   : > { %v5018_v59 = vmul.f32 0.2, %v4954_v25  ;;  %v6834_v54 = vadd.f32 %v6744_v29, %v8627_v53  ;;  %v4821_v45 = vpop.f32.mrb[1].mxu1  ;;  %6786 = vmatprep.mubr.msk.f32.mxu0 %vm9589_vm3, %v5047_v44  ;;  %vm4986_vm12 = vcmp.gt.f32.partialorder %v4954_v25, 0.0  ;;  %vm9596_vm3 = vmmov %vm9552_vm0 }
 0x337   : > { %v5017_v48 = vmul.f32 0.2, %v4953_v34  ;;  %v6835_v8 = vadd.f32 %v4821_v45, %v8629_v39  ;;  %6787 = vmatmul.mubr.msk.f32.gmra.mrb[76].mxu0 %vm9590_vm9, %v5048_v24  ;;  %vm4985_vm1 = vcmp.gt.f32.partialorder %v4953_v34, 0.0  ;;  %vm9597_vm9 = vmmov %vm9552_vm0 }
 0x338   : > { %v4956_v17 = vadd.f32 %v6834_v54, %v8697_v49  ;;  %v5050_v61 = vsel %vm4986_vm12, %v4954_v25, %v5018_v59 }
 0x339   : > { %v4955_v28 = vadd.f32 %v6835_v8, %v8697_v49  ;;  %v6747_v41 = vpop.f32.mrb[2].mxu1  ;;  %v5049_v20 = vsel %vm4985_vm1, %v4953_v34, %v5017_v48 }
 0x33a   : > { %v5020_v11 = vmul.f32 0.2, %v4956_v17  ;;  %v6836_v53 = vadd.f32 %v6747_v41, %v8638_v50  ;;  %v4831_v40 = vpop.f32.mrb[3].mxu1  ;;  %6789 = vmatprep.mubr.msk.f32.mxu0 %vm9591_vm10, %v5049_v20  ;;  %vm4988_vm7 = vcmp.gt.f32.partialorder %v4956_v17, 0.0  ;;  %vm9598_vm10 = vmmov %vm9552_vm0 }
 0x33b   : > { %v5019_v58 = vmul.f32 0.2, %v4955_v28  ;;  %v6837_v39 = vadd.f32 %v4831_v40, %v8640_v22  ;;  %6790 = vmatmul.mubr.msk.f32.gmra.mrb[78].mxu0 %vm9552_vm0, %v5050_v61  ;;  %vm4987_vm6 = vcmp.gt.f32.partialorder %v4955_v28, 0.0 }
 0x33c   : > { %v4958_v21 = vadd.f32 %v6836_v53, %v8697_v49  ;;  %v5052_v7 = vsel %vm4988_vm7, %v4956_v17, %v5020_v11 }
 0x33d   : > { %v4957_v47 = vadd.f32 %v6837_v39, %v8697_v49  ;;  %v6750_v30 = vpop.f32.mrb[4].mxu1  ;;  %v5051_v16 = vsel %vm4987_vm6, %v4955_v28, %v5019_v58 }
 0x33e   : > { %v5022_v32 = vmul.f32 0.2, %v4958_v21  ;;  %v6838_v50 = vadd.f32 %v6750_v30, %v8649_v2  ;;  %v4841_v5 = vpop.f32.mrb[5].mxu1  ;;  %6792 = vmatprep.mubr.msk.f32.mxu0 %vm9592_vm15, %v5051_v16  ;;  %vm4990_vm13 = vcmp.gt.f32.partialorder %v4958_v21, 0.0  ;;  %vm9599_vm15 = vmmov %vm9552_vm0 }
 0x33f   : > { %v5021_v0 = vmul.f32 0.2, %v4957_v47  ;;  %v6839_v22 = vadd.f32 %v4841_v5, %v8651_v26  ;;  %6793 = vmatmul.mubr.msk.f32.gmra.mrb[80].mxu0 %vm9593_vm14, %v5052_v7  ;;  %vm4989_vm2 = vcmp.gt.f32.partialorder %v4957_v47, 0.0  ;;  %vm9600_vm14 = vmmov %vm9552_vm0 }
 0x340   : > { %v4960_v3 = vadd.f32 %v6838_v50, %v8697_v49  ;;  %v5054_v4 = vsel %vm4990_vm13, %v4958_v21, %v5022_v32 }
 0x341   : > { %v4959_v38 = vadd.f32 %v6839_v22, %v8697_v49  ;;  %v6753_v33 = vpop.f32.mrb[6].mxu1  ;;  %v5053_v27 = vsel %vm4989_vm2, %v4957_v47, %v5021_v0  ;;  %v7085_v22 = vld [vmem:[%s7185_s9 + $0x8] sm:$0xff] }
 0x342   : > { %v5024_v6 = vmul.f32 0.2, %v4960_v3  ;;  %v6840_v2 = vadd.f32 %v6753_v33, %v8661_v37  ;;  %v4851_v12 = vpop.f32.mrb[7].mxu1  ;;  %6795 = vmatprep.mubr.msk.f32.mxu0 %vm9594_vm8, %v5053_v27  ;;  %vm4992_vm4 = vcmp.gt.f32.partialorder %v4960_v3, 0.0  ;;  %vm9601_vm8 = vmmov %vm9552_vm0 }
 0x343   : > { %v5023_v63 = vmul.f32 0.2, %v4959_v38  ;;  %v6841_v26 = vadd.f32 %v4851_v12, %v8663_v10  ;;  %6796 = vmatmul.mubr.msk.f32.gmra.mrb[82].mxu0 %vm9595_vm11, %v5054_v4  ;;  %vm4991_vm5 = vcmp.gt.f32.partialorder %v4959_v38, 0.0  ;;  %vm9602_vm11 = vmmov %vm9552_vm0  ;;  %v7087_v4 = vld [vmem:[%s7185_s9 + $0x18] sm:$0xff] }
 0x344   : > { %v4962_v51 = vadd.f32 %v6840_v2, %v8697_v49  ;;  %v5056_v15 = vsel %vm4992_vm4, %v4960_v3, %v5024_v6 }
 0x345   : > { %v4961_v23 = vadd.f32 %v6841_v26, %v8697_v49  ;;  %v6756_v43 = vpop.f32.mrb[8].mxu1  ;;  %v5055_v42 = vsel %vm4991_vm5, %v4959_v38, %v5023_v63  ;;  %v7086_v38 = vld [vmem:[%s7185_s9] sm:$0xff]  ;;  %v7088_v26 = vld [vmem:[%s7185_s9 + $0x10] sm:$0xff] }
 0x346   : > { %v5026_v18 = vmul.f32 0.2, %v4962_v51  ;;  %v6842_v37 = vadd.f32 %v6756_v43, %v8666_v14  ;;  %v4861_v56 = vpop.f32.mrb[9].mxu1  ;;  %6798 = vmatprep.mubr.msk.f32.mxu0 %vm9596_vm3, %v5055_v42  ;;  %vm4994_vm12 = vcmp.gt.f32.partialorder %v4962_v51, 0.0  ;;  %vm9603_vm3 = vmmov %vm9552_vm0 }
 0x347   : > { %v5025_v57 = vmul.f32 0.2, %v4961_v23  ;;  %v6843_v10 = vadd.f32 %v4861_v56, %v8668_v31  ;;  %6799 = vmatmul.mubr.msk.f32.gmra.mrb[84].mxu0 %vm9597_vm9, %v5056_v15  ;;  %vm4993_vm1 = vcmp.gt.f32.partialorder %v4961_v23, 0.0  ;;  %vm9604_vm9 = vmmov %vm9552_vm0  ;;  %v7090_v15 = vld [vmem:[%s7185_s9 + $0x20] sm:$0xff] }
 0x348   : > { %v4964_v36 = vadd.f32 %v6842_v37, %v8697_v49  ;;  %v5058_v34 = vsel %vm4994_vm12, %v4962_v51, %v5026_v18  ;;  %v7089_v37 = vld [vmem:[%s7185_s9 + $0x28] sm:$0xff] }
 0x349   : > { %v4963_v46 = vadd.f32 %v6843_v10, %v8697_v49  ;;  %v6759_v62 = vpop.f32.mrb[10].mxu1  ;;  %v5057_v35 = vsel %vm4993_vm1, %v4961_v23, %v5025_v57 }
 0x34a   : > { %v5028_v60 = vmul.f32 0.2, %v4964_v36  ;;  %v6844_v14 = vadd.f32 %v6759_v62, %v8670_v9  ;;  %v4871_v25 = vpop.f32.mrb[11].mxu1  ;;  %6801 = vmatprep.mubr.msk.f32.mxu0 %vm9598_vm10, %v5057_v35  ;;  %vm4996_vm7 = vcmp.gt.f32.partialorder %v4964_v36, 0.0  ;;  %vm9605_vm10 = vmmov %vm9552_vm0  ;;  %v7091_v35 = vld [vmem:[%s7185_s9 + $0x38] sm:$0xff] }
 0x34b   : > { %v5027_v29 = vmul.f32 0.2, %v4963_v46  ;;  %v6845_v31 = vadd.f32 %v4871_v25, %v8672_v52  ;;  %6802 = vmatmul.mubr.msk.f32.gmra.mrb[86].mxu0 %vm9552_vm0, %v5058_v34  ;;  %vm4995_vm6 = vcmp.gt.f32.partialorder %v4963_v46, 0.0 }
 0x34c   : > { %v4966_v44 = vadd.f32 %v6844_v14, %v8697_v49  ;;  %v5060_v8 = vsel %vm4996_vm7, %v4964_v36, %v5028_v60  ;;  %v7092_v14 = vld [vmem:[%s7185_s9 + $0x30] sm:$0xff] }
 0x34d   : > { %v4965_v59 = vadd.f32 %v6845_v31, %v8697_v49  ;;  %v6762_v54 = vpop.f32.mrb[12].mxu1  ;;  %v5059_v45 = vsel %vm4995_vm6, %v4963_v46, %v5027_v29  ;;  %vm9606_vm6 = vcmask 64512  }
 0x34e   : > { %v5030_v24 = vmul.f32 0.2, %v4966_v44  ;;  %v6846_v9 = vadd.f32 %v6762_v54, %v8674_v1  ;;  %v4881_v48 = vpop.f32.mrb[13].mxu1  ;;  %6804 = vmatprep.mubr.msk.f32.mxu0 %vm9599_vm15, %v5059_v45  ;;  %vm4998_vm13 = vcmp.gt.f32.partialorder %v4966_v44, 0.0  ;;  %vm9607_vm7 = vmmov %vm9606_vm6  ;;  %v7094_v45 = vld [vmem:[%s7185_s9 + $0x40] sm:$0xff] }
 0x34f   : > { %v5029_v17 = vmul.f32 0.2, %v4965_v59  ;;  %v6847_v52 = vadd.f32 %v4881_v48, %v8676_v55  ;;  %6805 = vmatmul.mubr.msk.f32.gmra.mrb[88].mxu0 %vm9600_vm14, %v5060_v8  ;;  %vm4997_vm2 = vcmp.gt.f32.partialorder %v4965_v59, 0.0  ;;  %vm9608_vm15 = vmmov %vm9606_vm6 }
 0x350   : > { %v4968_v28 = vadd.f32 %v6846_v9, %v8697_v49  ;;  %v5062_v61 = vsel %vm4998_vm13, %v4966_v44, %v5030_v24  ;;  %vm9609_vm14 = vmmov %vm9606_vm6 }
 0x351   : > { %v4967_v41 = vadd.f32 %v6847_v52, %v8697_v49  ;;  %v6765_v20 = vpop.f32.mrb[14].mxu1  ;;  %v5061_v11 = vsel %vm4997_vm2, %v4965_v59, %v5029_v17  ;;  %vm9610_vm2 = vmmov %vm9606_vm6  ;;  %v7093_v59 = vld [vmem:[%s7185_s9 + $0x48] sm:$0xff]  ;;  %v7095_v52 = vld [vmem:[%s7185_s9 + $0x58] sm:$0xff] }
 0x352   : > { %v5032_v53 = vmul.f32 0.2, %v4968_v28  ;;  %v6848_v1 = vadd.f32 %v6765_v20, %v8678_v19  ;;  %v4891_v40 = vpop.f32.mrb[15].mxu1  ;;  %6807 = vmatprep.mubr.msk.f32.mxu0 %vm9601_vm8, %v5061_v11  ;;  %vm5000_vm4 = vcmp.gt.f32.partialorder %v4968_v28, 0.0  ;;  %vm9611_vm13 = vmmov %vm9610_vm2 }
 0x353   : > { %v5031_v58 = vmul.f32 0.2, %v4967_v41  ;;  %v6849_v55 = vadd.f32 %v4891_v40, %v8680_v13  ;;  %6808 = vmatmul.mubr.msk.f32.gmra.mrb[90].mxu0 %vm9602_vm11, %v5062_v61  ;;  %vm4999_vm5 = vcmp.gt.f32.partialorder %v4967_v41, 0.0  ;;  %vm9612_vm8 = vmmov %vm9610_vm2  ;;  %v7097_v61 = vld [vmem:[%s7185_s9 + $0x68] sm:$0xff] }
 0x354   : > { %v4970_v39 = vadd.f32 %v6848_v1, %v8697_v49  ;;  %v5064_v19 = vsel %vm5000_vm4, %v4968_v28, %v5032_v53  ;;  %vm9613_vm11 = vmmov %vm9610_vm2 }
 0x355   : > { %v4969_v21 = vadd.f32 %v6849_v55, %v8697_v49  ;;  %v5063_v47 = vsel %vm4999_vm5, %v4967_v41, %v5031_v58  ;;  %v8788_v49 = vld [vmem:[%s8934_s6] ss:$0 sm:$0xff]  ;;  %vm9614_vm5 = vmmov %vm9610_vm2  ;;  %v7096_v41 = vld [vmem:[%s7185_s9 + $0x50] sm:$0xff] }
 0x356   : > { %v5034_v30 = vmul.f32 0.2, %v4970_v39  ;;  %6810 = vmatprep.mubr.msk.f32.mxu0 %vm9603_vm3, %v5063_v47  ;;  %vm5002_vm12 = vcmp.gt.f32.partialorder %v4970_v39, 0.0  ;;  %vm9615_vm4 = vmmov %vm9610_vm2  ;;  %v7098_v55 = vld [vmem:[%s7185_s9 + $0x60] sm:$0xff] }
 0x357   : > { %v5033_v16 = vmul.f32 0.2, %v4969_v21  ;;  %6811 = vmatmul.mubr.msk.f32.gmra.mrb[92].mxu0 %vm9604_vm9, %v5064_v19  ;;  %vm5001_vm1 = vcmp.gt.f32.partialorder %v4969_v21, 0.0  ;;  %vm9616_vm3 = vmmov %vm9610_vm2 }
 0x358   : > { %v5066_v32 = vsel %vm5002_vm12, %v4970_v39, %v5034_v30  ;;  %vm9617_vm9 = vmmov %vm9610_vm2 }
 0x359   : > { %v5065_v13 = vsel %vm5001_vm1, %v4969_v21, %v5033_v16  ;;  %vm9618_vm1 = vmmov %vm9610_vm2  ;;  %v7099_v16 = vld [vmem:[%s7185_s9 + $0x78] sm:$0xff] }
 0x35a   : > { %6813 = vmatprep.mubr.msk.f32.mxu0 %vm9605_vm10, %v5065_v13  ;;  %vm9619_vm12 = vmmov %vm9618_vm1 }
 0x35b   : > { %6814 = vmatmul.mubr.msk.f32.gmra.mrb[94].mxu0 %vm9552_vm0, %v5066_v32  ;;  %v7100_v32 = vld [vmem:[%s7185_s9 + $0x70] sm:$0xff]  ;;  %vm9620_vm10 = vmmov %vm9618_vm1 }
 0x35c   : > { %vm9621_vm0 = vmmov %vm9618_vm1 }
 0x3f2   : > { %v6770_v50 = vpop.f32.mrb[64].mxu0 }
 0x3f3   : > { %v5246_v5 = vadd.f32 %v6770_v50, %v8788_v49  ;;  %v5240_v7 = vpop.f32.mrb[65].mxu0 }
 0x3f4   : > { %v5241_v0 = vadd.f32 %v8788_v49, %v5240_v7 }
 0x3f5   : > { %v5400_v3 = vadd.f32 %v7085_v22, %v5246_v5 }
 0x3f6   : > { %v5399_v33 = vadd.f32 %v7086_v38, %v5241_v0  ;;  %v6773_v27 = vpop.f32.mrb[66].mxu0 }
 0x3f7   : > { %5432 = vst.msk [vmem:[%s8796_s21 + $0x8] sm:$0xff] %vm9606_vm6, %v5400_v3  ;;  %v5256_v6 = vadd.f32 %v6773_v27, %v8788_v49  ;;  %v5250_v2 = vpop.f32.mrb[67].mxu0  ;;  %v7101_v3 = vld [vmem:[%s7185_s9 + $0x88] sm:$0xff]  ;;  %vm9622_vm6 = vmmov %vm9621_vm0 }
 0x3f8   : > { %5431 = vst.msk [vmem:[%s8796_s21] sm:$0xff] %vm9607_vm7, %v5399_v33  ;;  %v5251_v12 = vadd.f32 %v8788_v49, %v5250_v2  ;;  %v7102_v33 = vld [vmem:[%s7185_s9 + $0x80] sm:$0xff]  ;;  %vm9623_vm7 = vmmov %vm9621_vm0 }
 0x3f9   : > { %v5402_v63 = vadd.f32 %v7087_v4, %v5256_v6 }
 0x3fa   : > { %v5401_v51 = vadd.f32 %v7088_v26, %v5251_v12  ;;  %v6776_v23 = vpop.f32.mrb[68].mxu0 }
 0x3fb   : > { %5434 = vst.msk [vmem:[%s8796_s21 + $0x18] sm:$0xff] %vm9608_vm15, %v5402_v63  ;;  %v5266_v43 = vadd.f32 %v6776_v23, %v8788_v49  ;;  %v5260_v42 = vpop.f32.mrb[69].mxu0  ;;  %v7103_v63 = vld [vmem:[%s7185_s9 + $0x98] sm:$0xff]  ;;  %vm9624_vm15 = vmmov %vm9621_vm0 }
 0x3fc   : > { %5433 = vst.msk [vmem:[%s8796_s21 + $0x10] sm:$0xff] %vm9609_vm14, %v5401_v51  ;;  %v5261_v18 = vadd.f32 %v8788_v49, %v5260_v42  ;;  %v7104_v51 = vld [vmem:[%s7185_s9 + $0x90] sm:$0xff]  ;;  %vm9625_vm14 = vmmov %vm9621_vm0 }
 0x3fd   : > { %v5404_v56 = vadd.f32 %v7089_v37, %v5266_v43 }
 0x3fe   : > { %v5403_v57 = vadd.f32 %v7090_v15, %v5261_v18  ;;  %v6779_v10 = vpop.f32.mrb[70].mxu0 }
 0x3ff   : > { %5436 = vst.msk [vmem:[%s8796_s21 + $0x28] sm:$0xff] %vm9610_vm2, %v5404_v56  ;;  %v5276_v36 = vadd.f32 %v6779_v10, %v8788_v49  ;;  %v5270_v46 = vpop.f32.mrb[71].mxu0  ;;  %v7105_v56 = vld [vmem:[%s7185_s9 + $0xa8] sm:$0xff]  ;;  %vm9626_vm2 = vmmov %vm9621_vm0 }
 0x400   : > { %5435 = vst.msk [vmem:[%s8796_s21 + $0x20] sm:$0xff] %vm9611_vm13, %v5403_v57  ;;  %v5271_v62 = vadd.f32 %v8788_v49, %v5270_v46  ;;  %v7106_v57 = vld [vmem:[%s7185_s9 + $0xa0] sm:$0xff]  ;;  %vm9627_vm13 = vmmov %vm9621_vm0 }
 0x401   : > { %v5406_v60 = vadd.f32 %v7091_v35, %v5276_v36 }
 0x402   : > { %v5405_v25 = vadd.f32 %v7092_v14, %v5271_v62  ;;  %v6782_v34 = vpop.f32.mrb[72].mxu0 }
 0x403   : > { %5438 = vst.msk [vmem:[%s8796_s21 + $0x38] sm:$0xff] %vm9612_vm8, %v5406_v60  ;;  %v5286_v29 = vadd.f32 %v6782_v34, %v8788_v49  ;;  %v5280_v31 = vpop.f32.mrb[73].mxu0  ;;  %v7107_v60 = vld [vmem:[%s7185_s9 + $0xb8] sm:$0xff]  ;;  %vm9628_vm8 = vmmov %vm9621_vm0 }
 0x404   : > { %5437 = vst.msk [vmem:[%s8796_s21 + $0x30] sm:$0xff] %vm9613_vm11, %v5405_v25  ;;  %v5281_v44 = vadd.f32 %v8788_v49, %v5280_v31  ;;  %v7108_v25 = vld [vmem:[%s7185_s9 + $0xb0] sm:$0xff]  ;;  %vm9629_vm11 = vmmov %vm9621_vm0 }
 0x405   : > { %v5408_v54 = vadd.f32 %v7093_v59, %v5286_v29 }
 0x406   : > { %v5407_v24 = vadd.f32 %v7094_v45, %v5281_v44  ;;  %v6785_v9 = vpop.f32.mrb[74].mxu0 }
 0x407   : > { %5440 = vst.msk [vmem:[%s8796_s21 + $0x48] sm:$0xff] %vm9614_vm5, %v5408_v54  ;;  %v5296_v48 = vadd.f32 %v6785_v9, %v8788_v49  ;;  %v5290_v8 = vpop.f32.mrb[75].mxu0  ;;  %v7109_v54 = vld [vmem:[%s7185_s9 + $0xc8] sm:$0xff]  ;;  %vm9630_vm5 = vmmov %vm9621_vm0 }
 0x408   : > { %5439 = vst.msk [vmem:[%s8796_s21 + $0x40] sm:$0xff] %vm9615_vm4, %v5407_v24  ;;  %v5291_v17 = vadd.f32 %v8788_v49, %v5290_v8  ;;  %v7110_v24 = vld [vmem:[%s7185_s9 + $0xc0] sm:$0xff]  ;;  %vm9631_vm4 = vmmov %vm9621_vm0 }
 0x409   : > { %v5410_v28 = vadd.f32 %v7095_v52, %v5296_v48 }
 0x40a   : > { %v5409_v20 = vadd.f32 %v7096_v41, %v5291_v17  ;;  %v6788_v11 = vpop.f32.mrb[76].mxu0 }
 0x40b   : > { %5442 = vst.msk [vmem:[%s8796_s21 + $0x58] sm:$0xff] %vm9616_vm3, %v5410_v28  ;;  %v5306_v53 = vadd.f32 %v6788_v11, %v8788_v49  ;;  %v5300_v1 = vpop.f32.mrb[77].mxu0  ;;  %v7111_v28 = vld [vmem:[%s7185_s9 + $0xd8] sm:$0xff]  ;;  %vm9632_vm3 = vmmov %vm9621_vm0 }
 0x40c   : > { %5441 = vst.msk [vmem:[%s8796_s21 + $0x50] sm:$0xff] %vm9617_vm9, %v5409_v20  ;;  %v5301_v40 = vadd.f32 %v8788_v49, %v5300_v1  ;;  %v7112_v20 = vld [vmem:[%s7185_s9 + $0xd0] sm:$0xff]  ;;  %vm9633_vm9 = vmmov %vm9621_vm0 }
 0x40d   : > { %v5412_v58 = vadd.f32 %v7097_v61, %v5306_v53 }
 0x40e   : > { %v5411_v39 = vadd.f32 %v7098_v55, %v5301_v40  ;;  %v6791_v21 = vpop.f32.mrb[78].mxu0 }
 0x40f   : > { %5444 = vst.msk [vmem:[%s8796_s21 + $0x68] sm:$0xff] %vm9618_vm1, %v5412_v58  ;;  %v5316_v47 = vadd.f32 %v6791_v21, %v8788_v49  ;;  %v5310_v30 = vpop.f32.mrb[79].mxu0  ;;  %v7113_v58 = vld [vmem:[%s7185_s9 + $0xe8] sm:$0xff]  ;;  %vm9634_vm1 = vmmov %vm9621_vm0 }
 0x410   : > { %5443 = vst.msk [vmem:[%s8796_s21 + $0x60] sm:$0xff] %vm9619_vm12, %v5411_v39  ;;  %v5311_v19 = vadd.f32 %v8788_v49, %v5310_v30  ;;  %v7114_v39 = vld [vmem:[%s7185_s9 + $0xe0] sm:$0xff]  ;;  %vm9635_vm12 = vmmov %vm9621_vm0 }
 0x411   : > { %v5414_v13 = vadd.f32 %v7099_v16, %v5316_v47 }
 0x412   : > { %v5413_v50 = vadd.f32 %v7100_v32, %v5311_v19  ;;  %v6794_v5 = vpop.f32.mrb[80].mxu0 }
 0x413   : > { %5446 = vst.msk [vmem:[%s8796_s21 + $0x78] sm:$0xff] %vm9620_vm10, %v5414_v13  ;;  %v5326_v7 = vadd.f32 %v6794_v5, %v8788_v49  ;;  %v5320_v0 = vpop.f32.mrb[81].mxu0  ;;  %v7115_v13 = vld [vmem:[%s7185_s9 + $0xf8] sm:$0xff]  ;;  %vm9636_vm10 = vmmov %vm9621_vm0 }
 0x414   : > { %5445 = vst.msk [vmem:[%s8796_s21 + $0x70] sm:$0xff] %vm9621_vm0, %v5413_v50  ;;  %v5321_v22 = vadd.f32 %v8788_v49, %v5320_v0  ;;  %v7116_v50 = vld [vmem:[%s7185_s9 + $0xf0] sm:$0xff] }
 0x415   : > { %v5416_v38 = vadd.f32 %v7101_v3, %v5326_v7 }
 0x416   : > { %v5415_v27 = vadd.f32 %v7102_v33, %v5321_v22  ;;  %v6797_v6 = vpop.f32.mrb[82].mxu0 }
 0x417   : > { %5448 = vst.msk [vmem:[%s8796_s21 + $0x88] sm:$0xff] %vm9622_vm6, %v5416_v38  ;;  %v5336_v2 = vadd.f32 %v6797_v6, %v8788_v49  ;;  %v5330_v12 = vpop.f32.mrb[83].mxu0 }
 0x418   : > { %5447 = vst.msk [vmem:[%s8796_s21 + $0x80] sm:$0xff] %vm9623_vm7, %v5415_v27  ;;  %v5331_v4 = vadd.f32 %v8788_v49, %v5330_v12 }
 0x419   : > { %v5418_v26 = vadd.f32 %v7103_v63, %v5336_v2 }
 0x41a   : > { %v5417_v23 = vadd.f32 %v7104_v51, %v5331_v4  ;;  %v6800_v43 = vpop.f32.mrb[84].mxu0 }
 0x41b   : > { %5450 = vst.msk [vmem:[%s8796_s21 + $0x98] sm:$0xff] %vm9624_vm15, %v5418_v26  ;;  %v5346_v42 = vadd.f32 %v6800_v43, %v8788_v49  ;;  %v5340_v18 = vpop.f32.mrb[85].mxu0 }
 0x41c   : > { %5449 = vst.msk [vmem:[%s8796_s21 + $0x90] sm:$0xff] %vm9625_vm14, %v5417_v23  ;;  %v5341_v37 = vadd.f32 %v8788_v49, %v5340_v18 }
 0x41d   : > { %v5420_v15 = vadd.f32 %v7105_v56, %v5346_v42 }
 0x41e   : > { %v5419_v10 = vadd.f32 %v7106_v57, %v5341_v37  ;;  %v6803_v36 = vpop.f32.mrb[86].mxu0 }
 0x41f   : > { %5452 = vst.msk [vmem:[%s8796_s21 + $0xa8] sm:$0xff] %vm9626_vm2, %v5420_v15  ;;  %v5356_v46 = vadd.f32 %v6803_v36, %v8788_v49  ;;  %v5350_v62 = vpop.f32.mrb[87].mxu0 }
 0x420   : > { %5451 = vst.msk [vmem:[%s8796_s21 + $0xa0] sm:$0xff] %vm9627_vm13, %v5419_v10  ;;  %v5351_v35 = vadd.f32 %v8788_v49, %v5350_v62 }
 0x421   : > { %v5422_v14 = vadd.f32 %v7107_v60, %v5356_v46 }
 0x422   : > { %v5421_v34 = vadd.f32 %v7108_v25, %v5351_v35  ;;  %v6806_v29 = vpop.f32.mrb[88].mxu0 }
 0x423   : > { %5454 = vst.msk [vmem:[%s8796_s21 + $0xb8] sm:$0xff] %vm9628_vm8, %v5422_v14  ;;  %v5366_v31 = vadd.f32 %v6806_v29, %v8788_v49  ;;  %v5360_v44 = vpop.f32.mrb[89].mxu0 }
 0x424   : > { %5453 = vst.msk [vmem:[%s8796_s21 + $0xb0] sm:$0xff] %vm9629_vm11, %v5421_v34  ;;  %v5361_v59 = vadd.f32 %v8788_v49, %v5360_v44 }
 0x425   : > { %v5424_v45 = vadd.f32 %v7109_v54, %v5366_v31 }
 0x426   : > { %v5423_v9 = vadd.f32 %v7110_v24, %v5361_v59  ;;  %v6809_v48 = vpop.f32.mrb[90].mxu0 }
 0x427   : > { %5456 = vst.msk [vmem:[%s8796_s21 + $0xc8] sm:$0xff] %vm9630_vm5, %v5424_v45  ;;  %v5376_v8 = vadd.f32 %v6809_v48, %v8788_v49  ;;  %v5370_v17 = vpop.f32.mrb[91].mxu0 }
 0x428   : > { %5455 = vst.msk [vmem:[%s8796_s21 + $0xc0] sm:$0xff] %vm9631_vm4, %v5423_v9  ;;  %v5371_v52 = vadd.f32 %v8788_v49, %v5370_v17 }
 0x429   : > { %v5426_v41 = vadd.f32 %v7111_v28, %v5376_v8 }
 0x42a   : > { %v5425_v11 = vadd.f32 %v7112_v20, %v5371_v52  ;;  %v6812_v53 = vpop.f32.mrb[92].mxu0 }
 0x42b   : > { %5458 = vst.msk [vmem:[%s8796_s21 + $0xd8] sm:$0xff] %vm9632_vm3, %v5426_v41  ;;  %v5386_v1 = vadd.f32 %v6812_v53, %v8788_v49  ;;  %v5380_v40 = vpop.f32.mrb[93].mxu0 }
 0x42c   : > { %5457 = vst.msk [vmem:[%s8796_s21 + $0xd0] sm:$0xff] %vm9633_vm9, %v5425_v11  ;;  %v5381_v61 = vadd.f32 %v8788_v49, %v5380_v40 }
 0x42d   : > { %v5428_v55 = vadd.f32 %v7113_v58, %v5386_v1 }
 0x42e   : > { %v5427_v21 = vadd.f32 %v7114_v39, %v5381_v61  ;;  %v6815_v47 = vpop.f32.mrb[94].mxu0 }
 0x42f   : > { %5460 = vst.msk [vmem:[%s8796_s21 + $0xe8] sm:$0xff] %vm9634_vm1, %v5428_v55  ;;  %v5396_v30 = vadd.f32 %v6815_v47, %v8788_v49  ;;  %v5390_v19 = vpop.f32.mrb[95].mxu0 }
 0x430   : > { %5459 = vst.msk [vmem:[%s8796_s21 + $0xe0] sm:$0xff] %vm9635_vm12, %v5427_v21  ;;  %v5391_v16 = vadd.f32 %v8788_v49, %v5390_v19 }
 0x431   : > { %v5430_v32 = vadd.f32 %v7115_v13, %v5396_v30 }
 0x432   : > { %v5429_v5 = vadd.f32 %v7116_v50, %v5391_v16 }
 0x433   : > { %5462 = vst.msk [vmem:[%s8796_s21 + $0xf8] sm:$0xff] %vm9636_vm10, %v5430_v32 }
 0x434   : > { %5461 = vst.msk [vmem:[%s8796_s21 + $0xf0] sm:$0xff] %vm9621_vm0, %v5429_v5 }
 0x435 PF: > { %s17_s24 = sadd.s32 1, %s7123_s24  }
 0x436   : > { %p14_p4 = scmp.ge.s32.totalorder %s17_s24, 4  }
 0x438   :  { %16 = sbr.rel (!%p14_p4) target bundleno = 1 (0x1), region = 86 }

</bundles_post_ra>
